<compile_context>
chip_gen: v6e
topology: v6e:2x2x1
jax: 0.10.0
libtpu: 0.0.40
codegen_flags: <defaults>
</compile_context>

<pallas_src>
import jax
import jax.numpy as jnp
from jax.experimental import pallas as pl
from jax.experimental.pallas import tpu as pltpu

F_IN = 256     # input feature dim fed to the (synthetic) feature extractor
HID = 512      # hidden width of the RND predictor
OUT = 1        # predictor output width


def _rnd_kernel(x_ref, wf_ref, w01_ref, w2_ref, b_ref, o_ref):
    # x tile: (TB, F_IN) in its native dtype; cast to bf16 in-kernel (VPU work hidden
    # under MXU slack, and it halves activation HBM traffic vs a wrapper-side cast).
    x = x_ref[...].astype(jnp.bfloat16)

    # Bias slab (f32): rows 0..2 = bf, b0, b1; row 3, col 0 = b2.
    bf = b_ref[0:1, :]          # (1, HID)
    b0 = b_ref[1:2, :]
    b1 = b_ref[2:3, :]
    b2 = b_ref[3:4, 0:1]        # (1, 1)

    # feature_extractor: Linear(F_IN, HID) + ReLU  (bf16 MXU, f32 accumulate)
    f = jnp.dot(x, wf_ref[...], preferred_element_type=jnp.float32)
    f = jnp.maximum(f + bf, 0.0)

    # predictor[0]: Linear(HID, HID) + ReLU
    h = jnp.dot(f.astype(jnp.bfloat16), w01_ref[:, :HID],
                preferred_element_type=jnp.float32)
    h = jnp.maximum(h + b0, 0.0)

    # predictor[2]: Linear(HID, HID) + ReLU
    h = jnp.dot(h.astype(jnp.bfloat16), w01_ref[:, HID:],
                preferred_element_type=jnp.float32)
    h = jnp.maximum(h + b1, 0.0)

    # predictor[4]: Linear(HID, 1) as a VPU multiply + lane reduction (avoids an N=1
    # MXU matmul / weight swap); w2 is pre-transposed to (1, HID).  The per-row scalars
    # are written along lanes so the store into the (1, 1, TB) block is unmasked and
    # lane-dense.
    w2 = w2_ref[...].astype(jnp.float32)                 # (1, HID)
    row = jnp.sum(h * w2, axis=-1)[None, :] + b2         # (1, TB) f32
    o_ref[...] = row.reshape(o_ref.shape).astype(o_ref.dtype)


def _round_up(n, m):
    return ((n + m - 1) // m) * m


def _pick_batch_tile(batch):
    """Batch-tile heuristic.

    Big tiles amortize the ~0.35us per-grid-step overhead (the weights stay
    VMEM-resident regardless of TB, so TB is not tied to the MXU shape).  On v7x
    keep >=2 grid tiles so the "parallel" batch axis shards across both TensorCores.
    """
    tb = min(1024, max(128, _round_up(batch, 128)))
    try:
        kind = jax.devices()[0].device_kind.lower()
    except Exception:
        kind = ""
    if "v7" in kind and batch > 128:
        tb = min(tb, max(128, _round_up(pl.cdiv(batch, 2), 128)))
    return tb


def prepare_params(params):
    """One-time parameter packing/casting, hoisted out of the per-call hot path.

    w0|w1 are concatenated into one bf16 slab, w2 is pre-transposed to a bf16 row and
    the four biases are packed into one f32 (4, HID) slab -> 4 weight DMAs per kernel
    instead of 8 and no per-call XLA concat/cast passes.
    """
    wf, bf, w0, b0, w1, b1, w2, b2 = params
    bf16 = jnp.bfloat16
    wf_bf = wf.astype(bf16)                                   # (F_IN, HID)
    w01_bf = jnp.concatenate([w0, w1], axis=1).astype(bf16)   # (HID, 2*HID)
    w2_row = jnp.transpose(w2).astype(bf16)                   # (OUT, HID) == (1, HID)
    # TODO(synk): this b2 packing assumes OUT == 1.
    b2_row = jnp.zeros((1, HID), jnp.float32).at[0, 0].set(b2[0, 0])
    b_all = jnp.concatenate([bf, b0, b1, b2_row], axis=0)     # (4, HID) f32
    return wf_bf, w01_bf, w2_row, b_all


def rnd_forward(x, packed_params, *, tb=None):
    """x: [B, F_IN] (any float dtype) -> [B, 1] float32."""
    wf_bf, w01_bf, w2_row, b_all = packed_params
    B = x.shape[0]
    if tb is None:
        tb = _pick_batch_tile(B)
    nb = pl.cdiv(B, tb)

    # Advisory cost estimate so XLA schedules neighboring ops around the kernel.
    flops = 2 * nb * tb * (F_IN * HID + 2 * HID * HID + HID)
    bytes_accessed = (B * F_IN * x.dtype.itemsize
                      + (wf_bf.size + w01_bf.size + w2_row.size) * 2
                      + b_all.size * 4
                      + nb * tb * 4)

    out = pl.pallas_call(
        _rnd_kernel,
        out_shape=jax.ShapeDtypeStruct((nb, 1, tb), jnp.float32),
        grid=(nb,),
        in_specs=[
            pl.BlockSpec((tb, F_IN), lambda i: (i, 0)),        # activations, tiled on batch
            pl.BlockSpec((F_IN, HID), lambda i: (0, 0)),       # wf  (VMEM-resident)
            pl.BlockSpec((HID, 2 * HID), lambda i: (0, 0)),    # w0 | w1
            pl.BlockSpec((1, HID), lambda i: (0, 0)),          # w2 (row layout)
            pl.BlockSpec((4, HID), lambda i: (0, 0)),          # bias slab
        ],
        out_specs=pl.BlockSpec((1, 1, tb), lambda i: (i, 0, 0)),   # lane-dense output
        compiler_params=pltpu.CompilerParams(
            dimension_semantics=("parallel",),   # shards batch tiles across v7x's 2 TCs
            vmem_limit_bytes=32 << 20,
        ),
        cost_estimate=pl.CostEstimate(flops=flops, transcendentals=0,
                                      bytes_accessed=bytes_accessed),
    )(x, wf_bf, w01_bf, w2_row, b_all)

    # (nb, 1, tb) -> (nb*tb, 1); rows past B come from the ragged last tile (undefined
    # data, but all ops are row-local) and are dropped here.
    return out.reshape(-1, 1)[:B]


def init_params(key):
    """Deterministic synthetic parameters (uniform fan-in scaling like nn.Linear)."""
    def linear(key, d_in, d_out):
        kw, kb = jax.random.split(key)
        bound = 1.0 / jnp.sqrt(d_in)
        w = jax.random.uniform(kw, (d_in, d_out), jnp.float32, -bound, bound)
        b = jax.random.uniform(kb, (1, d_out), jnp.float32, -bound, bound)
        return w, b

    k0, k1, k2, k3 = jax.random.split(key, 4)
    wf, bf = linear(k0, F_IN, HID)   # feature_extractor
    w0, b0 = linear(k1, HID, HID)    # predictor[0]
    w1, b1 = linear(k2, HID, HID)    # predictor[2]
    w2, b2 = linear(k3, HID, OUT)    # predictor[4]
    return (wf, bf, w0, b0, w1, b1, w2, b2)


def rnd_reference(x, params):
    """Pure-JAX reference applying the same bf16 casts / f32 accumulation as the kernel."""
    wf, bf, w0, b0, w1, b1, w2, b2 = params
    bf16 = jnp.bfloat16
    f = jnp.dot(x.astype(bf16), wf.astype(bf16),
                preferred_element_type=jnp.float32) + bf
    f = jnp.maximum(f, 0.0)
    h = jnp.dot(f.astype(bf16), w0.astype(bf16),
                preferred_element_type=jnp.float32) + b0
    h = jnp.maximum(h, 0.0)
    h = jnp.dot(h.astype(bf16), w1.astype(bf16),
                preferred_element_type=jnp.float32) + b1
    h = jnp.maximum(h, 0.0)
    w2_row = jnp.transpose(w2).astype(bf16).astype(jnp.float32)   # (1, HID)
    return jnp.sum(h * w2_row, axis=-1, keepdims=True) + b2


if __name__ == "__main__":
    key = jax.random.PRNGKey(0)
    kx, kp = jax.random.split(key)

    B = 37  # small batch, not a multiple of the tile -> exercises the ragged last tile
    x = jax.random.normal(kx, (B, F_IN), jnp.float32)
    params = init_params(kp)
    packed = prepare_params(params)        # one-time packing, out of the hot path

    fwd = jax.jit(rnd_forward)
    out = fwd(x, packed)
    out = jax.block_until_ready(out)

    ref = rnd_reference(x, params)
    assert out.shape == (B, OUT)
    assert jnp.allclose(out, ref, atol=2e-2, rtol=2e-2), "mismatch vs JAX reference"
    print("KERNEL_OK")
</pallas_src>

<mosaic_0001>
module attributes {stable_mosaic.version = 11 : i64} {
  func.func @_rnd_kernel(%arg0: i32, %arg1: memref<128x256xf32, #tpu.memory_space<vmem>>, %arg2: memref<256x512xbf16, #tpu.memory_space<vmem>>, %arg3: memref<512x1024xbf16, #tpu.memory_space<vmem>>, %arg4: memref<1x512xbf16, #tpu.memory_space<vmem>>, %arg5: memref<4x512xf32, #tpu.memory_space<vmem>>, %arg6: memref<1x1x128xf32, #tpu.memory_space<vmem>>) attributes {dimension_semantics = [#tpu.dimension_semantics<parallel>], iteration_bounds = array<i64: 1>, scalar_prefetch = 0 : i64, scratch_operands = 0 : i64, tpu.core_type = #tpu.core_type<tc>, window_params = [{transform_indices = @transform_0, window_bounds = array<i64: 128, 256>}, {pipeline_mode = #tpu.pipeline_mode<synchronous>, transform_indices = @transform_1, window_bounds = array<i64: 256, 512>}, {pipeline_mode = #tpu.pipeline_mode<synchronous>, transform_indices = @transform_2, window_bounds = array<i64: 512, 1024>}, {pipeline_mode = #tpu.pipeline_mode<synchronous>, transform_indices = @transform_3, window_bounds = array<i64: 1, 512>}, {pipeline_mode = #tpu.pipeline_mode<synchronous>, transform_indices = @transform_4, window_bounds = array<i64: 4, 512>}, {transform_indices = @transform_5, window_bounds = array<i64: 1, 1, 128>}]} {
    %c0 = arith.constant 0 : index
    %c0_0 = arith.constant 0 : index
    %0 = vector.load %arg1[%c0, %c0_0] : memref<128x256xf32, #tpu.memory_space<vmem>>, vector<128x256xf32>
    %1 = arith.truncf %0 : vector<128x256xf32> to vector<128x256xbf16>
    %c0_1 = arith.constant 0 : index
    %c0_2 = arith.constant 0 : index
    %2 = vector.load %arg5[%c0_1, %c0_2] : memref<4x512xf32, #tpu.memory_space<vmem>>, vector<1x512xf32>
    %c1 = arith.constant 1 : index
    %c0_3 = arith.constant 0 : index
    %3 = vector.load %arg5[%c1, %c0_3] : memref<4x512xf32, #tpu.memory_space<vmem>>, vector<1x512xf32>
    %c2 = arith.constant 2 : index
    %c0_4 = arith.constant 0 : index
    %4 = vector.load %arg5[%c2, %c0_4] : memref<4x512xf32, #tpu.memory_space<vmem>>, vector<1x512xf32>
    %c3 = arith.constant 3 : index
    %c0_5 = arith.constant 0 : index
    %5 = vector.load %arg5[%c3, %c0_5] : memref<4x512xf32, #tpu.memory_space<vmem>>, vector<1x1xf32>
    %c0_6 = arith.constant 0 : index
    %c0_7 = arith.constant 0 : index
    %6 = vector.load %arg2[%c0_6, %c0_7] : memref<256x512xbf16, #tpu.memory_space<vmem>>, vector<256x512xbf16>
    %cst = arith.constant dense<0.000000e+00> : vector<128x512xf32>
    %7 = tpu.matmul %1, %6, %cst {dimension_numbers = #tpu.dot_dimension_numbers<[1], [0], [0], [1], [0, 0, 1, 1], [], []>} : vector<128x256xbf16>, vector<256x512xbf16>, vector<128x512xf32> -> vector<128x512xf32>
    %8 = vector.broadcast %2 : vector<1x512xf32> to vector<128x512xf32>
    %9 = arith.addf %7, %8 : vector<128x512xf32>
    %cst_8 = arith.constant 0.000000e+00 : f32
    %10 = vector.broadcast %cst_8 : f32 to vector<128x512xf32>
    %11 = arith.maximumf %9, %10 : vector<128x512xf32>
    %12 = arith.truncf %11 : vector<128x512xf32> to vector<128x512xbf16>
    %c0_9 = arith.constant 0 : index
    %c0_10 = arith.constant 0 : index
    %13 = vector.load %arg3[%c0_9, %c0_10] : memref<512x1024xbf16, #tpu.memory_space<vmem>>, vector<512x512xbf16>
    %cst_11 = arith.constant dense<0.000000e+00> : vector<128x512xf32>
    %14 = tpu.matmul %12, %13, %cst_11 {dimension_numbers = #tpu.dot_dimension_numbers<[1], [0], [0], [1], [0, 0, 1, 1], [], []>} : vector<128x512xbf16>, vector<512x512xbf16>, vector<128x512xf32> -> vector<128x512xf32>
    %15 = vector.broadcast %3 : vector<1x512xf32> to vector<128x512xf32>
    %16 = arith.addf %14, %15 : vector<128x512xf32>
    %cst_12 = arith.constant 0.000000e+00 : f32
    %17 = vector.broadcast %cst_12 : f32 to vector<128x512xf32>
    %18 = arith.maximumf %16, %17 : vector<128x512xf32>
    %19 = arith.truncf %18 : vector<128x512xf32> to vector<128x512xbf16>
    %c0_13 = arith.constant 0 : index
    %c512 = arith.constant 512 : index
    %20 = vector.load %arg3[%c0_13, %c512] : memref<512x1024xbf16, #tpu.memory_space<vmem>>, vector<512x512xbf16>
    %cst_14 = arith.constant dense<0.000000e+00> : vector<128x512xf32>
    %21 = tpu.matmul %19, %20, %cst_14 {dimension_numbers = #tpu.dot_dimension_numbers<[1], [0], [0], [1], [0, 0, 1, 1], [], []>} : vector<128x512xbf16>, vector<512x512xbf16>, vector<128x512xf32> -> vector<128x512xf32>
    %22 = vector.broadcast %4 : vector<1x512xf32> to vector<128x512xf32>
    %23 = arith.addf %21, %22 : vector<128x512xf32>
    %cst_15 = arith.constant 0.000000e+00 : f32
    %24 = vector.broadcast %cst_15 : f32 to vector<128x512xf32>
    %25 = arith.maximumf %23, %24 : vector<128x512xf32>
    %c0_16 = arith.constant 0 : index
    %c0_17 = arith.constant 0 : index
    %26 = vector.load %arg4[%c0_16, %c0_17] : memref<1x512xbf16, #tpu.memory_space<vmem>>, vector<1x512xbf16>
    %27 = arith.extf %26 : vector<1x512xbf16> to vector<1x512xf32>
    %28 = vector.broadcast %27 : vector<1x512xf32> to vector<128x512xf32>
    %29 = arith.mulf %25, %28 : vector<128x512xf32>
    %cst_18 = arith.constant dense<0.000000e+00> : vector<128xf32>
    %30 = vector.multi_reduction <add>, %29, %cst_18 [1] : vector<128x512xf32> to vector<128xf32>
    %31 = vector.shape_cast %30 : vector<128xf32> to vector<1x128xf32>
    %32 = vector.broadcast %5 : vector<1x1xf32> to vector<1x128xf32>
    %33 = arith.addf %31, %32 : vector<1x128xf32>
    %34 = vector.shape_cast %33 : vector<1x128xf32> to vector<1x1x128xf32>
    %c0_19 = arith.constant 0 : index
    %c0_20 = arith.constant 0 : index
    %c0_21 = arith.constant 0 : index
    %35 = vector.load %arg6[%c0_19, %c0_20, %c0_21] : memref<1x1x128xf32, #tpu.memory_space<vmem>>, vector<1x1x128xf32>
    tpu.vector_store %arg6[%c0_19, %c0_20, %c0_21], %34 {strides = array<i32>} : memref<1x1x128xf32, #tpu.memory_space<vmem>>, vector<1x1x128xf32>,
    return
  }
  func.func @transform_0(%arg0: i32) -> (i32, i32) {
    %c0_i32 = arith.constant 0 : i32
    %c0_i32_0 = arith.constant 0 : i32
    return %arg0, %c0_i32 : i32, i32
  }
  func.func @transform_1(%arg0: i32) -> (i32, i32) {
    %c0_i32 = arith.constant 0 : i32
    %c0_i32_0 = arith.constant 0 : i32
    %c0_i32_1 = arith.constant 0 : i32
    return %c0_i32, %c0_i32_0 : i32, i32
  }
  func.func @transform_2(%arg0: i32) -> (i32, i32) {
    %c0_i32 = arith.constant 0 : i32
    %c0_i32_0 = arith.constant 0 : i32
    %c0_i32_1 = arith.constant 0 : i32
    return %c0_i32, %c0_i32_0 : i32, i32
  }
  func.func @transform_3(%arg0: i32) -> (i32, i32) {
    %c0_i32 = arith.constant 0 : i32
    %c0_i32_0 = arith.constant 0 : i32
    %c0_i32_1 = arith.constant 0 : i32
    return %c0_i32, %c0_i32_0 : i32, i32
  }
  func.func @transform_4(%arg0: i32) -> (i32, i32) {
    %c0_i32 = arith.constant 0 : i32
    %c0_i32_0 = arith.constant 0 : i32
    %c0_i32_1 = arith.constant 0 : i32
    return %c0_i32, %c0_i32_0 : i32, i32
  }
  func.func @transform_5(%arg0: i32) -> (i32, i32, i32) {
    %c0_i32 = arith.constant 0 : i32
    %c0_i32_0 = arith.constant 0 : i32
    %c0_i32_1 = arith.constant 0 : i32
    return %arg0, %c0_i32, %c0_i32_0 : i32, i32, i32
  }
}

</mosaic_0001>

<bundles_post_ra>
// kernel: rnd_forward.1
= control target key start
LH: loop header
LB: loop body
LE: loop exit
PB: predicated region body
PF: predicated region fallthrough
CT: control target
= control target key end

     0   :  { %10 = vsyncpa [#allocation3], 0  ;;  %s5614_s0 = inlined_call_operand.hbm [shape: f32[37,256], index: 0, kind: input, shape index: {}]   ;;  %s5615_s1 = inlined_call_operand.hbm [shape: bf16[256,512], index: 1, kind: input, shape index: {}]   ;;  %s5616_s2 = inlined_call_operand.hbm [shape: bf16[512,1024], index: 2, kind: input, shape index: {}]   ;;  %s5617_s3 = inlined_call_operand.vmem [shape: bf16[1,512], index: 3, kind: input, shape index: {}]   ;;  %s5618_s4 = inlined_call_operand.hbm [shape: f32[4,512], index: 4, kind: input, shape index: {}]   ;;  %s5619_s5 = inlined_call_operand.vmem [shape: f32[1,1,128], index: 5, kind: output, shape index: {}]  }
   0x1   :  { %11 = vsyncpa [#allocation5], 0 }
   0x2   :  { %12 = vsyncpa [#allocation8], 0 }
   0x3   :  { %17 = vsyncadd [#allocation3], 2816  ;;  %s4411_s18 = smov [#allocation4]   ;;  %s4412_s20 = smov [#allocation2]  }
   0x4   :  { %s30_s19 = sshll.u32 %s4411_s18, 4  ;;  %s18_s21 = sshll.u32 %s4412_s20, 4  ;;  %s31_s19 = int_to_ptr.vmem [resolvable:$true] %s30_s19  ;;  %s19_s21 = int_to_ptr.vmem [resolvable:$true] %s18_s21 }
   0x5   :  { %s4333_s22 = scalar_lea.vmem %s31_s19, 8192  ;;  %p4338_p1 = scmp.lt.s32.totalorder %s31_s19, %s31_s19 }
   0x6   :  { %p4334_p0 = scmp.ne.s32.totalorder %s31_s19, %s4333_s22  ;;  %p4339_p2 = scmp.lt.s32.totalorder %s4333_s22, %s4333_s22 }
   0x8   :  { %p4340_p3 = por %p4339_p2, %p4338_p1 }
   0xa   :  { %p4341_p4 = pnand %p4340_p3, %p4334_p0 }
   0xc   :  { %4344 = shalt.err (!%p4341_p4)
}
   0xd   :  { %s4413_s23 = smov 256   ;;  %s4414_s24 = smov 16  }
   0xe   :  { %36 = dma.hbm_to_vmem [thread:$0]  %s5615_s1, 8192, %s31_s19, [#allocation5], %s4413_s23, %s4413_s23, %s4414_s24  }
   0xf   :  { %s4353_s27 = scalar_lea.vmem %s19_s21, 1280  ;;  %s4357_s28 = scalar_lea.vmem %s19_s21, 4096 }
  0x10   :  { %p4354_p5 = scmp.ne.s32.totalorder %s19_s21, %s4353_s27  ;;  %p4358_p6 = scmp.lt.s32.totalorder %s19_s21, %s19_s21 }
  0x11   :  { %p4359_p7 = scmp.lt.s32.totalorder %s4357_s28, %s4353_s27 }
  0x13   :  { %p4360_p8 = por %p4359_p7, %p4358_p6 }
  0x15   :  { %p4361_p9 = pnand %p4360_p8, %p4354_p5 }
  0x17   :  { %4364 = shalt.err (!%p4361_p9)
}
  0x18   :  { %24 = dma.hbm_to_vmem [thread:$0]  %s5614_s0, 1280, %s19_s21, [#allocation3], %s4413_s23, %s4413_s23, %s4414_s24  }
  0x19   :  { %s4415_s6 = smov [#allocation6]  }
  0x1a   :  { %s42_s7 = sshll.u32 %s4415_s6, 4  ;;  %s43_s7 = int_to_ptr.vmem [resolvable:$true] %s42_s7 }
  0x1b   :  { %s4373_s8 = scalar_lea.vmem %s43_s7, 32768  ;;  %p4378_p11 = scmp.lt.s32.totalorder %s43_s7, %s43_s7 }
  0x1c   :  { %p4374_p10 = scmp.ne.s32.totalorder %s43_s7, %s4373_s8  ;;  %p4379_p12 = scmp.lt.s32.totalorder %s4373_s8, %s4373_s8 }
  0x1e   :  { %p4380_p13 = por %p4379_p12, %p4378_p11 }
  0x20   :  { %p4381_p0 = pnand %p4380_p13, %p4374_p10 }
  0x22   :  { %4384 = shalt.err (!%p4381_p0)
}
  0x23   :  { %s4416_s1 = smov 512   ;;  %s4417_s9 = smov 32  }
  0x24   :  { %48 = dma.hbm_to_vmem [thread:$0]  %s5616_s2, 32768, %s43_s7, [#allocation5], %s4416_s1, %s4416_s1, %s4417_s9  }
  0x25   :  { %s4418_s12 = smov [#allocation7]  }
  0x26   :  { %s57_s13 = sshll.u32 %s4418_s12, 4  ;;  %s58_s13 = int_to_ptr.vmem [resolvable:$true] %s57_s13 }
  0x27   :  { %s4393_s0 = scalar_lea.vmem %s58_s13, 256  ;;  %p4398_p2 = scmp.lt.s32.totalorder %s58_s13, %s58_s13 }
  0x28   :  { %p4394_p1 = scmp.ne.s32.totalorder %s58_s13, %s4393_s0  ;;  %p4399_p3 = scmp.lt.s32.totalorder %s4393_s0, %s4393_s0 }
  0x2a   :  { %p4400_p4 = por %p4399_p3, %p4398_p2 }
  0x2c   :  { %p4401_p5 = pnand %p4400_p4, %p4394_p1 }
  0x2e   :  { %4404 = shalt.err (!%p4401_p5)
}
  0x2f   :  { %60 = dma.hbm_to_vmem [thread:$0]  %s5618_s4, 256, %s58_s13, [#allocation8]  }
  0x30   :  { %4405 = dma.done.wait [#allocation3], 4096  }
  0x31   :  { %4406 = vsyncadd [#allocation3], 4294963200 }
  0x32   :  { %4407 = dma.done.wait [#allocation5], 40960  }
  0x33   :  { %4408 = vsyncadd [#allocation5], 4294926336 }
  0x34   :  { %4409 = dma.done.wait [#allocation8], 256  }
  0x35   :  { %4410 = vsyncadd [#allocation8], 4294967040  ;;  %v4229_v0 = vld [vmem:[#allocation4 + $0xe4] ss:$16 sps:$4 sm:$0xff]   ;;  %v4231_v1 = vld [vmem:[#allocation4 + $0xec] ss:$16 sps:$4 sm:$0xff]  }
  0x36   :  { %532 = vmatprep.subr.bf16.mxu0 %v4229_v0  ;;  %v4233_v2 = vld [vmem:[#allocation4 + $0xe0] ss:$16 sps:$4 sm:$0xff]   ;;  %v4234_v3 = vld [vmem:[#allocation4 + $0xe8] ss:$16 sps:$4 sm:$0xff]   ;;  %645 = vmatprep.subr.bf16.mxu1 %v4231_v1  ;;  %v4235_v4 = vld [vmem:[#allocation4 + $0xc4] ss:$16 sps:$4 sm:$0xff]  }
  0x37   :  { %533 = vmatpush1.bf16.msra.mxu0 %v4233_v2  ;;  %646 = vmatpush1.bf16.msra.mxu1 %v4234_v3  ;;  %v4237_v5 = vld [vmem:[#allocation4 + $0xcc] ss:$16 sps:$4 sm:$0xff]   ;;  %v4239_v6 = vld [vmem:[#allocation4 + $0xc0] ss:$16 sps:$4 sm:$0xff]   ;;  %v4240_v7 = vld [vmem:[#allocation4 + $0xc8] ss:$16 sps:$4 sm:$0xff]  }
  0x38   :  { %534 = vmatprep.subr.bf16.mxu0 %v4235_v4  ;;  %647 = vmatprep.subr.bf16.mxu1 %v4237_v5  ;;  %v4241_v8 = vld [vmem:[#allocation4 + $0xa4] ss:$16 sps:$4 sm:$0xff]   ;;  %v4243_v9 = vld [vmem:[#allocation4 + $0xac] ss:$16 sps:$4 sm:$0xff]   ;;  %v4245_v10 = vld [vmem:[#allocation4 + $0xa0] ss:$16 sps:$4 sm:$0xff]  }
  0x39   :  { %v4246_v11 = vld [vmem:[#allocation4 + $0xa8] ss:$16 sps:$4 sm:$0xff]   ;;  %v4247_v12 = vld [vmem:[#allocation4 + $0x84] ss:$16 sps:$4 sm:$0xff]   ;;  %v4249_v13 = vld [vmem:[#allocation4 + $0x8c] ss:$16 sps:$4 sm:$0xff]  }
  0x3a   :  { %v4251_v14 = vld [vmem:[#allocation4 + $0x80] ss:$16 sps:$4 sm:$0xff]   ;;  %v4252_v15 = vld [vmem:[#allocation4 + $0x88] ss:$16 sps:$4 sm:$0xff]   ;;  %v4253_v16 = vld [vmem:[#allocation4 + $0x64] ss:$16 sps:$4 sm:$0xff]  }
  0x3b   :  { %535 = vmatpush1.bf16.msra.mxu0 %v4239_v6  ;;  %648 = vmatpush1.bf16.msra.mxu1 %v4240_v7  ;;  %v4255_v17 = vld [vmem:[#allocation4 + $0x6c] ss:$16 sps:$4 sm:$0xff]   ;;  %v4257_v18 = vld [vmem:[#allocation4 + $0x60] ss:$16 sps:$4 sm:$0xff]   ;;  %v4258_v19 = vld [vmem:[#allocation4 + $0x68] ss:$16 sps:$4 sm:$0xff]  }
  0x3c   :  { %536 = vmatprep.subr.bf16.mxu0 %v4241_v8  ;;  %649 = vmatprep.subr.bf16.mxu1 %v4243_v9  ;;  %v4259_v20 = vld [vmem:[#allocation4 + $0x44] ss:$16 sps:$4 sm:$0xff]   ;;  %v4261_v21 = vld [vmem:[#allocation4 + $0x4c] ss:$16 sps:$4 sm:$0xff]   ;;  %v4263_v22 = vld [vmem:[#allocation4 + $0x40] ss:$16 sps:$4 sm:$0xff]  }
  0x3d   :  { %v4264_v23 = vld [vmem:[#allocation4 + $0x48] ss:$16 sps:$4 sm:$0xff]   ;;  %v4265_v24 = vld [vmem:[#allocation4 + $0x24] ss:$16 sps:$4 sm:$0xff]   ;;  %v4267_v25 = vld [vmem:[#allocation4 + $0x2c] ss:$16 sps:$4 sm:$0xff]  }
  0x3e   :  { %v4269_v26 = vld [vmem:[#allocation4 + $0x20] ss:$16 sps:$4 sm:$0xff]   ;;  %v4270_v27 = vld [vmem:[#allocation4 + $0x28] ss:$16 sps:$4 sm:$0xff]   ;;  %v4271_v28 = vld [vmem:[#allocation4 + $0x4] ss:$16 sps:$4 sm:$0xff]  }
  0x3f   :  { %537 = vmatpush1.bf16.msra.mxu0 %v4245_v10  ;;  %650 = vmatpush1.bf16.msra.mxu1 %v4246_v11  ;;  %v4273_v29 = vld [vmem:[#allocation4 + $0xc] ss:$16 sps:$4 sm:$0xff]   ;;  %v4275_v30 = vld [vmem:[#allocation4] ss:$16 sps:$4 sm:$0xff]   ;;  %v4276_v31 = vld [vmem:[#allocation4 + $0x8] ss:$16 sps:$4 sm:$0xff]  }
  0x40   :  { %538 = vmatprep.subr.bf16.mxu0 %v4247_v12  ;;  %651 = vmatprep.subr.bf16.mxu1 %v4249_v13  ;;  %v4277_v32 = vld [vmem:[#allocation4 + $0x1e4] ss:$16 sps:$4 sm:$0xff]   ;;  %v4279_v33 = vld [vmem:[#allocation4 + $0x1ec] ss:$16 sps:$4 sm:$0xff]   ;;  %v4281_v34 = vld [vmem:[#allocation4 + $0x1e0] ss:$16 sps:$4 sm:$0xff]  }
  0x41   :  { %v4282_v35 = vld [vmem:[#allocation4 + $0x1e8] ss:$16 sps:$4 sm:$0xff]   ;;  %v4283_v36 = vld [vmem:[#allocation4 + $0x1c4] ss:$16 sps:$4 sm:$0xff]   ;;  %v4285_v37 = vld [vmem:[#allocation4 + $0x1cc] ss:$16 sps:$4 sm:$0xff]  }
  0x42   :  { %v4287_v38 = vld [vmem:[#allocation4 + $0x1c0] ss:$16 sps:$4 sm:$0xff]   ;;  %v4288_v39 = vld [vmem:[#allocation4 + $0x1c8] ss:$16 sps:$4 sm:$0xff]   ;;  %v4289_v40 = vld [vmem:[#allocation4 + $0x1a4] ss:$16 sps:$4 sm:$0xff]  }
  0x43   :  { %539 = vmatpush1.bf16.msra.mxu0 %v4251_v14  ;;  %652 = vmatpush1.bf16.msra.mxu1 %v4252_v15  ;;  %v4291_v41 = vld [vmem:[#allocation4 + $0x1ac] ss:$16 sps:$4 sm:$0xff]   ;;  %v4293_v42 = vld [vmem:[#allocation4 + $0x1a0] ss:$16 sps:$4 sm:$0xff]   ;;  %v4294_v43 = vld [vmem:[#allocation4 + $0x1a8] ss:$16 sps:$4 sm:$0xff]  }
  0x44   :  { %540 = vmatprep.subr.bf16.mxu0 %v4253_v16  ;;  %653 = vmatprep.subr.bf16.mxu1 %v4255_v17  ;;  %v4295_v44 = vld [vmem:[#allocation4 + $0x184] ss:$16 sps:$4 sm:$0xff]   ;;  %v4297_v45 = vld [vmem:[#allocation4 + $0x18c] ss:$16 sps:$4 sm:$0xff]   ;;  %v4299_v48 = vld [vmem:[#allocation4 + $0x180] ss:$16 sps:$4 sm:$0xff]  }
  0x45   :  { %v74_v46 = vld [vmem:[#allocation2 + $0x8] sm:$0xff]  ;;  %v76_v47 = vld [vmem:[#allocation2 + $0x18] sm:$0xff]  ;;  %v4301_v51 = vld [vmem:[#allocation4 + $0x164] ss:$16 sps:$4 sm:$0xff]   ;;  %vm3788_vm0 = vcmask 130112   ;;  %vm3795_vm1 = vcmask 195712  }
  0x46   :  { %v4300_v49 = vld [vmem:[#allocation4 + $0x188] ss:$16 sps:$4 sm:$0xff]   ;;  %v106_v50 = vpack.c.bf16 %v76_v47, %v74_v46  ;;  %v4303_v52 = vld [vmem:[#allocation4 + $0x16c] ss:$16 sps:$4 sm:$0xff]   ;;  %v4305_v53 = vld [vmem:[#allocation4 + $0x160] ss:$16 sps:$4 sm:$0xff]  }
  0x47   :  { %541 = vmatpush1.bf16.msra.mxu0 %v4257_v18  ;;  %654 = vmatpush1.bf16.msra.mxu1 %v4258_v19  ;;  %v4306_v54 = vld [vmem:[#allocation4 + $0x168] ss:$16 sps:$4 sm:$0xff]   ;;  %v4307_v55 = vld [vmem:[#allocation4 + $0x144] ss:$16 sps:$4 sm:$0xff]   ;;  %v4309_v56 = vld [vmem:[#allocation4 + $0x14c] ss:$16 sps:$4 sm:$0xff]  }
  0x48   :  { %542 = vmatprep.subr.bf16.mxu0 %v4259_v20  ;;  %655 = vmatprep.subr.bf16.mxu1 %v4261_v21  ;;  %v4311_v57 = vld [vmem:[#allocation4 + $0x140] ss:$16 sps:$4 sm:$0xff]   ;;  %v4312_v58 = vld [vmem:[#allocation4 + $0x148] ss:$16 sps:$4 sm:$0xff]   ;;  %v4313_v59 = vld [vmem:[#allocation4 + $0x124] ss:$16 sps:$4 sm:$0xff]  }
  0x49   :  { %564 = vmatprep.mubr.bf16.mxu0 %v106_v50  ;;  %677 = vmatprep.mubr.bf16.mxu1 %v106_v50  ;;  %v4315_v60 = vld [vmem:[#allocation4 + $0x12c] ss:$16 sps:$4 sm:$0xff]   ;;  %v4317_v61 = vld [vmem:[#allocation4 + $0x120] ss:$16 sps:$4 sm:$0xff]   ;;  %v4318_v62 = vld [vmem:[#allocation4 + $0x128] ss:$16 sps:$4 sm:$0xff]  }
  0x4a   :  { %v4319_v63 = vld [vmem:[#allocation4 + $0x104] ss:$16 sps:$4 sm:$0xff]   ;;  %v4321_v0 = vld [vmem:[#allocation4 + $0x10c] ss:$16 sps:$4 sm:$0xff]   ;;  %v4323_v5 = vld [vmem:[#allocation4 + $0x100] ss:$16 sps:$4 sm:$0xff]  }
  0x4b   :  { %543 = vmatpush1.bf16.msra.mxu0 %v4263_v22  ;;  %656 = vmatpush1.bf16.msra.mxu1 %v4264_v23  ;;  %v882_v1 = vld [vmem:[#allocation6 + $0x1c0] sm:$0xff]  ;;  %v4324_v6 = vld [vmem:[#allocation4 + $0x108] ss:$16 sps:$4 sm:$0xff]   ;;  %v75_v8 = vld [vmem:[#allocation2 + $0x10] sm:$0xff]  ;;  %vm3802_vm2 = vcmask 261312   ;;  %vm3809_vm3 = vcmask 326912  }
  0x4c   :  { %544 = vmatprep.subr.bf16.mxu0 %v4265_v24  ;;  %657 = vmatprep.subr.bf16.mxu1 %v4267_v25  ;;  %v884_v2 = vld [vmem:[#allocation6 + $0x1e0] sm:$0xff]  ;;  %v78_v9 = vld [vmem:[#allocation2 + $0x28] sm:$0xff]  ;;  %v80_v10 = vld [vmem:[#allocation2 + $0x38] sm:$0xff]  ;;  %vm3816_vm4 = vcmask 392512   ;;  %vm3823_vm5 = vcmask 458112   ;;  %vm3830_vm6 = vcmask 523712  }
  0x4d   :  { %v946_v3 = vld [vmem:[#allocation6 + $0x5c0] sm:$0xff]  ;;  %v3990_v11 = vcombine.high %v882_v1, %v884_v2  ;;  %v108_v18 = vpack.c.bf16 %v80_v10, %v78_v9  ;;  %v3989_v19 = vcombine.low %v882_v1, %v884_v2  ;;  %v83_v50 = vld [vmem:[#allocation2 + $0x50] sm:$0xff]  ;;  %v90_v9 = vld [vmem:[#allocation2 + $0x88] sm:$0xff]  ;;  %vm3837_vm7 = vcmask 589312  }
  0x4e   :  { %v948_v4 = vld [vmem:[#allocation6 + $0x5e0] sm:$0xff]  ;;  %v92_v10 = vld [vmem:[#allocation2 + $0x98] sm:$0xff]  ;;  %vm3844_vm8 = vcmask 654912   ;;  %vm3851_vm9 = vcmask 720512   ;;  %vm3858_vm10 = vcmask 786112   ;;  %vm3865_vm11 = vcmask 851712  }
  0x4f   :  { %545 = vmatpush1.bf16.msra.mxu0 %v4269_v26  ;;  %658 = vmatpush1.bf16.msra.mxu1 %v4270_v27  ;;  %v73_v7 = vld [vmem:[#allocation2] sm:$0xff]  ;;  %v4054_v12 = vcombine.high %v946_v3, %v948_v4  ;;  %v4053_v20 = vcombine.low %v946_v3, %v948_v4  ;;  %vm3872_vm12 = vcmask 917312   ;;  %vm3879_vm13 = vcmask 982912  }
  0x50   :  { %546 = vmatprep.subr.bf16.mxu0 %v4271_v28  ;;  %659 = vmatprep.subr.bf16.mxu1 %v4273_v29  ;;  %v878_v13 = vld [vmem:[#allocation6 + $0x180] sm:$0xff]  ;;  %v105_v14 = vpack.c.bf16 %v75_v8, %v73_v7  ;;  %v79_v28 = vld [vmem:[#allocation2 + $0x30] sm:$0xff]  ;;  %v82_v29 = vld [vmem:[#allocation2 + $0x48] sm:$0xff]  ;;  %vm3886_vm14 = vcmask 1048512  }
  0x51   :  { %v880_v15 = vld [vmem:[#allocation6 + $0x1a0] sm:$0xff]  ;;  %v87_v8 = vld [vmem:[#allocation2 + $0x70] sm:$0xff] }
  0x52   :  { %v942_v16 = vld [vmem:[#allocation6 + $0x580] sm:$0xff]  ;;  %v3986_v21 = vcombine.high %v878_v13, %v880_v15 }
  0x53   :  { %547 = vmatpush1.bf16.msra.mxu0 %v4275_v30  ;;  %660 = vmatpush1.bf16.msra.mxu1 %v4276_v31  ;;  %v944_v17 = vld [vmem:[#allocation6 + $0x5a0] sm:$0xff]  ;;  %v84_v30 = vld [vmem:[#allocation2 + $0x58] sm:$0xff]  ;;  %v3985_v31 = vcombine.low %v878_v13, %v880_v15 }
  0x54   :  { %548 = vmatprep.subr.bf16.mxu0 %v4277_v32  ;;  %661 = vmatprep.subr.bf16.mxu1 %v4279_v33  ;;  %v4050_v22 = vcombine.high %v942_v16, %v944_v17  ;;  %v874_v23 = vld [vmem:[#allocation6 + $0x140] sm:$0xff]  ;;  %v4049_v32 = vcombine.low %v942_v16, %v944_v17 }
  0x55   :  { %v876_v24 = vld [vmem:[#allocation6 + $0x160] sm:$0xff] }
  0x56   :  { %v938_v25 = vld [vmem:[#allocation6 + $0x540] sm:$0xff]  ;;  %v3982_v33 = vcombine.high %v874_v23, %v876_v24 }
  0x57   :  { %549 = vmatpush2.bf16.msra.mxu0 %v4281_v34  ;;  %662 = vmatpush2.bf16.msra.mxu1 %v4282_v35  ;;  %v940_v26 = vld [vmem:[#allocation6 + $0x560] sm:$0xff] }
  0x58   :  { %550 = vmatprep.subr.bf16.mxu0 %v4283_v36  ;;  %663 = vmatprep.subr.bf16.mxu1 %v4285_v37  ;;  %v77_v27 = vld [vmem:[#allocation2 + $0x20] sm:$0xff]  ;;  %v4046_v34 = vcombine.high %v938_v25, %v940_v26 }
  0x59   :  { %v870_v35 = vld [vmem:[#allocation6 + $0x100] sm:$0xff]  ;;  %v107_v36 = vpack.c.bf16 %v79_v28, %v77_v27 }
  0x5a   :  { %v872_v37 = vld [vmem:[#allocation6 + $0x120] sm:$0xff] }
  0x5b   :  { %551 = vmatpush2.bf16.msra.mxu0 %v4287_v38  ;;  %664 = vmatpush2.bf16.msra.mxu1 %v4288_v39  ;;  %v934_v38 = vld [vmem:[#allocation6 + $0x500] sm:$0xff] }
  0x5c   :  { %552 = vmatprep.subr.bf16.mxu0 %v4289_v40  ;;  %665 = vmatprep.subr.bf16.mxu1 %v4291_v41  ;;  %v936_v39 = vld [vmem:[#allocation6 + $0x520] sm:$0xff]  ;;  %v110_v40 = vpack.c.bf16 %v84_v30, %v82_v29  ;;  %v3981_v41 = vcombine.low %v874_v23, %v876_v24  ;;  %v91_v30 = vld [vmem:[#allocation2 + $0x90] sm:$0xff] }
  0x5d   :  { %v868_v46 = vld [vmem:[#allocation6 + $0xe0] sm:$0xff] }
  0x5e   :  { %v930_v47 = vld [vmem:[#allocation6 + $0x4c0] sm:$0xff] }
  0x5f   :  { %553 = vmatpush2.bf16.msra.mxu0 %v4293_v42  ;;  %666 = vmatpush2.bf16.msra.mxu1 %v4294_v43  ;;  %v4045_v42 = vcombine.low %v938_v25, %v940_v26  ;;  %v3978_v43 = vcombine.high %v870_v35, %v872_v37  ;;  %v858_v3 = vld [vmem:[#allocation6 + $0x40] sm:$0xff] }
  0x60   :  { %554 = vmatprep.subr.bf16.mxu0 %v4295_v44  ;;  %667 = vmatprep.subr.bf16.mxu1 %v4297_v45  ;;  %v4042_v44 = vcombine.high %v934_v38, %v936_v39  ;;  %v866_v45 = vld [vmem:[#allocation6 + $0xc0] sm:$0xff] }
  0x61   :  { %v860_v4 = vld [vmem:[#allocation6 + $0x60] sm:$0xff] }
  0x62   :  { %v85_v7 = vld [vmem:[#allocation2 + $0x60] sm:$0xff]  ;;  %v3966_v13 = vcombine.high %v858_v3, %v860_v4 }
  0x63   :  { %555 = vmatpush2.bf16.msra.mxu0 %v4299_v48  ;;  %668 = vmatpush2.bf16.msra.mxu1 %v4300_v49  ;;  %v932_v48 = vld [vmem:[#allocation6 + $0x4e0] sm:$0xff]  ;;  %v111_v16 = vpack.c.bf16 %v87_v8, %v85_v7 }
  0x64   :  { %556 = vmatprep.subr.bf16.mxu0 %v4301_v51  ;;  %669 = vmatprep.subr.bf16.mxu1 %v4303_v52  ;;  %v81_v49 = vld [vmem:[#allocation2 + $0x40] sm:$0xff]  ;;  %v86_v51 = vld [vmem:[#allocation2 + $0x68] sm:$0xff]  ;;  %v88_v52 = vld [vmem:[#allocation2 + $0x78] sm:$0xff] }
  0x65   :  { %v854_v15 = vld [vmem:[#allocation6] sm:$0xff] }
  0x66   :  { %v856_v17 = vld [vmem:[#allocation6 + $0x20] sm:$0xff] }
  0x67   :  { %557 = vmatpush2.bf16.msra.mxu0 %v4305_v53  ;;  %670 = vmatpush2.bf16.msra.mxu1 %v4306_v54  ;;  %v3977_v53 = vcombine.low %v870_v35, %v872_v37  ;;  %v4041_v54 = vcombine.low %v934_v38, %v936_v39  ;;  %v3962_v23 = vcombine.high %v854_v15, %v856_v17  ;;  %v914_v25 = vld [vmem:[#allocation6 + $0x3c0] sm:$0xff] }
  0x68   :  { %558 = vmatprep.subr.bf16.mxu0 %v4307_v55  ;;  %671 = vmatprep.subr.bf16.mxu1 %v4309_v56  ;;  %v3974_v55 = vcombine.high %v866_v45, %v868_v46  ;;  %v4038_v56 = vcombine.high %v930_v47, %v932_v48  ;;  %v916_v26 = vld [vmem:[#allocation6 + $0x3e0] sm:$0xff] }
  0x69   :  { %v978_v27 = vld [vmem:[#allocation6 + $0x7c0] sm:$0xff]  ;;  %v4022_v35 = vcombine.high %v914_v25, %v916_v26 }
  0x6a   :  { %v980_v28 = vld [vmem:[#allocation6 + $0x7e0] sm:$0xff] }
  0x6b   :  { %559 = vmatpush2.bf16.msra.mxu0 %v4311_v57  ;;  %672 = vmatpush2.bf16.msra.mxu1 %v4312_v58  ;;  %v862_v57 = vld [vmem:[#allocation6 + $0x80] sm:$0xff]  ;;  %v109_v58 = vpack.c.bf16 %v83_v50, %v81_v49 }
  0x6c   :  { %560 = vmatprep.subr.bf16.mxu0 %v4313_v59  ;;  %673 = vmatprep.subr.bf16.mxu1 %v4315_v60  ;;  %v864_v59 = vld [vmem:[#allocation6 + $0xa0] sm:$0xff] }
  0x6d   :  { %v926_v60 = vld [vmem:[#allocation6 + $0x480] sm:$0xff]  ;;  %v3970_v1 = vcombine.high %v862_v57, %v864_v59 }
  0x6e   :  { %v89_v29 = vld [vmem:[#allocation2 + $0x80] sm:$0xff] }
  0x6f   :  { %561 = vmatpush2.bf16.msra.mxu0 %v4317_v61  ;;  %674 = vmatpush2.bf16.msra.mxu1 %v4318_v62  ;;  %v928_v61 = vld [vmem:[#allocation6 + $0x4a0] sm:$0xff]  ;;  %v112_v62 = vpack.c.bf16 %v88_v52, %v86_v51  ;;  %v113_v38 = vpack.c.bf16 %v91_v30, %v89_v29  ;;  %v95_v52 = vld [vmem:[#allocation2 + $0xb0] sm:$0xff] }
  0x70   :  { %562 = vmatprep.subr.bf16.mxu0 %v4319_v63  ;;  %675 = vmatprep.subr.bf16.mxu1 %v4321_v0  ;;  %v3973_v63 = vcombine.low %v866_v45, %v868_v46  ;;  %v4037_v0 = vcombine.low %v930_v47, %v932_v48  ;;  %v4034_v2 = vcombine.high %v926_v60, %v928_v61  ;;  %v910_v37 = vld [vmem:[#allocation6 + $0x380] sm:$0xff] }
  0x71   :  { %v912_v39 = vld [vmem:[#allocation6 + $0x3a0] sm:$0xff] }
  0x72   :  { %v4018_v45 = vcombine.high %v910_v37, %v912_v39  ;;  %v906_v47 = vld [vmem:[#allocation6 + $0x340] sm:$0xff] }
  0x73   :  { %563 = vmatpush2.bf16.msra.mxu0 %v4323_v5  ;;  %676 = vmatpush2.bf16.msra.mxu1 %v4324_v6  ;;  %v922_v5 = vld [vmem:[#allocation6 + $0x440] sm:$0xff] }
  0x74   :  { %1643 = vmatprep.subr.bf16.mxu0 %v3990_v11  ;;  %1756 = vmatprep.subr.bf16.mxu1 %v4054_v12  ;;  %v924_v6 = vld [vmem:[#allocation6 + $0x460] sm:$0xff]  ;;  %v3969_v11 = vcombine.low %v862_v57, %v864_v59  ;;  %v4033_v12 = vcombine.low %v926_v60, %v928_v61 }
  0x75   :  { %v908_v48 = vld [vmem:[#allocation6 + $0x360] sm:$0xff] }
  0x76   :  { %565 = vmatmul.mubr.bf16.vlgmr.msra.gmra.mxu0 %v105_v14  ;;  %678 = vmatmul.mubr.bf16.vlgmr.msra.gmra.mxu1 %v105_v14  ;;  %v4030_v14 = vcombine.high %v922_v5, %v924_v6  ;;  %v970_v49 = vld [vmem:[#allocation6 + $0x740] sm:$0xff]  ;;  %v4014_v57 = vcombine.high %v906_v47, %v908_v48 }
  0x77   :  { %574 = vmatprep.mubr.bf16.mxu0 %v108_v18  ;;  %687 = vmatprep.mubr.bf16.mxu1 %v108_v18  ;;  %v918_v18 = vld [vmem:[#allocation6 + $0x400] sm:$0xff] }
  0x78   :  { %1644 = vmatpush1.bf16.msra.mxu0 %v3989_v19  ;;  %1757 = vmatpush1.bf16.msra.mxu1 %v4053_v20  ;;  %v920_v19 = vld [vmem:[#allocation6 + $0x420] sm:$0xff]  ;;  %v114_v20 = vpack.c.bf16 %v92_v10, %v90_v9  ;;  %v99_v10 = vld [vmem:[#allocation2 + $0xd0] sm:$0xff] }
  0x79   :  { %1645 = vmatprep.subr.bf16.mxu0 %v3986_v21  ;;  %1758 = vmatprep.subr.bf16.mxu1 %v4050_v22  ;;  %v3965_v21 = vcombine.low %v858_v3, %v860_v4  ;;  %v4029_v22 = vcombine.low %v922_v5, %v924_v6  ;;  %v4026_v24 = vcombine.high %v918_v18, %v920_v19  ;;  %v972_v50 = vld [vmem:[#allocation6 + $0x760] sm:$0xff] }
  0x7a   :  { %v93_v51 = vld [vmem:[#allocation2 + $0xa0] sm:$0xff] }
  0x7b   :  { %v902_v59 = vld [vmem:[#allocation6 + $0x300] sm:$0xff]  ;;  %v115_v60 = vpack.c.bf16 %v95_v52, %v93_v51  ;;  %v4471_v52 = vld [vmem:[#allocation6 + $0x5e8] sm:$0xff] }
  0x7c   :  { %1646 = vmatpush1.bf16.msra.mxu0 %v3985_v31  ;;  %1759 = vmatpush1.bf16.msra.mxu1 %v4049_v32  ;;  %v94_v31 = vld [vmem:[#allocation2 + $0xa8] sm:$0xff]  ;;  %v96_v32 = vld [vmem:[#allocation2 + $0xb8] sm:$0xff]  ;;  %v904_v61 = vld [vmem:[#allocation6 + $0x320] sm:$0xff] }
  0x7d   :  { %1647 = vmatprep.subr.bf16.mxu0 %v3982_v33  ;;  %1760 = vmatprep.subr.bf16.mxu1 %v4046_v34  ;;  %v3961_v33 = vcombine.low %v854_v15, %v856_v17  ;;  %v4025_v34 = vcombine.low %v918_v18, %v920_v19  ;;  %v4010_v3 = vcombine.high %v902_v59, %v904_v61  ;;  %v898_v5 = vld [vmem:[#allocation6 + $0x2c0] sm:$0xff] }
  0x7e   :  { %575 = vmatmul.mubr.bf16.gmra.mxu0 %v107_v36  ;;  %688 = vmatmul.mubr.bf16.gmra.mxu1 %v107_v36  ;;  %v4086_v36 = vcombine.high %v978_v27, %v980_v28  ;;  %v900_v6 = vld [vmem:[#allocation6 + $0x2e0] sm:$0xff] }
  0x7f   :  { %584 = vmatprep.mubr.bf16.mxu0 %v110_v40  ;;  %697 = vmatprep.mubr.bf16.mxu1 %v110_v40  ;;  %v974_v40 = vld [vmem:[#allocation6 + $0x780] sm:$0xff]  ;;  %v4006_v15 = vcombine.high %v898_v5, %v900_v6  ;;  %v4005_v19 = vcombine.low %v898_v5, %v900_v6 }
  0x80   :  { %1648 = vmatpush1.bf16.msra.mxu0 %v3981_v41  ;;  %1761 = vmatpush1.bf16.msra.mxu1 %v4045_v42  ;;  %v976_v41 = vld [vmem:[#allocation6 + $0x7a0] sm:$0xff]  ;;  %v116_v42 = vpack.c.bf16 %v96_v32, %v94_v31 }
  0x81   :  { %1649 = vmatprep.subr.bf16.mxu0 %v3978_v43  ;;  %1762 = vmatprep.subr.bf16.mxu1 %v4042_v44  ;;  %v4021_v43 = vcombine.low %v914_v25, %v916_v26  ;;  %v4085_v44 = vcombine.low %v978_v27, %v980_v28  ;;  %v4082_v46 = vcombine.high %v974_v40, %v976_v41  ;;  %v962_v7 = vld [vmem:[#allocation6 + $0x6c0] sm:$0xff] }
  0x82   :  { %v964_v8 = vld [vmem:[#allocation6 + $0x6e0] sm:$0xff] }
  0x83   :  { %v97_v9 = vld [vmem:[#allocation2 + $0xc0] sm:$0xff] }
  0x84   :  { %1650 = vmatpush1.bf16.msra.mxu0 %v3977_v53  ;;  %1763 = vmatpush1.bf16.msra.mxu1 %v4041_v54  ;;  %v98_v53 = vld [vmem:[#allocation2 + $0xc8] sm:$0xff]  ;;  %v100_v54 = vld [vmem:[#allocation2 + $0xd8] sm:$0xff]  ;;  %v117_v17 = vpack.c.bf16 %v99_v10, %v97_v9  ;;  %v896_v25 = vld [vmem:[#allocation6 + $0x2a0] sm:$0xff] }
  0x85   :  { %1651 = vmatprep.subr.bf16.mxu0 %v3974_v55  ;;  %1764 = vmatprep.subr.bf16.mxu1 %v4038_v56  ;;  %v4017_v55 = vcombine.low %v910_v37, %v912_v39  ;;  %v4081_v56 = vcombine.low %v974_v40, %v976_v41  ;;  %v958_v26 = vld [vmem:[#allocation6 + $0x680] sm:$0xff] }
  0x86   :  { %585 = vmatmul.mubr.bf16.gmra.mxu0 %v109_v58  ;;  %698 = vmatmul.mubr.bf16.gmra.mxu1 %v109_v58  ;;  %v4078_v58 = vcombine.high %v970_v49, %v972_v50  ;;  %v960_v28 = vld [vmem:[#allocation6 + $0x6a0] sm:$0xff] }
  0x87   :  { %594 = vmatprep.mubr.bf16.mxu0 %v112_v62  ;;  %707 = vmatprep.mubr.bf16.mxu1 %v112_v62  ;;  %v966_v62 = vld [vmem:[#allocation6 + $0x700] sm:$0xff]  ;;  %v4065_v30 = vcombine.low %v958_v26, %v960_v28  ;;  %v4066_v31 = vcombine.high %v958_v26, %v960_v28 }
  0x88   :  { %1652 = vmatpush1.bf16.msra.mxu0 %v3973_v63  ;;  %1765 = vmatpush1.bf16.msra.mxu1 %v4037_v0  ;;  %v968_v63 = vld [vmem:[#allocation6 + $0x720] sm:$0xff]  ;;  %v118_v0 = vpack.c.bf16 %v100_v54, %v98_v53 }
  0x89   :  { %1653 = vmatprep.subr.bf16.mxu0 %v3970_v1  ;;  %1766 = vmatprep.subr.bf16.mxu1 %v4034_v2  ;;  %v4013_v1 = vcombine.low %v906_v47, %v908_v48  ;;  %v4077_v2 = vcombine.low %v970_v49, %v972_v50  ;;  %v4074_v4 = vcombine.high %v966_v62, %v968_v63  ;;  %v890_v32 = vld [vmem:[#allocation6 + $0x240] sm:$0xff]  ;;  %v4463_v48 = vld [vmem:[#allocation6 + $0x1c8] sm:$0xff] }
  0x8a   :  { %v886_v40 = vld [vmem:[#allocation6 + $0x200] sm:$0xff]  ;;  %v4465_v49 = vld [vmem:[#allocation6 + $0x1e8] sm:$0xff] }
  0x8b   :  { %v888_v41 = vld [vmem:[#allocation6 + $0x220] sm:$0xff]  ;;  %v4467_v50 = vld [vmem:[#allocation6 + $0x5c8] sm:$0xff]  ;;  %v3992_v51 = vcombine.high %v4463_v48, %v4465_v49  ;;  %v3991_v53 = vcombine.low %v4463_v48, %v4465_v49 }
  0x8c   :  { %1654 = vmatpush1.bf16.msra.mxu0 %v3969_v11  ;;  %1767 = vmatpush1.bf16.msra.mxu1 %v4033_v12  ;;  %v102_v11 = vld [vmem:[#allocation2 + $0xe8] sm:$0xff]  ;;  %v104_v12 = vld [vmem:[#allocation2 + $0xf8] sm:$0xff]  ;;  %v4055_v54 = vcombine.low %v4467_v50, %v4471_v52 }
  0x8d   :  { %1655 = vmatprep.subr.bf16.mxu0 %v3966_v13  ;;  %1768 = vmatprep.subr.bf16.mxu1 %v4030_v14  ;;  %v4009_v13 = vcombine.low %v902_v59, %v904_v61  ;;  %v4073_v14 = vcombine.low %v966_v62, %v968_v63  ;;  %v120_v18 = vpack.c.bf16 %v104_v12, %v102_v11  ;;  %v121_v62 = vld [vmem:[#allocation7] ss:$4 sm:$0xf] }
  0x8e   :  { %595 = vmatmul.mubr.bf16.gmra.mxu0 %v111_v16  ;;  %708 = vmatmul.mubr.bf16.gmra.mxu1 %v111_v16  ;;  %v4070_v16 = vcombine.high %v962_v7, %v964_v8  ;;  %v4562_v49 = vld [vmem:[#allocation6 + $0x128] sm:$0xff] }
  0x8f   :  { %604 = vmatprep.mubr.bf16.mxu0 %v114_v20  ;;  %717 = vmatprep.mubr.bf16.mxu1 %v114_v20  ;;  %v4069_v20 = vcombine.low %v962_v7, %v964_v8 }
  0x90   :  { %1656 = vmatpush1.bf16.msra.mxu0 %v3965_v21  ;;  %1769 = vmatpush1.bf16.msra.mxu1 %v4029_v22  ;;  %v101_v21 = vld [vmem:[#allocation2 + $0xe0] sm:$0xff]  ;;  %v103_v22 = vld [vmem:[#allocation2 + $0xf0] sm:$0xff] }
  0x91   :  { %1657 = vmatprep.subr.bf16.mxu0 %v3962_v23  ;;  %1770 = vmatprep.subr.bf16.mxu1 %v4026_v24  ;;  %v119_v23 = vpack.c.bf16 %v103_v22, %v101_v21  ;;  %v894_v24 = vld [vmem:[#allocation6 + $0x280] sm:$0xff] }
  0x92   :  { %v4002_v27 = vcombine.high %v894_v24, %v896_v25  ;;  %v4001_v29 = vcombine.low %v894_v24, %v896_v25  ;;  %v4516_v24 = vld [vmem:[#allocation6 + $0x1a8] sm:$0xff] }
  0x94   :  { %1658 = vmatpush1.bf16.msra.mxu0 %v3961_v33  ;;  %1771 = vmatpush1.bf16.msra.mxu1 %v4025_v34  ;;  %v892_v33 = vld [vmem:[#allocation6 + $0x260] sm:$0xff] }
  0x95   :  { %1659 = vmatprep.subr.bf16.mxu0 %v4022_v35  ;;  %1772 = vmatprep.subr.bf16.mxu1 %v4086_v36  ;;  %v954_v34 = vld [vmem:[#allocation6 + $0x640] sm:$0xff]  ;;  %v3998_v35 = vcombine.high %v890_v32, %v892_v33  ;;  %v3997_v37 = vcombine.low %v890_v32, %v892_v33 }
  0x96   :  { %605 = vmatmul.mubr.bf16.gmra.mxu0 %v113_v38  ;;  %718 = vmatmul.mubr.bf16.gmra.mxu1 %v113_v38  ;;  %v956_v36 = vld [vmem:[#allocation6 + $0x660] sm:$0xff] }
  0x97   :  { %614 = vmatprep.mubr.bf16.mxu0 %v116_v42  ;;  %727 = vmatprep.mubr.bf16.mxu1 %v116_v42  ;;  %v4061_v38 = vcombine.low %v954_v34, %v956_v36  ;;  %v4062_v39 = vcombine.high %v954_v34, %v956_v36  ;;  %v950_v42 = vld [vmem:[#allocation6 + $0x600] sm:$0xff] }
  0x98   :  { %1660 = vmatpush2.bf16.msra.mxu0 %v4021_v43  ;;  %1773 = vmatpush2.bf16.msra.mxu1 %v4085_v44  ;;  %v3994_v43 = vcombine.high %v886_v40, %v888_v41  ;;  %v952_v44 = vld [vmem:[#allocation6 + $0x620] sm:$0xff] }
  0x99   :  { %1661 = vmatprep.subr.bf16.mxu0 %v4018_v45  ;;  %1774 = vmatprep.subr.bf16.mxu1 %v4082_v46  ;;  %v3993_v45 = vcombine.low %v886_v40, %v888_v41  ;;  %v4057_v46 = vcombine.low %v950_v42, %v952_v44  ;;  %v4058_v47 = vcombine.high %v950_v42, %v952_v44  ;;  %v4530_v44 = vld [vmem:[#allocation6 + $0x148] sm:$0xff] }
  0x9c   :  { %1662 = vmatpush2.bf16.msra.mxu0 %v4017_v55  ;;  %1775 = vmatpush2.bf16.msra.mxu1 %v4081_v56  ;;  %v4056_v55 = vcombine.high %v4467_v50, %v4471_v52  ;;  %v5620_v56 = vlaneseq  ;;  %v4566_v50 = vld [vmem:[#allocation6 + $0x528] sm:$0xff] }
  0x9d   :  { %1663 = vmatprep.subr.bf16.mxu0 %v4014_v57  ;;  %1776 = vmatprep.subr.bf16.mxu1 %v4078_v58 }
  0x9e   :  { %615 = vmatmul.mubr.bf16.gmra.mxu0 %v115_v60  ;;  %728 = vmatmul.mubr.bf16.gmra.mxu1 %v115_v60  ;;  %v4480_v57 = vshrl.u32 %v5620_v56, 7 }
  0x9f   :  { %624 = vmatprep.mubr.bf16.mxu0 %v118_v0  ;;  %737 = vmatprep.mubr.bf16.mxu1 %v118_v0 }
  0xa0   :  { %1664 = vmatpush2.bf16.msra.mxu0 %v4013_v1  ;;  %1777 = vmatpush2.bf16.msra.mxu1 %v4077_v2  ;;  %5629 = vst [vmem:[#allocation12_spill] sm:$0xff] %v4480_v57  ;;  %v4483_v58 = vsub.s32 1, %v4480_v57  ;;  %v4486_v59 = vsub.s32 3, %v4480_v57  ;;  %v4489_v60 = vsub.s32 0, %v4480_v57  ;;  %v4492_v61 = vsub.s32 2, %v4480_v57 }
  0xa1   :  { %1665 = vmatprep.subr.bf16.mxu0 %v4010_v3  ;;  %1778 = vmatprep.subr.bf16.mxu1 %v4074_v4 }
  0xa2   :  { %5630 = vst [vmem:[#allocation13_spill] sm:$0xff] %v4486_v59  ;;  %5631 = vst [vmem:[#allocation14_spill] sm:$0xff] %v4489_v60  ;;  %v4495_v1 = vrot.slane %v121_v62, %v4483_v58  ;;  %v4498_v2 = vrot.slane %v121_v62, %v4486_v59  ;;  %v4501_v3 = vrot.slane %v121_v62, %v4489_v60 }
  0xa3   :  { %5632 = vst [vmem:[#allocation15_spill] sm:$0xff] %v4492_v61  ;;  %v4504_v4 = vrot.slane %v121_v62, %v4492_v61  ;;  %v4541_v62 = vld [vmem:[#allocation6 + $0x568] sm:$0xff] }
  0xa4   :  { %1666 = vmatpush2.bf16.msra.mxu0 %v4009_v13  ;;  %1779 = vmatpush2.bf16.msra.mxu1 %v4073_v14 }
  0xa5   :  { %1667 = vmatprep.subr.bf16.mxu0 %v4006_v15  ;;  %1780 = vmatprep.subr.bf16.mxu1 %v4070_v16 }
  0xa6   :  { %625 = vmatmul.mubr.bf16.gmra.mxu0 %v117_v17  ;;  %738 = vmatmul.mubr.bf16.gmra.mxu1 %v117_v17 }
  0xa7   :  { %634 = vmatprep.mubr.bf16.mxu0 %v120_v18  ;;  %747 = vmatprep.mubr.bf16.mxu1 %v120_v18 }
  0xa8   :  { %1668 = vmatpush2.bf16.msra.mxu0 %v4005_v19  ;;  %1781 = vmatpush2.bf16.msra.mxu1 %v4069_v20 }
  0xa9   :  { %1669 = vmatprep.subr.bf16.mxu0 %v4002_v27  ;;  %1782 = vmatprep.subr.bf16.mxu1 %v4066_v31 }
  0xac   :  { %1670 = vmatpush2.bf16.msra.mxu0 %v4001_v29  ;;  %1783 = vmatpush2.bf16.msra.mxu1 %v4065_v30  ;;  %v943_v29 = vld [vmem:[#allocation6 + $0x588] sm:$0xff] }
  0xad   :  { %1671 = vmatprep.subr.bf16.mxu0 %v3998_v35  ;;  %1784 = vmatprep.subr.bf16.mxu1 %v4062_v39  ;;  %v945_v30 = vld [vmem:[#allocation6 + $0x5a8] sm:$0xff] }
  0xae   :  { %635 = vmatmul.mubr.bf16.gmra.mxu0 %v119_v23  ;;  %748 = vmatmul.mubr.bf16.gmra.mxu1 %v119_v23  ;;  %v4514_v23 = vld [vmem:[#allocation6 + $0x188] sm:$0xff] }
  0xaf   :  { %v3987_v42 = vcombine.low %v4514_v23, %v4516_v24 }
  0xb0   :  { %1672 = vmatpush2.bf16.msra.mxu0 %v3997_v37  ;;  %1785 = vmatpush2.bf16.msra.mxu1 %v4061_v38  ;;  %v3988_v37 = vcombine.high %v4514_v23, %v4516_v24 }
  0xb1   :  { %1673 = vmatprep.subr.bf16.mxu0 %v3994_v43  ;;  %1786 = vmatprep.subr.bf16.mxu1 %v4058_v47  ;;  %v4052_v43 = vcombine.high %v943_v29, %v945_v30 }
  0xb4   :  { %1674 = vmatpush2.bf16.msra.mxu0 %v3993_v45  ;;  %1787 = vmatpush2.bf16.msra.mxu1 %v4057_v46 }
  0xb5   :  { %1869 = vmatprep.subr.bf16.mxu0 %v3992_v51  ;;  %1982 = vmatprep.subr.bf16.mxu1 %v4056_v55  ;;  %v4537_v51 = vld [vmem:[#allocation6 + $0x168] sm:$0xff] }
  0xb6   :  { %v4539_v55 = vld [vmem:[#allocation6 + $0x548] sm:$0xff] }
  0xb7   :  { %v4048_v48 = vcombine.high %v4539_v55, %v4541_v62  ;;  %v4047_v24 = vcombine.low %v4539_v55, %v4541_v62 }
 0x136   :  { %v566_v63 = vpop.f32.mrf.mxu0  ;;  %v679_v0 = vpop.f32.mrf.mxu1 }
 0x137   :  { %v567_v13 = vadd.f32 %v566_v63, %v4501_v3  ;;  %v680_v14 = vadd.f32 %v679_v0, %v4504_v4 }
 0x138   :  { %v568_v5 = vpop.f32.mrf.mxu0  ;;  %v681_v6 = vpop.f32.mrf.mxu1 }
 0x139   :  { %v569_v9 = vadd.f32 %v568_v5, %v4495_v1  ;;  %v682_v10 = vadd.f32 %v681_v6, %v4498_v2  ;;  %v758_v31 = vmax.f32 %v567_v13, 0.0  ;;  %v760_v32 = vmax.f32 %v680_v14, 0.0 }
 0x13a   :  { %v570_v7 = vpop.f32.mrf.mxu0  ;;  %v683_v8 = vpop.f32.mrf.mxu1 }
 0x13b   :  { %v571_v11 = vadd.f32 %v570_v7, %v4501_v3  ;;  %v684_v12 = vadd.f32 %v683_v8, %v4504_v4  ;;  %v759_v25 = vmax.f32 %v569_v9, 0.0  ;;  %v761_v26 = vmax.f32 %v682_v10, 0.0 }
 0x13c   :  { %v572_v15 = vpop.f32.mrf.mxu0  ;;  %v685_v16 = vpop.f32.mrf.mxu1  ;;  %v4051_v10 = vcombine.low %v943_v29, %v945_v30 }
 0x13d   :  { %v573_v17 = vadd.f32 %v572_v15, %v4495_v1  ;;  %v686_v18 = vadd.f32 %v685_v16, %v4498_v2  ;;  %v762_v19 = vmax.f32 %v571_v11, 0.0  ;;  %v764_v20 = vmax.f32 %v684_v12, 0.0  ;;  %v4556_v11 = vld [vmem:[#allocation6 + $0x108] sm:$0xff] }
 0x13e   :  { %v576_v21 = vpop.f32.mrf.mxu0  ;;  %v689_v22 = vpop.f32.mrf.mxu1  ;;  %v3984_v16 = vcombine.high %v4530_v44, %v4537_v51 }
 0x13f   :  { %v763_v27 = vmax.f32 %v573_v17, 0.0  ;;  %v765_v28 = vmax.f32 %v686_v18, 0.0  ;;  %v4524_v38 = vpack.c.bf16 %v762_v19, %v758_v31  ;;  %v4526_v39 = vpack.c.bf16 %v764_v20, %v760_v32 }
 0x140   :  { %v578_v33 = vpop.f32.mrf.mxu0  ;;  %v691_v34 = vpop.f32.mrf.mxu1  ;;  %v577_v63 = vadd.f32 %v576_v21, %v4501_v3  ;;  %v690_v0 = vadd.f32 %v689_v22, %v4504_v4  ;;  %v3983_v18 = vcombine.low %v4530_v44, %v4537_v51 }
 0x141   :  { %v4518_v35 = vpack.c.bf16 %v763_v27, %v759_v25  ;;  %v4520_v36 = vpack.c.bf16 %v765_v28, %v761_v26  ;;  %v579_v45 = vadd.f32 %v578_v33, %v4495_v1  ;;  %v692_v5 = vadd.f32 %v691_v34, %v4498_v2 }
 0x142   :  { %v580_v40 = vpop.f32.mrf.mxu0  ;;  %v693_v41 = vpop.f32.mrf.mxu1  ;;  %v766_v19 = vmax.f32 %v577_v63, 0.0  ;;  %v768_v20 = vmax.f32 %v690_v0, 0.0  ;;  %v3980_v26 = vcombine.high %v4556_v11, %v4562_v49  ;;  %v931_v63 = vld [vmem:[#allocation6 + $0x4c8] sm:$0xff] }
 0x143   :  { %v581_v46 = vadd.f32 %v580_v40, %v4501_v3  ;;  %v694_v47 = vadd.f32 %v693_v41, %v4504_v4  ;;  %1675 = vmatprep.mubr.bf16.mxu0 %v4518_v35  ;;  %1788 = vmatprep.mubr.bf16.mxu1 %v4520_v36  ;;  %v767_v52 = vmax.f32 %v579_v45, 0.0  ;;  %v769_v21 = vmax.f32 %v692_v5, 0.0  ;;  %v4589_v41 = vld [vmem:[#allocation6 + $0xc8] sm:$0xff] }
 0x144   :  { %v582_v6 = vpop.f32.mrf.mxu0  ;;  %v695_v7 = vpop.f32.mrf.mxu1  ;;  %1676 = vmatmul.mubr.bf16.vlgmr.msra.gmra.mxu0 %v4524_v38  ;;  %1789 = vmatmul.mubr.bf16.vlgmr.msra.gmra.mxu1 %v4526_v39  ;;  %v933_v0 = vld [vmem:[#allocation6 + $0x4e8] sm:$0xff] }
 0x145   :  { %v583_v8 = vadd.f32 %v582_v6, %v4495_v1  ;;  %v696_v9 = vadd.f32 %v695_v7, %v4498_v2  ;;  %1870 = vmatpush1.bf16.msra.mxu0 %v3991_v53  ;;  %1983 = vmatpush1.bf16.msra.mxu1 %v4055_v54  ;;  %v770_v12 = vmax.f32 %v581_v46, 0.0  ;;  %v772_v13 = vmax.f32 %v694_v47, 0.0  ;;  %v4564_v53 = vld [vmem:[#allocation6 + $0x508] sm:$0xff] }
 0x146   :  { %v586_v14 = vpop.f32.mrf.mxu0  ;;  %v699_v15 = vpop.f32.mrf.mxu1  ;;  %1871 = vmatprep.subr.bf16.mxu0 %v3988_v37  ;;  %1984 = vmatprep.subr.bf16.mxu1 %v4052_v43  ;;  %v4044_v27 = vcombine.high %v4564_v53, %v4566_v50  ;;  %v3979_v47 = vcombine.low %v4556_v11, %v4562_v49  ;;  %v4043_v62 = vcombine.low %v4564_v53, %v4566_v50  ;;  %v4604_v5 = vld [vmem:[#allocation6 + $0x88] sm:$0xff] }
 0x147   :  { %v771_v54 = vmax.f32 %v583_v8, 0.0  ;;  %v773_v17 = vmax.f32 %v696_v9, 0.0  ;;  %v4578_v28 = vpack.c.bf16 %v770_v12, %v766_v19  ;;  %v4580_v29 = vpack.c.bf16 %v772_v13, %v768_v20  ;;  %v4610_v12 = vld [vmem:[#allocation6 + $0xa8] sm:$0xff] }
 0x148   :  { %v588_v22 = vpop.f32.mrf.mxu0  ;;  %v701_v23 = vpop.f32.mrf.mxu1  ;;  %v587_v43 = vadd.f32 %v586_v14, %v4501_v3  ;;  %v700_v44 = vadd.f32 %v699_v15, %v4504_v4  ;;  %v4612_v13 = vld [vmem:[#allocation6 + $0x488] sm:$0xff] }
 0x149   :  { %1872 = vmatpush1.bf16.msra.mxu0 %v3987_v42  ;;  %1985 = vmatpush1.bf16.msra.mxu1 %v4051_v10  ;;  %v4572_v25 = vpack.c.bf16 %v771_v54, %v767_v52  ;;  %v4582_v32 = vpack.c.bf16 %v773_v17, %v769_v21  ;;  %v589_v33 = vadd.f32 %v588_v22, %v4495_v1  ;;  %v4591_v42 = vld [vmem:[#allocation6 + $0xe8] sm:$0xff] }
 0x14a   :  { %v590_v30 = vpop.f32.mrf.mxu0  ;;  %v703_v31 = vpop.f32.mrf.mxu1  ;;  %1873 = vmatprep.subr.bf16.mxu0 %v3984_v16  ;;  %1986 = vmatprep.subr.bf16.mxu1 %v4048_v48  ;;  %v702_v34 = vadd.f32 %v701_v23, %v4498_v2  ;;  %v3975_v10 = vcombine.low %v4589_v41, %v4591_v42  ;;  %v3976_v11 = vcombine.high %v4589_v41, %v4591_v42  ;;  %v4614_v14 = vld [vmem:[#allocation6 + $0x4a8] sm:$0xff]  ;;  %v774_v53 = vmax.f32 %v587_v43, 0.0 }
 0x14b   :  { %v591_v37 = vadd.f32 %v590_v30, %v4501_v3  ;;  %v704_v40 = vadd.f32 %v703_v31, %v4504_v4  ;;  %1685 = vmatprep.mubr.bf16.mxu0 %v4572_v25  ;;  %1798 = vmatprep.mubr.bf16.mxu1 %v4582_v32  ;;  %v775_v15 = vmax.f32 %v589_v33, 0.0  ;;  %v776_v50 = vmax.f32 %v700_v44, 0.0 }
 0x14c   :  { %v592_v45 = vpop.f32.mrf.mxu0  ;;  %v705_v46 = vpop.f32.mrf.mxu1  ;;  %1686 = vmatmul.mubr.bf16.gmra.mxu0 %v4578_v28  ;;  %1799 = vmatmul.mubr.bf16.gmra.mxu1 %v4580_v29  ;;  %v777_v16 = vmax.f32 %v702_v34, 0.0  ;;  %v4039_v17 = vcombine.low %v931_v63, %v933_v0  ;;  %v3972_v21 = vcombine.high %v4604_v5, %v4610_v12  ;;  %v4036_v22 = vcombine.high %v4612_v13, %v4614_v14 }
 0x14d   :  { %v593_v51 = vadd.f32 %v592_v45, %v4495_v1  ;;  %v706_v55 = vadd.f32 %v705_v46, %v4498_v2  ;;  %1874 = vmatpush1.bf16.msra.mxu0 %v3983_v18  ;;  %v778_v6 = vmax.f32 %v591_v37, 0.0  ;;  %v780_v7 = vmax.f32 %v704_v40, 0.0  ;;  %1987 = vmatpush1.bf16.msra.mxu1 %v4047_v24  ;;  %v4634_v37 = vld [vmem:[#allocation6 + $0x48] sm:$0xff] }
 0x14e   :  { %v596_v8 = vpop.f32.mrf.mxu0  ;;  %v709_v9 = vpop.f32.mrf.mxu1  ;;  %1875 = vmatprep.subr.bf16.mxu0 %v3980_v26  ;;  %1988 = vmatprep.subr.bf16.mxu1 %v4044_v27  ;;  %v4040_v18 = vcombine.high %v931_v63, %v933_v0  ;;  %v4636_v40 = vld [vmem:[#allocation6 + $0x68] sm:$0xff]  ;;  %v3971_v45 = vcombine.low %v4604_v5, %v4610_v12 }
 0x14f   :  { %v779_v48 = vmax.f32 %v593_v51, 0.0  ;;  %v781_v49 = vmax.f32 %v706_v55, 0.0  ;;  %v4624_v23 = vpack.c.bf16 %v778_v6, %v774_v53  ;;  %v4626_v24 = vpack.c.bf16 %v780_v7, %v776_v50  ;;  %v923_v55 = vld [vmem:[#allocation6 + $0x448] sm:$0xff] }
 0x150   :  { %v598_v52 = vpop.f32.mrf.mxu0  ;;  %v711_v54 = vpop.f32.mrf.mxu1  ;;  %v597_v41 = vadd.f32 %v596_v8, %v4501_v3  ;;  %v710_v42 = vadd.f32 %v709_v9, %v4504_v4  ;;  %v4035_v51 = vcombine.low %v4612_v13, %v4614_v14  ;;  %v4648_v63 = vld [vmem:[#allocation6 + $0x8] sm:$0xff]  ;;  %v3967_v5 = vcombine.low %v4634_v37, %v4636_v40 }
 0x151   :  { %1876 = vmatpush1.bf16.msra.mxu0 %v3979_v47  ;;  %v4616_v19 = vpack.c.bf16 %v779_v48, %v775_v15  ;;  %v4618_v20 = vpack.c.bf16 %v781_v49, %v777_v16  ;;  %v599_v26 = vadd.f32 %v598_v52, %v4495_v1  ;;  %1989 = vmatpush1.bf16.msra.mxu1 %v4043_v62  ;;  %v925_v62 = vld [vmem:[#allocation6 + $0x468] sm:$0xff] }
 0x152   :  { %v600_v27 = vpop.f32.mrf.mxu0  ;;  %v713_v30 = vpop.f32.mrf.mxu1  ;;  %1877 = vmatprep.subr.bf16.mxu0 %v3976_v11  ;;  %v712_v31 = vadd.f32 %v711_v54, %v4498_v2  ;;  %1990 = vmatprep.subr.bf16.mxu1 %v4040_v18  ;;  %v3968_v9 = vcombine.high %v4634_v37, %v4636_v40  ;;  %v4656_v11 = vld [vmem:[#allocation6 + $0x408] sm:$0xff]  ;;  %v782_v48 = vmax.f32 %v597_v41, 0.0  ;;  %v784_v49 = vmax.f32 %v710_v42, 0.0 }
 0x153   :  { %v601_v33 = vadd.f32 %v600_v27, %v4501_v3  ;;  %v714_v34 = vadd.f32 %v713_v30, %v4504_v4  ;;  %1695 = vmatprep.mubr.bf16.mxu0 %v4616_v19  ;;  %1808 = vmatprep.mubr.bf16.mxu1 %v4618_v20  ;;  %v4658_v12 = vld [vmem:[#allocation6 + $0x428] sm:$0xff]  ;;  %v783_v13 = vmax.f32 %v599_v26, 0.0  ;;  %v4031_v52 = vcombine.low %v923_v55, %v925_v62 }
 0x154   :  { %v602_v43 = vpop.f32.mrf.mxu0  ;;  %v715_v44 = vpop.f32.mrf.mxu1  ;;  %1696 = vmatmul.mubr.bf16.gmra.mxu0 %v4624_v23  ;;  %1809 = vmatmul.mubr.bf16.gmra.mxu1 %v4626_v24  ;;  %v785_v14 = vmax.f32 %v712_v31, 0.0  ;;  %v4032_v54 = vcombine.high %v923_v55, %v925_v62  ;;  %v4028_v26 = vcombine.high %v4656_v11, %v4658_v12  ;;  %v4678_v41 = vld [vmem:[#allocation6 + $0x3c8] sm:$0xff]  ;;  %v4027_v62 = vcombine.low %v4656_v11, %v4658_v12 }
 0x155   :  { %v603_v46 = vadd.f32 %v602_v43, %v4495_v1  ;;  %v716_v47 = vadd.f32 %v715_v44, %v4498_v2  ;;  %1878 = vmatpush1.bf16.msra.mxu0 %v3975_v10  ;;  %v786_v0 = vmax.f32 %v601_v33, 0.0  ;;  %v788_v6 = vmax.f32 %v714_v34, 0.0  ;;  %1991 = vmatpush1.bf16.msra.mxu1 %v4039_v17  ;;  %v4654_v10 = vld [vmem:[#allocation6 + $0x28] sm:$0xff] }
 0x156   :  { %v606_v7 = vpop.f32.mrf.mxu0  ;;  %v719_v8 = vpop.f32.mrf.mxu1  ;;  %1879 = vmatprep.subr.bf16.mxu0 %v3972_v21  ;;  %1992 = vmatprep.subr.bf16.mxu1 %v4036_v22  ;;  %v3964_v21 = vcombine.high %v4648_v63, %v4654_v10  ;;  %v4680_v42 = vld [vmem:[#allocation6 + $0x3e8] sm:$0xff] }
 0x157   :  { %v787_v15 = vmax.f32 %v603_v46, 0.0  ;;  %v789_v16 = vmax.f32 %v716_v47, 0.0  ;;  %v4668_v27 = vpack.c.bf16 %v786_v0, %v782_v48  ;;  %v4670_v22 = vpack.c.bf16 %v788_v6, %v784_v49  ;;  %v979_v0 = vld [vmem:[#allocation6 + $0x7c8] sm:$0xff] }
 0x158   :  { %v608_v53 = vpop.f32.mrf.mxu0  ;;  %v721_v50 = vpop.f32.mrf.mxu1  ;;  %v607_v43 = vadd.f32 %v606_v7, %v4501_v3  ;;  %v720_v44 = vadd.f32 %v719_v8, %v4504_v4  ;;  %v3963_v47 = vcombine.low %v4648_v63, %v4654_v10  ;;  %v981_v6 = vld [vmem:[#allocation6 + $0x7e8] sm:$0xff]  ;;  %v4023_v63 = vcombine.low %v4678_v41, %v4680_v42 }
 0x159   :  { %1880 = vmatpush1.bf16.msra.mxu0 %v3971_v45  ;;  %v4660_v17 = vpack.c.bf16 %v787_v15, %v783_v13  ;;  %v4662_v18 = vpack.c.bf16 %v789_v16, %v785_v14  ;;  %v609_v30 = vadd.f32 %v608_v53, %v4495_v1  ;;  %1993 = vmatpush1.bf16.msra.mxu1 %v4035_v51  ;;  %v4692_v7 = vld [vmem:[#allocation6 + $0x388] sm:$0xff] }
 0x15a   :  { %v610_v31 = vpop.f32.mrf.mxu0  ;;  %v723_v33 = vpop.f32.mrf.mxu1  ;;  %1881 = vmatprep.subr.bf16.mxu0 %v3968_v9  ;;  %v722_v34 = vadd.f32 %v721_v50, %v4498_v2  ;;  %1994 = vmatprep.subr.bf16.mxu1 %v4032_v54  ;;  %v4024_v10 = vcombine.high %v4678_v41, %v4680_v42  ;;  %v4700_v15 = vld [vmem:[#allocation6 + $0x788] sm:$0xff]  ;;  %v790_v53 = vmax.f32 %v607_v43, 0.0  ;;  %v792_v50 = vmax.f32 %v720_v44, 0.0 }
 0x15b   :  { %v611_v37 = vadd.f32 %v610_v31, %v4501_v3  ;;  %v724_v40 = vadd.f32 %v723_v33, %v4504_v4  ;;  %1705 = vmatprep.mubr.bf16.mxu0 %v4660_v17  ;;  %1818 = vmatprep.mubr.bf16.mxu1 %v4662_v18  ;;  %v4702_v11 = vld [vmem:[#allocation6 + $0x7a8] sm:$0xff]  ;;  %v791_v12 = vmax.f32 %v609_v30, 0.0  ;;  %v4088_v31 = vcombine.high %v979_v0, %v981_v6 }
 0x15c   :  { %v612_v45 = vpop.f32.mrf.mxu0  ;;  %v725_v46 = vpop.f32.mrf.mxu1  ;;  %1706 = vmatmul.mubr.bf16.gmra.mxu0 %v4668_v27  ;;  %1819 = vmatmul.mubr.bf16.gmra.mxu1 %v4670_v22  ;;  %v793_v16 = vmax.f32 %v722_v34, 0.0  ;;  %v4084_v30 = vcombine.high %v4700_v15, %v4702_v11 }
 0x15d   :  { %v613_v51 = vadd.f32 %v612_v45, %v4495_v1  ;;  %v726_v55 = vadd.f32 %v725_v46, %v4498_v2  ;;  %1882 = vmatpush1.bf16.msra.mxu0 %v3967_v5  ;;  %v794_v8 = vmax.f32 %v611_v37, 0.0  ;;  %v796_v9 = vmax.f32 %v724_v40, 0.0  ;;  %1995 = vmatpush1.bf16.msra.mxu1 %v4031_v52  ;;  %v4698_v5 = vld [vmem:[#allocation6 + $0x3a8] sm:$0xff] }
 0x15e   :  { %v616_v13 = vpop.f32.mrf.mxu0  ;;  %v729_v14 = vpop.f32.mrf.mxu1  ;;  %1883 = vmatprep.subr.bf16.mxu0 %v3964_v21  ;;  %1996 = vmatprep.subr.bf16.mxu1 %v4028_v26  ;;  %v4087_v21 = vcombine.low %v979_v0, %v981_v6  ;;  %v4020_v40 = vcombine.high %v4692_v7, %v4698_v5 }
 0x15f   :  { %v795_v48 = vmax.f32 %v613_v51, 0.0  ;;  %v797_v49 = vmax.f32 %v726_v55, 0.0  ;;  %v4712_v34 = vpack.c.bf16 %v794_v8, %v790_v53  ;;  %v4714_v26 = vpack.c.bf16 %v796_v9, %v792_v50  ;;  %v4724_v51 = vld [vmem:[#allocation6 + $0x368] sm:$0xff] }
 0x160   :  { %v618_v52 = vpop.f32.mrf.mxu0  ;;  %v731_v54 = vpop.f32.mrf.mxu1  ;;  %v617_v55 = vadd.f32 %v616_v13, %v4501_v3  ;;  %v4019_v8 = vcombine.low %v4692_v7, %v4698_v5  ;;  %v4083_v13 = vcombine.low %v4700_v15, %v4702_v11  ;;  %v4746_v15 = vld [vmem:[#allocation6 + $0x728] sm:$0xff] }
 0x161   :  { %1884 = vmatpush1.bf16.msra.mxu0 %v3963_v47  ;;  %v4704_v33 = vpack.c.bf16 %v795_v48, %v791_v12  ;;  %v4706_v37 = vpack.c.bf16 %v797_v49, %v793_v16  ;;  %v619_v41 = vadd.f32 %v618_v52, %v4495_v1  ;;  %1997 = vmatpush1.bf16.msra.mxu1 %v4027_v62  ;;  %v4722_v47 = vld [vmem:[#allocation6 + $0x348] sm:$0xff] }
 0x162   :  { %v620_v42 = vpop.f32.mrf.mxu0  ;;  %v733_v43 = vpop.f32.mrf.mxu1  ;;  %1885 = vmatprep.subr.bf16.mxu0 %v4024_v10  ;;  %v732_v44 = vadd.f32 %v731_v54, %v4498_v2  ;;  %v730_v62 = vadd.f32 %v729_v14, %v4504_v4  ;;  %1998 = vmatprep.subr.bf16.mxu1 %v4088_v31  ;;  %v971_v12 = vld [vmem:[#allocation6 + $0x748] sm:$0xff]  ;;  %v4015_v7 = vcombine.low %v4722_v47, %v4724_v51 }
 0x163   :  { %v621_v45 = vadd.f32 %v620_v42, %v4501_v3  ;;  %v734_v46 = vadd.f32 %v733_v43, %v4504_v4  ;;  %1715 = vmatprep.mubr.bf16.mxu0 %v4704_v33  ;;  %1828 = vmatprep.mubr.bf16.mxu1 %v4706_v37  ;;  %v973_v14 = vld [vmem:[#allocation6 + $0x768] sm:$0xff]  ;;  %v4016_v5 = vcombine.high %v4722_v47, %v4724_v51  ;;  %v799_v11 = vmax.f32 %v619_v41, 0.0 }
 0x164   :  { %v622_v0 = vpop.f32.mrf.mxu0  ;;  %v735_v6 = vpop.f32.mrf.mxu1  ;;  %1716 = vmatmul.mubr.bf16.gmra.mxu0 %v4712_v34  ;;  %1829 = vmatmul.mubr.bf16.gmra.mxu1 %v4714_v26  ;;  %v4736_v16 = vld [vmem:[#allocation6 + $0x308] sm:$0xff]  ;;  %v801_v54 = vmax.f32 %v732_v44, 0.0  ;;  %v800_v43 = vmax.f32 %v730_v62, 0.0 }
 0x165   :  { %v623_v9 = vadd.f32 %v622_v0, %v4495_v1  ;;  %v736_v10 = vadd.f32 %v735_v6, %v4498_v2  ;;  %1886 = vmatpush2.bf16.msra.mxu0 %v4023_v63  ;;  %v802_v48 = vmax.f32 %v621_v45, 0.0  ;;  %v804_v49 = vmax.f32 %v734_v46, 0.0  ;;  %1999 = vmatpush2.bf16.msra.mxu1 %v4087_v21  ;;  %v4742_v63 = vld [vmem:[#allocation6 + $0x328] sm:$0xff] }
 0x166   :  { %v626_v53 = vpop.f32.mrf.mxu0  ;;  %v739_v50 = vpop.f32.mrf.mxu1  ;;  %1887 = vmatprep.subr.bf16.mxu0 %v4020_v40  ;;  %v4744_v52 = vld [vmem:[#allocation6 + $0x708] sm:$0xff]  ;;  %2000 = vmatprep.subr.bf16.mxu1 %v4084_v30  ;;  %v798_v21 = vmax.f32 %v617_v55, 0.0  ;;  %v4079_v46 = vcombine.low %v971_v12, %v973_v14  ;;  %v4080_v0 = vcombine.high %v971_v12, %v973_v14  ;;  %v4012_v51 = vcombine.high %v4736_v16, %v4742_v63 }
 0x167   :  { %v803_v31 = vmax.f32 %v623_v9, 0.0  ;;  %v805_v42 = vmax.f32 %v736_v10, 0.0  ;;  %v4076_v41 = vcombine.high %v4744_v52, %v4746_v15  ;;  %v4758_v30 = vpack.c.bf16 %v804_v49, %v800_v43  ;;  %v4766_v14 = vld [vmem:[#allocation6 + $0x2c8] sm:$0xff] }
 0x168   :  { %v628_v40 = vpop.f32.mrf.mxu0  ;;  %v741_v45 = vpop.f32.mrf.mxu1  ;;  %v4756_v44 = vpack.c.bf16 %v802_v48, %v798_v21  ;;  %v4768_v48 = vld [vmem:[#allocation6 + $0x2e8] sm:$0xff]  ;;  %v627_v49 = vadd.f32 %v626_v53, %v4501_v3  ;;  %v4075_v53 = vcombine.low %v4744_v52, %v4746_v15 }
 0x169   :  { %1888 = vmatpush2.bf16.msra.mxu0 %v4019_v8  ;;  %v4748_v6 = vpack.c.bf16 %v803_v31, %v799_v11  ;;  %v4750_v47 = vpack.c.bf16 %v805_v42, %v801_v54  ;;  %v629_v55 = vadd.f32 %v628_v40, %v4495_v1  ;;  %2001 = vmatpush2.bf16.msra.mxu1 %v4083_v13  ;;  %v963_v21 = vld [vmem:[#allocation6 + $0x6c8] sm:$0xff] }
 0x16a   :  { %v630_v62 = vpop.f32.mrf.mxu0  ;;  %v743_v9 = vpop.f32.mrf.mxu1  ;;  %1889 = vmatprep.subr.bf16.mxu0 %v4016_v5  ;;  %v742_v8 = vadd.f32 %v741_v45, %v4498_v2  ;;  %v740_v13 = vadd.f32 %v739_v50, %v4504_v4  ;;  %2002 = vmatprep.subr.bf16.mxu1 %v4080_v0  ;;  %v4011_v54 = vcombine.low %v4736_v16, %v4742_v63  ;;  %v965_v50 = vld [vmem:[#allocation6 + $0x6e8] sm:$0xff] }
 0x16b   :  { %v631_v10 = vadd.f32 %v630_v62, %v4501_v3  ;;  %v744_v12 = vadd.f32 %v743_v9, %v4504_v4  ;;  %1725 = vmatprep.mubr.bf16.mxu0 %v4748_v6  ;;  %1838 = vmatprep.mubr.bf16.mxu1 %v4750_v47  ;;  %v4780_v43 = vld [vmem:[#allocation6 + $0x288] sm:$0xff]  ;;  %v4007_v16 = vcombine.low %v4766_v14, %v4768_v48  ;;  %v807_v15 = vmax.f32 %v629_v55, 0.0 }
 0x16c   :  { %v632_v11 = vpop.f32.mrf.mxu0  ;;  %v745_v5 = vpop.f32.mrf.mxu1  ;;  %1726 = vmatmul.mubr.bf16.gmra.mxu0 %v4756_v44  ;;  %1839 = vmatmul.mubr.bf16.gmra.mxu1 %v4758_v30  ;;  %v4008_v63 = vcombine.high %v4766_v14, %v4768_v48  ;;  %v4786_v9 = vld [vmem:[#allocation6 + $0x688] sm:$0xff]  ;;  %v4071_v57 = vcombine.low %v963_v21, %v965_v50  ;;  %v4072_v61 = vcombine.high %v963_v21, %v965_v50 }
 0x16d   :  { %v633_v31 = vadd.f32 %v632_v11, %v4495_v1  ;;  %v746_v42 = vadd.f32 %v745_v5, %v4498_v2  ;;  %1890 = vmatpush2.bf16.msra.mxu0 %v4015_v7  ;;  %v810_v40 = vmax.f32 %v631_v10, 0.0  ;;  %v812_v45 = vmax.f32 %v744_v12, 0.0  ;;  %2003 = vmatpush2.bf16.msra.mxu1 %v4079_v46  ;;  %v897_v7 = vld [vmem:[#allocation6 + $0x2a8] sm:$0xff] }
 0x16e   :  { %v636_v0 = vpop.f32.mrf.mxu0  ;;  %v749_v62 = vpop.f32.mrf.mxu1  ;;  %1891 = vmatprep.subr.bf16.mxu0 %v4012_v51  ;;  %v4788_v52 = vld [vmem:[#allocation6 + $0x6a8] sm:$0xff]  ;;  %v809_v11 = vmax.f32 %v742_v8, 0.0  ;;  %2004 = vmatprep.subr.bf16.mxu1 %v4076_v41  ;;  %v806_v46 = vmax.f32 %v627_v49, 0.0  ;;  %v808_v12 = vmax.f32 %v740_v13, 0.0  ;;  %v4004_v48 = vcombine.high %v4780_v43, %v897_v7 }
 0x16f   :  { %v811_v5 = vmax.f32 %v633_v31, 0.0  ;;  %v813_v10 = vmax.f32 %v746_v42, 0.0  ;;  %v4068_v55 = vcombine.high %v4786_v9, %v4788_v52  ;;  %v891_v50 = vld [vmem:[#allocation6 + $0x248] sm:$0xff] }
 0x170   :  { %v638_v56 = vpop.f32.mrf.mxu0  ;;  %v751_v51 = vpop.f32.mrf.mxu1  ;;  %v4797_v8 = vpack.c.bf16 %v810_v40, %v806_v46  ;;  %v4799_v31 = vpack.c.bf16 %v812_v45, %v808_v12  ;;  %v893_v40 = vld [vmem:[#allocation6 + $0x268] sm:$0xff]  ;;  %v637_v45 = vadd.f32 %v636_v0, %v4501_v3 }
 0x171   :  { %1892 = vmatpush2.bf16.msra.mxu0 %v4011_v54  ;;  %v4790_v59 = vpack.c.bf16 %v811_v5, %v807_v15  ;;  %v4792_v14 = vpack.c.bf16 %v813_v10, %v809_v11  ;;  %v639_v41 = vadd.f32 %v638_v56, %v4495_v1  ;;  %2005 = vmatpush2.bf16.msra.mxu1 %v4075_v53  ;;  %v955_v10 = vld [vmem:[#allocation6 + $0x648] sm:$0xff] }
 0x172   :  { %v640_v49 = vpop.f32.mrf.mxu0  ;;  %v753_v13 = vpop.f32.mrf.mxu1  ;;  %1893 = vmatprep.subr.bf16.mxu0 %v4008_v63  ;;  %v752_v54 = vadd.f32 %v751_v51, %v4498_v2  ;;  %2006 = vmatprep.subr.bf16.mxu1 %v4072_v61  ;;  %v4003_v53 = vcombine.low %v4780_v43, %v897_v7  ;;  %v750_v63 = vadd.f32 %v749_v62, %v4504_v4  ;;  %v957_v46 = vld [vmem:[#allocation6 + $0x668] sm:$0xff] }
 0x173   :  { %v641_v42 = vadd.f32 %v640_v49, %v4501_v3  ;;  %v754_v21 = vadd.f32 %v753_v13, %v4504_v4  ;;  %1735 = vmatprep.mubr.bf16.mxu0 %v4790_v59  ;;  %1848 = vmatprep.mubr.bf16.mxu1 %v4792_v14  ;;  %v815_v12 = vmax.f32 %v639_v41, 0.0  ;;  %v4067_v61 = vcombine.low %v4786_v9, %v4788_v52  ;;  %v887_v51 = vld [vmem:[#allocation6 + $0x208] sm:$0xff] }
 0x174   :  { %v642_v15 = vpop.f32.mrf.mxu0  ;;  %v755_v56 = vpop.f32.mrf.mxu1  ;;  %1736 = vmatmul.mubr.bf16.gmra.mxu0 %v4797_v8  ;;  %1849 = vmatmul.mubr.bf16.gmra.mxu1 %v4799_v31  ;;  %v4000_v0 = vcombine.high %v891_v50, %v893_v40  ;;  %v817_v43 = vmax.f32 %v752_v54, 0.0  ;;  %v889_v49 = vld [vmem:[#allocation6 + $0x228] sm:$0xff]  ;;  %v4063_v52 = vcombine.low %v955_v10, %v957_v46 }
 0x175   :  { %v643_v11 = vadd.f32 %v642_v15, %v4495_v1  ;;  %v756_v5 = vadd.f32 %v755_v56, %v4498_v2  ;;  %1894 = vmatpush2.bf16.msra.mxu0 %v4007_v16  ;;  %v818_v3 = vmax.f32 %v641_v42, 0.0  ;;  %2007 = vmatpush2.bf16.msra.mxu1 %v4071_v57  ;;  %v820_v7 = vmax.f32 %v754_v21, 0.0  ;;  %v953_v42 = vld [vmem:[#allocation6 + $0x628] sm:$0xff]  ;;  %v2219_v21 = vld [vmem:[#allocation6 + $0x1d0] sm:$0xff] }
 0x176   :  { %1895 = vmatprep.subr.bf16.mxu0 %v4004_v48  ;;  %2008 = vmatprep.subr.bf16.mxu1 %v4068_v55  ;;  %v814_v1 = vmax.f32 %v637_v45, 0.0  ;;  %v4064_v2 = vcombine.high %v955_v10, %v957_v46  ;;  %v816_v16 = vmax.f32 %v750_v63, 0.0  ;;  %v3999_v57 = vcombine.low %v891_v50, %v893_v40  ;;  %v951_v48 = vld [vmem:[#allocation6 + $0x608] sm:$0xff]  ;;  %v2221_v45 = vld [vmem:[#allocation6 + $0x1f0] sm:$0xff] }
 0x177   :  { %v819_v4 = vmax.f32 %v643_v11, 0.0  ;;  %v821_v62 = vmax.f32 %v756_v5, 0.0  ;;  %v3996_v55 = vcombine.high %v887_v51, %v889_v49  ;;  %v4060_v50 = vcombine.high %v951_v48, %v953_v42  ;;  %v2217_v63 = vld [vmem:[#allocation6 + $0x1b0] sm:$0xff] }
 0x178   :  { %v4820_v9 = vpack.c.bf16 %v818_v3, %v814_v1  ;;  %v4822_v54 = vpack.c.bf16 %v820_v7, %v816_v16  ;;  %v3995_v40 = vcombine.low %v887_v51, %v889_v49  ;;  %v4059_v15 = vcombine.low %v951_v48, %v953_v42  ;;  %v2211_v10 = vld [vmem:[#allocation6 + $0x150] sm:$0xff] }
 0x179   :  { %1896 = vmatpush2.bf16.msra.mxu0 %v4003_v53  ;;  %v4816_v13 = vpack.c.bf16 %v819_v4, %v815_v12  ;;  %v4818_v41 = vpack.c.bf16 %v821_v62, %v817_v43  ;;  %2009 = vmatpush2.bf16.msra.mxu1 %v4067_v61  ;;  %v4118_v56 = vcombine.high %v2219_v21, %v2221_v45  ;;  %v2215_v53 = vld [vmem:[#allocation6 + $0x190] sm:$0xff] }
 0x17a   :  { %1897 = vmatprep.subr.bf16.mxu0 %v4000_v0  ;;  %2010 = vmatprep.subr.bf16.mxu1 %v4064_v2  ;;  %v4117_v11 = vcombine.low %v2219_v21, %v2221_v45  ;;  %v4114_v5 = vcombine.high %v2215_v53, %v2217_v63  ;;  %v2213_v46 = vld [vmem:[#allocation6 + $0x170] sm:$0xff]  ;;  %v4838_v2 = vld [vmem:[#allocation6 + $0x1d8] sm:$0xff] }
 0x17b   :  { %1745 = vmatprep.mubr.bf16.mxu0 %v4816_v13  ;;  %1858 = vmatprep.mubr.bf16.mxu1 %v4818_v41  ;;  %v2207_v12 = vld [vmem:[#allocation6 + $0x110] sm:$0xff]  ;;  %v4109_v61 = vcombine.low %v2211_v10, %v2213_v46 }
 0x17c   :  { %1746 = vmatmul.mubr.bf16.gmra.mxu0 %v4820_v9  ;;  %1859 = vmatmul.mubr.bf16.gmra.mxu1 %v4822_v54  ;;  %v2209_v3 = vld [vmem:[#allocation6 + $0x130] sm:$0xff] }
 0x17d   :  { %1898 = vmatpush2.bf16.msra.mxu0 %v3999_v57  ;;  %1901 = vmatprep.mubr.bf16.mxu0 %v4518_v35  ;;  %v4113_v35 = vcombine.low %v2215_v53, %v2217_v63  ;;  %v4106_v0 = vcombine.high %v2207_v12, %v2209_v3  ;;  %v2205_v43 = vld [vmem:[#allocation6 + $0xf0] sm:$0xff] }
 0x17e   :  { %2011 = vmatpush2.bf16.msra.mxu1 %v4063_v52  ;;  %2014 = vmatprep.mubr.bf16.mxu1 %v4520_v36  ;;  %v4110_v36 = vcombine.high %v2211_v10, %v2213_v46  ;;  %v2201_v7 = vld [vmem:[#allocation6 + $0xb0] sm:$0xff] }
 0x17f   :  { %1899 = vmatprep.subr.bf16.mxu0 %v3996_v55  ;;  %2012 = vmatprep.subr.bf16.mxu1 %v4060_v50  ;;  %v2283_v1 = vld [vmem:[#allocation6 + $0x5d0] sm:$0xff] }
 0x180   :  { %v2281_v42 = vld [vmem:[#allocation6 + $0x5b0] sm:$0xff] }
 0x181   :  { %1900 = vmatpush2.bf16.msra.mxu0 %v3995_v40  ;;  %v2191_v52 = vld [vmem:[#allocation6 + $0x10] sm:$0xff] }
 0x182   :  { %2013 = vmatpush2.bf16.msra.mxu1 %v4059_v15  ;;  %2980 = vmatprep.subr.bf16.mxu0 %v4118_v56  ;;  %v2193_v55 = vld [vmem:[#allocation6 + $0x30] sm:$0xff] }
 0x183   :  { %v4090_v45 = vcombine.high %v2191_v52, %v2193_v55  ;;  %v2275_v50 = vld [vmem:[#allocation6 + $0x550] sm:$0xff]  ;;  %v4089_v63 = vcombine.low %v2191_v52, %v2193_v55 }
 0x184   :  { %1902 = vmatmul.mubr.bf16.vlgmr.msra.gmra.mxu0 %v4524_v38  ;;  %v2203_v38 = vld [vmem:[#allocation6 + $0xd0] sm:$0xff] }
 0x185   :  { %2015 = vmatmul.mubr.bf16.vlgmr.msra.gmra.mxu1 %v4526_v39  ;;  %1911 = vmatprep.mubr.bf16.mxu0 %v4572_v25  ;;  %v4105_v39 = vcombine.low %v2207_v12, %v2209_v3  ;;  %v4102_v25 = vcombine.high %v2203_v38, %v2205_v43  ;;  %v4101_v4 = vcombine.low %v2203_v38, %v2205_v43  ;;  %v2277_v40 = vld [vmem:[#allocation6 + $0x570] sm:$0xff] }
 0x186   :  { %2024 = vmatprep.mubr.bf16.mxu1 %v4582_v32  ;;  %2981 = vmatpush1.bf16.msra.mxu0 %v4117_v11  ;;  %v2199_v32 = vld [vmem:[#allocation6 + $0x90] sm:$0xff]  ;;  %v4174_v56 = vcombine.high %v2275_v50, %v2277_v40  ;;  %v4173_v53 = vcombine.low %v2275_v50, %v2277_v40 }
 0x187   :  { %2982 = vmatprep.subr.bf16.mxu0 %v4114_v5  ;;  %v4098_v62 = vcombine.high %v2199_v32, %v2201_v7  ;;  %v4097_v57 = vcombine.low %v2199_v32, %v2201_v7  ;;  %v2253_v15 = vld [vmem:[#allocation6 + $0x3f0] sm:$0xff] }
 0x188   :  { %v2271_v5 = vld [vmem:[#allocation6 + $0x510] sm:$0xff] }
 0x189   :  { %v2273_v10 = vld [vmem:[#allocation6 + $0x530] sm:$0xff] }
 0x18a   :  { %2983 = vmatpush1.bf16.msra.mxu0 %v4113_v35  ;;  %v2247_v46 = vld [vmem:[#allocation6 + $0x390] sm:$0xff]  ;;  %v4170_v35 = vcombine.high %v2271_v5, %v2273_v10 }
 0x18b   :  { %2984 = vmatprep.subr.bf16.mxu0 %v4110_v36  ;;  %v4169_v36 = vcombine.low %v2271_v5, %v2273_v10  ;;  %v2269_v3 = vld [vmem:[#allocation6 + $0x4f0] sm:$0xff] }
 0x18c   :  { %1912 = vmatmul.mubr.bf16.gmra.mxu0 %v4578_v28  ;;  %v2285_v28 = vld [vmem:[#allocation6 + $0x5f0] sm:$0xff] }
 0x18d   :  { %2025 = vmatmul.mubr.bf16.gmra.mxu1 %v4580_v29  ;;  %1921 = vmatprep.mubr.bf16.mxu0 %v4616_v19  ;;  %v2195_v29 = vld [vmem:[#allocation6 + $0x50] sm:$0xff]  ;;  %v4182_v51 = vcombine.high %v2283_v1, %v2285_v28  ;;  %v4181_v49 = vcombine.low %v2283_v1, %v2285_v28 }
 0x18e   :  { %2034 = vmatprep.mubr.bf16.mxu1 %v4618_v20  ;;  %2985 = vmatpush1.bf16.msra.mxu0 %v4109_v61  ;;  %v2197_v19 = vld [vmem:[#allocation6 + $0x70] sm:$0xff]  ;;  %v4841_v20 = vld [vmem:[#allocation6 + $0x1f8] sm:$0xff] }
 0x18f   :  { %2986 = vmatprep.subr.bf16.mxu0 %v4106_v0  ;;  %v4119_v16 = vcombine.low %v4838_v2, %v4841_v20  ;;  %v4094_v48 = vcombine.high %v2195_v29, %v2197_v19  ;;  %3093 = vmatprep.subr.bf16.mxu1 %v4182_v51  ;;  %v2245_v61 = vld [vmem:[#allocation6 + $0x370] sm:$0xff] }
 0x190   :  { %3094 = vmatpush1.bf16.msra.mxu1 %v4181_v49  ;;  %v2265_v32 = vld [vmem:[#allocation6 + $0x4b0] sm:$0xff] }
 0x191   :  { %v2239_v7 = vld [vmem:[#allocation6 + $0x310] sm:$0xff] }
 0x192   :  { %2987 = vmatpush1.bf16.msra.mxu0 %v4105_v39  ;;  %v2261_v28 = vld [vmem:[#allocation6 + $0x470] sm:$0xff] }
 0x193   :  { %2988 = vmatprep.subr.bf16.mxu0 %v4102_v25  ;;  %v2263_v25 = vld [vmem:[#allocation6 + $0x490] sm:$0xff] }
 0x194   :  { %1922 = vmatmul.mubr.bf16.gmra.mxu0 %v4624_v23  ;;  %v2279_v23 = vld [vmem:[#allocation6 + $0x590] sm:$0xff] }
 0x195   :  { %2035 = vmatmul.mubr.bf16.gmra.mxu1 %v4626_v24  ;;  %1931 = vmatprep.mubr.bf16.mxu0 %v4660_v17  ;;  %v4178_v21 = vcombine.high %v2279_v23, %v2281_v42  ;;  %v4177_v24 = vcombine.low %v2279_v23, %v2281_v42  ;;  %v4093_v17 = vcombine.low %v2195_v29, %v2197_v19  ;;  %v2237_v29 = vld [vmem:[#allocation6 + $0x2f0] sm:$0xff] }
 0x196   :  { %2044 = vmatprep.mubr.bf16.mxu1 %v4662_v18  ;;  %2989 = vmatpush1.bf16.msra.mxu0 %v4101_v4  ;;  %v2251_v18 = vld [vmem:[#allocation6 + $0x3d0] sm:$0xff]  ;;  %v4162_v4 = vcombine.high %v2263_v25, %v2265_v32 }
 0x197   :  { %2990 = vmatprep.subr.bf16.mxu0 %v4098_v62  ;;  %3095 = vmatprep.subr.bf16.mxu1 %v4178_v21  ;;  %v4150_v11 = vcombine.high %v2251_v18, %v2253_v15  ;;  %v4149_v12 = vcombine.low %v2251_v18, %v2253_v15  ;;  %v4161_v62 = vcombine.low %v2263_v25, %v2265_v32  ;;  %v2257_v23 = vld [vmem:[#allocation6 + $0x430] sm:$0xff] }
 0x198   :  { %3096 = vmatpush1.bf16.msra.mxu1 %v4177_v24  ;;  %v2231_v42 = vld [vmem:[#allocation6 + $0x290] sm:$0xff] }
 0x199   :  { %3097 = vmatprep.subr.bf16.mxu1 %v4174_v56  ;;  %v2317_v24 = vld [vmem:[#allocation6 + $0x7f0] sm:$0xff] }
 0x19a   :  { %2991 = vmatpush1.bf16.msra.mxu0 %v4097_v57  ;;  %v2311_v15 = vld [vmem:[#allocation6 + $0x790] sm:$0xff] }
 0x19b   :  { %2992 = vmatprep.subr.bf16.mxu0 %v4094_v48  ;;  %v2255_v48 = vld [vmem:[#allocation6 + $0x410] sm:$0xff] }
 0x19c   :  { %1932 = vmatmul.mubr.bf16.gmra.mxu0 %v4668_v27  ;;  %v2249_v27 = vld [vmem:[#allocation6 + $0x3b0] sm:$0xff]  ;;  %3098 = vmatpush1.bf16.msra.mxu1 %v4173_v53  ;;  %v4154_v52 = vcombine.high %v2255_v48, %v2257_v23  ;;  %v4153_v55 = vcombine.low %v2255_v48, %v2257_v23 }
 0x19d   :  { %2045 = vmatmul.mubr.bf16.gmra.mxu1 %v4670_v22  ;;  %1941 = vmatprep.mubr.bf16.mxu0 %v4704_v33  ;;  %v4146_v22 = vcombine.high %v2247_v46, %v2249_v27  ;;  %v2267_v33 = vld [vmem:[#allocation6 + $0x4d0] sm:$0xff]  ;;  %v4145_v43 = vcombine.low %v2247_v46, %v2249_v27 }
 0x19e   :  { %2054 = vmatprep.mubr.bf16.mxu1 %v4706_v37  ;;  %2993 = vmatpush1.bf16.msra.mxu0 %v4093_v17  ;;  %v2243_v37 = vld [vmem:[#allocation6 + $0x350] sm:$0xff]  ;;  %v4166_v0 = vcombine.high %v2267_v33, %v2269_v3  ;;  %v4165_v38 = vcombine.low %v2267_v33, %v2269_v3 }
 0x19f   :  { %2994 = vmatprep.subr.bf16.mxu0 %v4090_v45  ;;  %3099 = vmatprep.subr.bf16.mxu1 %v4170_v35  ;;  %v4142_v39 = vcombine.high %v2243_v37, %v2245_v61  ;;  %v4141_v1 = vcombine.low %v2243_v37, %v2245_v61  ;;  %v2229_v17 = vld [vmem:[#allocation6 + $0x270] sm:$0xff]  ;;  %v4120_v35 = vcombine.high %v4838_v2, %v4841_v20 }
 0x1a0   :  { %3100 = vmatpush1.bf16.msra.mxu1 %v4169_v36  ;;  %v2313_v56 = vld [vmem:[#allocation6 + $0x7b0] sm:$0xff] }
 0x1a1   :  { %3101 = vmatprep.subr.bf16.mxu1 %v4166_v0  ;;  %v2223_v53 = vld [vmem:[#allocation6 + $0x210] sm:$0xff] }
 0x1a2   :  { %2995 = vmatpush1.bf16.msra.mxu0 %v4089_v63  ;;  %v4210_v63 = vcombine.high %v2311_v15, %v2313_v56  ;;  %v2309_v10 = vld [vmem:[#allocation6 + $0x770] sm:$0xff] }
 0x1a3   :  { %2996 = vmatprep.subr.bf16.mxu0 %v4150_v11  ;;  %v4209_v11 = vcombine.low %v2311_v15, %v2313_v56  ;;  %v2303_v36 = vld [vmem:[#allocation6 + $0x710] sm:$0xff] }
 0x1a4   :  { %1942 = vmatmul.mubr.bf16.gmra.mxu0 %v4712_v34  ;;  %v2241_v34 = vld [vmem:[#allocation6 + $0x330] sm:$0xff]  ;;  %3102 = vmatpush1.bf16.msra.mxu1 %v4165_v38 }
 0x1a5   :  { %2055 = vmatmul.mubr.bf16.gmra.mxu1 %v4714_v26  ;;  %1951 = vmatprep.mubr.bf16.mxu0 %v4748_v6  ;;  %v4138_v26 = vcombine.high %v2239_v7, %v2241_v34  ;;  %v2259_v6 = vld [vmem:[#allocation6 + $0x450] sm:$0xff]  ;;  %v4137_v49 = vcombine.low %v2239_v7, %v2241_v34 }
 0x1a6   :  { %2064 = vmatprep.mubr.bf16.mxu1 %v4750_v47  ;;  %2997 = vmatpush2.bf16.msra.mxu0 %v4149_v12  ;;  %v2235_v47 = vld [vmem:[#allocation6 + $0x2d0] sm:$0xff]  ;;  %v4158_v19 = vcombine.high %v2259_v6, %v2261_v28  ;;  %v4157_v51 = vcombine.low %v2259_v6, %v2261_v28  ;;  %v4870_v6 = vld [vmem:[#allocation6 + $0x5f8] sm:$0xff] }
 0x1a7   :  { %2998 = vmatprep.subr.bf16.mxu0 %v4146_v22  ;;  %3103 = vmatprep.subr.bf16.mxu1 %v4162_v4  ;;  %v4134_v57 = vcombine.high %v2235_v47, %v2237_v29  ;;  %v4133_v21 = vcombine.low %v2235_v47, %v2237_v29  ;;  %v2305_v12 = vld [vmem:[#allocation6 + $0x730] sm:$0xff]  ;;  %v4876_v29 = vld [vmem:[#allocation7 + $0x1] ss:$4 sm:$0xf] }
 0x1a8   :  { %3104 = vmatpush1.bf16.msra.mxu1 %v4161_v62  ;;  %v4202_v22 = vcombine.high %v2303_v36, %v2305_v12  ;;  %v4201_v33 = vcombine.low %v2303_v36, %v2305_v12  ;;  %v2301_v3 = vld [vmem:[#allocation6 + $0x6f0] sm:$0xff] }
 0x1a9   :  { %3105 = vmatprep.subr.bf16.mxu1 %v4158_v19  ;;  %v2295_v61 = vld [vmem:[#allocation6 + $0x690] sm:$0xff]  ;;  %v4880_v19 = vrot.slane %v4876_v29, %v4483_v58 }
 0x1aa   :  { %2999 = vmatpush2.bf16.msra.mxu0 %v4145_v43  ;;  %v2297_v0 = vld [vmem:[#allocation6 + $0x6b0] sm:$0xff] }
 0x1ab   :  { %3000 = vmatprep.subr.bf16.mxu0 %v4142_v39  ;;  %v4194_v38 = vcombine.high %v2295_v61, %v2297_v0  ;;  %v4193_v43 = vcombine.low %v2295_v61, %v2297_v0  ;;  %v2291_v39 = vld [vmem:[#allocation6 + $0x650] sm:$0xff]  ;;  %v2214_v61 = vld [vmem:[#allocation6 + $0x178] sm:$0xff] }
 0x1ac   :  { %1952 = vmatmul.mubr.bf16.gmra.mxu0 %v4756_v44  ;;  %v2233_v44 = vld [vmem:[#allocation6 + $0x2b0] sm:$0xff]  ;;  %3106 = vmatpush1.bf16.msra.mxu1 %v4157_v51  ;;  %v4884_v51 = vrot.slane %v4876_v29, %v4489_v60 }
 0x1ad   :  { %2065 = vmatmul.mubr.bf16.gmra.mxu1 %v4758_v30  ;;  %1961 = vmatprep.mubr.bf16.mxu0 %v4790_v59  ;;  %v4130_v59 = vcombine.high %v2231_v42, %v2233_v44  ;;  %v2315_v30 = vld [vmem:[#allocation6 + $0x7d0] sm:$0xff]  ;;  %v4129_v40 = vcombine.low %v2231_v42, %v2233_v44 }
 0x1ae   :  { %2074 = vmatprep.mubr.bf16.mxu1 %v4792_v14  ;;  %3001 = vmatpush2.bf16.msra.mxu0 %v4141_v1  ;;  %v2227_v14 = vld [vmem:[#allocation6 + $0x250] sm:$0xff]  ;;  %v4214_v45 = vcombine.high %v2315_v30, %v2317_v24  ;;  %v4213_v50 = vcombine.low %v2315_v30, %v2317_v24 }
 0x1af   :  { %3002 = vmatprep.subr.bf16.mxu0 %v4138_v26  ;;  %3107 = vmatprep.subr.bf16.mxu1 %v4154_v52  ;;  %v4126_v18 = vcombine.high %v2227_v14, %v2229_v17  ;;  %v4125_v5 = vcombine.low %v2227_v14, %v2229_v17  ;;  %v2293_v25 = vld [vmem:[#allocation6 + $0x670] sm:$0xff]  ;;  %v4868_v26 = vld [vmem:[#allocation6 + $0x5d8] sm:$0xff] }
 0x1b0   :  { %3108 = vmatpush1.bf16.msra.mxu1 %v4153_v55  ;;  %v4190_v32 = vcombine.high %v2291_v39, %v2293_v25  ;;  %v4189_v7 = vcombine.low %v2291_v39, %v2293_v25  ;;  %v2287_v34 = vld [vmem:[#allocation6 + $0x610] sm:$0xff]  ;;  %v4184_v28 = vcombine.high %v4868_v26, %v4870_v6  ;;  %v4183_v47 = vcombine.low %v4868_v26, %v4870_v6 }
 0x1b1   :  { %3109 = vmatprep.subr.bf16.mxu1 %v4214_v45  ;;  %v2289_v4 = vld [vmem:[#allocation6 + $0x630] sm:$0xff] }
 0x1b2   :  { %3003 = vmatpush2.bf16.msra.mxu0 %v4137_v49  ;;  %v4186_v62 = vcombine.high %v2287_v34, %v2289_v4  ;;  %v4185_v1 = vcombine.low %v2287_v34, %v2289_v4 }
 0x1b3   :  { %3004 = vmatprep.subr.bf16.mxu0 %v4134_v57 }
 0x1b4   :  { %1962 = vmatmul.mubr.bf16.gmra.mxu0 %v4797_v8  ;;  %v2225_v8 = vld [vmem:[#allocation6 + $0x230] sm:$0xff]  ;;  %3110 = vmatpush2.bf16.msra.mxu1 %v4213_v50 }
 0x1b5   :  { %2075 = vmatmul.mubr.bf16.gmra.mxu1 %v4799_v31  ;;  %1971 = vmatprep.mubr.bf16.mxu0 %v4816_v13  ;;  %v4122_v31 = vcombine.high %v2223_v53, %v2225_v8  ;;  %v2307_v13 = vld [vmem:[#allocation6 + $0x750] sm:$0xff]  ;;  %v4121_v27 = vcombine.low %v2223_v53, %v2225_v8 }
 0x1b6   :  { %2084 = vmatprep.mubr.bf16.mxu1 %v4818_v41  ;;  %3005 = vmatpush2.bf16.msra.mxu0 %v4133_v21  ;;  %v4206_v41 = vcombine.high %v2307_v13, %v2309_v10  ;;  %v4205_v46 = vcombine.low %v2307_v13, %v2309_v10 }
 0x1b7   :  { %3006 = vmatprep.subr.bf16.mxu0 %v4130_v59  ;;  %3111 = vmatprep.subr.bf16.mxu1 %v4210_v63 }
 0x1b8   :  { %3112 = vmatpush2.bf16.msra.mxu1 %v4209_v11 }
 0x1b9   :  { %3113 = vmatprep.subr.bf16.mxu1 %v4206_v41 }
 0x1ba   :  { %3007 = vmatpush2.bf16.msra.mxu0 %v4129_v40 }
 0x1bb   :  { %3008 = vmatprep.subr.bf16.mxu0 %v4126_v18 }
 0x1bc   :  { %1972 = vmatmul.mubr.bf16.gmra.mxu0 %v4820_v9  ;;  %3114 = vmatpush2.bf16.msra.mxu1 %v4205_v46  ;;  %v2299_v9 = vld [vmem:[#allocation6 + $0x6d0] sm:$0xff] }
 0x1bd   :  { %2085 = vmatmul.mubr.bf16.gmra.mxu1 %v4822_v54  ;;  %3115 = vmatprep.subr.bf16.mxu1 %v4202_v22  ;;  %v4198_v54 = vcombine.high %v2299_v9, %v2301_v3  ;;  %v4197_v37 = vcombine.low %v2299_v9, %v2301_v3 }
 0x1be   :  { %3009 = vmatpush2.bf16.msra.mxu0 %v4125_v5  ;;  %v2216_v5 = vld [vmem:[#allocation6 + $0x198] sm:$0xff] }
 0x1bf   :  { %3010 = vmatprep.subr.bf16.mxu0 %v4122_v31  ;;  %v2218_v31 = vld [vmem:[#allocation6 + $0x1b8] sm:$0xff] }
 0x1c0   :  { %3116 = vmatpush2.bf16.msra.mxu1 %v4201_v33  ;;  %v4116_v22 = vcombine.high %v2216_v5, %v2218_v31  ;;  %v4115_v25 = vcombine.low %v2216_v5, %v2218_v31 }
 0x1c1   :  { %3117 = vmatprep.subr.bf16.mxu1 %v4198_v54 }
 0x1c2   :  { %3011 = vmatpush2.bf16.msra.mxu0 %v4121_v27 }
 0x1c3   :  { %3206 = vmatprep.subr.bf16.mxu0 %v4120_v35 }
 0x1c4   :  { %3118 = vmatpush2.bf16.msra.mxu1 %v4197_v37  ;;  %v2212_v37 = vld [vmem:[#allocation6 + $0x158] sm:$0xff] }
 0x1c5   :  { %3119 = vmatprep.subr.bf16.mxu1 %v4194_v38  ;;  %v4112_v34 = vcombine.high %v2212_v37, %v2214_v61 }
 0x1c8   :  { %3120 = vmatpush2.bf16.msra.mxu1 %v4193_v43 }
 0x1c9   :  { %3121 = vmatprep.subr.bf16.mxu1 %v4190_v32 }
 0x1cc   :  { %3122 = vmatpush2.bf16.msra.mxu1 %v4189_v7 }
 0x1cd   :  { %3123 = vmatprep.subr.bf16.mxu1 %v4186_v62 }
 0x1d0   :  { %3124 = vmatpush2.bf16.msra.mxu1 %v4185_v1 }
 0x1d1   :  { %3319 = vmatprep.subr.bf16.mxu1 %v4184_v28 }
 0x204   :  { %v1677_v49 = vpop.f32.mrf.mxu0  ;;  %v1790_v57 = vpop.f32.mrf.mxu1 }
 0x205   :  { %v1678_v44 = vadd.f32 %v1677_v49, %v4884_v51  ;;  %v2208_v49 = vld [vmem:[#allocation6 + $0x118] sm:$0xff] }
 0x206   :  { %v1679_v48 = vpop.f32.mrf.mxu0  ;;  %v1792_v23 = vpop.f32.mrf.mxu1 }
 0x207   :  { %v1680_v42 = vadd.f32 %v1679_v48, %v4880_v19  ;;  %v1791_v45 = vadd.f32 %v1790_v57, %v1678_v44  ;;  %v2210_v57 = vld [vmem:[#allocation6 + $0x138] sm:$0xff] }
 0x208   :  { %v1681_v52 = vpop.f32.mrf.mxu0  ;;  %v1794_v55 = vpop.f32.mrf.mxu1 }
 0x209   :  { %v1682_v21 = vadd.f32 %v1681_v52, %v4884_v51  ;;  %v1793_v24 = vadd.f32 %v1792_v23, %v1680_v42  ;;  %v2095_v13 = vmax.f32 %v1791_v45, 0.0  ;;  %v2206_v45 = vld [vmem:[#allocation6 + $0xf8] sm:$0xff] }
 0x20a   :  { %v1683_v59 = vpop.f32.mrf.mxu0  ;;  %v1796_v30 = vpop.f32.mrf.mxu1 }
 0x20b   :  { %v1795_v14 = vadd.f32 %v1794_v55, %v1682_v21  ;;  %v1684_v17 = vadd.f32 %v1683_v59, %v4880_v19  ;;  %v2096_v53 = vmax.f32 %v1793_v24, 0.0  ;;  %v4108_v21 = vcombine.high %v2208_v49, %v2210_v57 }
 0x20c   :  { %v1687_v50 = vpop.f32.mrf.mxu0  ;;  %v1800_v18 = vpop.f32.mrf.mxu1 }
 0x20d   :  { %v1797_v40 = vadd.f32 %v1796_v30, %v1684_v17  ;;  %v2099_v15 = vmax.f32 %v1795_v14, 0.0  ;;  %v1688_v10 = vadd.f32 %v1687_v50, %v4884_v51  ;;  %v2204_v17 = vld [vmem:[#allocation6 + $0xd8] sm:$0xff] }
 0x20e   :  { %v1689_v56 = vpop.f32.mrf.mxu0  ;;  %v1802_v11 = vpop.f32.mrf.mxu1 }
 0x20f   :  { %v2100_v8 = vmax.f32 %v1797_v40, 0.0  ;;  %v1690_v63 = vadd.f32 %v1689_v56, %v4880_v19  ;;  %v4895_v36 = vpack.c.bf16 %v2099_v15, %v2095_v13  ;;  %v1801_v0 = vadd.f32 %v1800_v18, %v1688_v10  ;;  %v2200_v10 = vld [vmem:[#allocation6 + $0x98] sm:$0xff] }
 0x210   :  { %v1691_v41 = vpop.f32.mrf.mxu0  ;;  %v1804_v27 = vpop.f32.mrf.mxu1  ;;  %v4107_v56 = vcombine.low %v2208_v49, %v2210_v57 }
 0x211   :  { %v1692_v46 = vadd.f32 %v1691_v41, %v4884_v51  ;;  %v4893_v35 = vpack.c.bf16 %v2100_v8, %v2096_v53  ;;  %v1803_v33 = vadd.f32 %v1802_v11, %v1690_v63  ;;  %v2103_v48 = vmax.f32 %v1801_v0, 0.0  ;;  %v2202_v41 = vld [vmem:[#allocation6 + $0xb8] sm:$0xff] }
 0x212   :  { %v1693_v12 = vpop.f32.mrf.mxu0  ;;  %v1806_v54 = vpop.f32.mrf.mxu1  ;;  %v4104_v63 = vcombine.high %v2204_v17, %v2206_v45 }
 0x213   :  { %v1805_v9 = vadd.f32 %v1804_v27, %v1692_v46  ;;  %v1694_v3 = vadd.f32 %v1693_v12, %v4880_v19  ;;  %3012 = vmatprep.mubr.bf16.mxu0 %v4893_v35  ;;  %v2104_v4 = vmax.f32 %v1803_v33, 0.0 }
 0x214   :  { %v1697_v38 = vpop.f32.mrf.mxu0  ;;  %3013 = vmatmul.mubr.bf16.vlgmr.msra.gmra.mxu0 %v4895_v36  ;;  %v1810_v39 = vpop.f32.mrf.mxu1 }
 0x215   :  { %v1807_v43 = vadd.f32 %v1806_v54, %v1694_v3  ;;  %3207 = vmatpush1.bf16.msra.mxu0 %v4119_v16  ;;  %v2107_v32 = vmax.f32 %v1805_v9, 0.0  ;;  %v1698_v23 = vadd.f32 %v1697_v38, %v4884_v51  ;;  %v4111_v16 = vcombine.low %v2212_v37, %v2214_v61 }
 0x216   :  { %v1699_v7 = vpop.f32.mrf.mxu0  ;;  %3208 = vmatprep.subr.bf16.mxu0 %v4116_v22  ;;  %v1812_v28 = vpop.f32.mrf.mxu1  ;;  %v4103_v3 = vcombine.low %v2204_v17, %v2206_v45  ;;  %v4100_v61 = vcombine.high %v2200_v10, %v2202_v41 }
 0x217   :  { %v2108_v62 = vmax.f32 %v1807_v43, 0.0  ;;  %v1700_v1 = vadd.f32 %v1699_v7, %v4880_v19  ;;  %v4908_v52 = vpack.c.bf16 %v2107_v32, %v2103_v48  ;;  %v1811_v50 = vadd.f32 %v1810_v39, %v1698_v23  ;;  %v2198_v32 = vld [vmem:[#allocation6 + $0x78] sm:$0xff] }
 0x218   :  { %v1701_v42 = vpop.f32.mrf.mxu0  ;;  %v1814_v2 = vpop.f32.mrf.mxu1 }
 0x219   :  { %v1702_v44 = vadd.f32 %v1701_v42, %v4884_v51  ;;  %3209 = vmatpush1.bf16.msra.mxu0 %v4115_v25  ;;  %v4906_v20 = vpack.c.bf16 %v2108_v62, %v2104_v4  ;;  %v1813_v59 = vadd.f32 %v1812_v28, %v1700_v1  ;;  %v2111_v46 = vmax.f32 %v1811_v50, 0.0  ;;  %v2196_v25 = vld [vmem:[#allocation6 + $0x58] sm:$0xff] }
 0x21a   :  { %v1703_v55 = vpop.f32.mrf.mxu0  ;;  %3210 = vmatprep.subr.bf16.mxu0 %v4112_v34  ;;  %v1816_v14 = vpop.f32.mrf.mxu1  ;;  %v4099_v1 = vcombine.low %v2200_v10, %v2202_v41  ;;  %v4096_v57 = vcombine.high %v2196_v25, %v2198_v32  ;;  %v4095_v17 = vcombine.low %v2196_v25, %v2198_v32 }
 0x21b   :  { %v1815_v30 = vadd.f32 %v1814_v2, %v1702_v44  ;;  %v1704_v24 = vadd.f32 %v1703_v55, %v4880_v19  ;;  %3022 = vmatprep.mubr.bf16.mxu0 %v4906_v20  ;;  %v2112_v11 = vmax.f32 %v1813_v59, 0.0  ;;  %v2192_v2 = vld [vmem:[#allocation6 + $0x18] sm:$0xff] }
 0x21c   :  { %v1707_v40 = vpop.f32.mrf.mxu0  ;;  %3023 = vmatmul.mubr.bf16.gmra.mxu0 %v4908_v52  ;;  %v1820_v15 = vpop.f32.mrf.mxu1 }
 0x21d   :  { %v1817_v18 = vadd.f32 %v1816_v14, %v1704_v24  ;;  %3211 = vmatpush1.bf16.msra.mxu0 %v4111_v16  ;;  %v2115_v53 = vmax.f32 %v1815_v30, 0.0  ;;  %v1708_v27 = vadd.f32 %v1707_v40, %v4884_v51  ;;  %v2194_v16 = vld [vmem:[#allocation6 + $0x38] sm:$0xff] }
 0x21e   :  { %v1709_v8 = vpop.f32.mrf.mxu0  ;;  %3212 = vmatprep.subr.bf16.mxu0 %v4108_v21  ;;  %v1822_v13 = vpop.f32.mrf.mxu1  ;;  %v4092_v40 = vcombine.high %v2192_v2, %v2194_v16  ;;  %v4091_v10 = vcombine.low %v2192_v2, %v2194_v16 }
 0x21f   :  { %v2116_v5 = vmax.f32 %v1817_v18, 0.0  ;;  %v1710_v31 = vadd.f32 %v1709_v8, %v4880_v19  ;;  %v4918_v54 = vpack.c.bf16 %v2115_v53, %v2111_v46  ;;  %v1821_v7 = vadd.f32 %v1820_v15, %v1708_v27  ;;  %v2252_v8 = vld [vmem:[#allocation6 + $0x3d8] sm:$0xff] }
 0x220   :  { %v1711_v12 = vpop.f32.mrf.mxu0  ;;  %v1824_v33 = vpop.f32.mrf.mxu1 }
 0x221   :  { %v1712_v22 = vadd.f32 %v1711_v12, %v4884_v51  ;;  %3213 = vmatpush1.bf16.msra.mxu0 %v4107_v56  ;;  %v4916_v9 = vpack.c.bf16 %v2116_v5, %v2112_v11  ;;  %v1823_v0 = vadd.f32 %v1822_v13, %v1710_v31  ;;  %v2119_v55 = vmax.f32 %v1821_v7, 0.0 }
 0x222   :  { %v1713_v37 = vpop.f32.mrf.mxu0  ;;  %3214 = vmatprep.subr.bf16.mxu0 %v4104_v63  ;;  %v1826_v39 = vpop.f32.mrf.mxu1  ;;  %v2254_v63 = vld [vmem:[#allocation6 + $0x3f8] sm:$0xff] }
 0x223   :  { %v1825_v38 = vadd.f32 %v1824_v33, %v1712_v22  ;;  %v1714_v43 = vadd.f32 %v1713_v37, %v4880_v19  ;;  %3032 = vmatprep.mubr.bf16.mxu0 %v4916_v9  ;;  %v2120_v48 = vmax.f32 %v1823_v0, 0.0  ;;  %v4152_v27 = vcombine.high %v2252_v8, %v2254_v63  ;;  %v2248_v37 = vld [vmem:[#allocation6 + $0x398] sm:$0xff] }
 0x224   :  { %v1717_v34 = vpop.f32.mrf.mxu0  ;;  %3033 = vmatmul.mubr.bf16.gmra.mxu0 %v4918_v54  ;;  %v1830_v62 = vpop.f32.mrf.mxu1  ;;  %v4151_v7 = vcombine.low %v2252_v8, %v2254_v63 }
 0x225   :  { %v1827_v4 = vadd.f32 %v1826_v39, %v1714_v43  ;;  %3215 = vmatpush1.bf16.msra.mxu0 %v4103_v3  ;;  %v2123_v28 = vmax.f32 %v1825_v38, 0.0  ;;  %v1718_v21 = vadd.f32 %v1717_v34, %v4884_v51 }
 0x226   :  { %v1719_v49 = vpop.f32.mrf.mxu0  ;;  %3216 = vmatprep.subr.bf16.mxu0 %v4100_v61  ;;  %v1832_v44 = vpop.f32.mrf.mxu1  ;;  %v2250_v61 = vld [vmem:[#allocation6 + $0x3b8] sm:$0xff] }
 0x227   :  { %v2124_v23 = vmax.f32 %v1827_v4, 0.0  ;;  %v1720_v42 = vadd.f32 %v1719_v49, %v4880_v19  ;;  %v4928_v45 = vpack.c.bf16 %v2123_v28, %v2119_v55  ;;  %v1831_v11 = vadd.f32 %v1830_v62, %v1718_v21 }
 0x228   :  { %v1721_v59 = vpop.f32.mrf.mxu0  ;;  %v1834_v24 = vpop.f32.mrf.mxu1  ;;  %v4148_v62 = vcombine.high %v2248_v37, %v2250_v61  ;;  %v4147_v55 = vcombine.low %v2248_v37, %v2250_v61 }
 0x229   :  { %v1722_v30 = vadd.f32 %v1721_v59, %v4884_v51  ;;  %3217 = vmatpush1.bf16.msra.mxu0 %v4099_v1  ;;  %v4926_v14 = vpack.c.bf16 %v2124_v23, %v2120_v48  ;;  %v1833_v18 = vadd.f32 %v1832_v44, %v1720_v42  ;;  %v2127_v0 = vmax.f32 %v1831_v11, 0.0  ;;  %v2244_v48 = vld [vmem:[#allocation6 + $0x358] sm:$0xff] }
 0x22a   :  { %v1723_v50 = vpop.f32.mrf.mxu0  ;;  %3218 = vmatprep.subr.bf16.mxu0 %v4096_v57  ;;  %v1836_v53 = vpop.f32.mrf.mxu1  ;;  %v2246_v23 = vld [vmem:[#allocation6 + $0x378] sm:$0xff] }
 0x22b   :  { %v1835_v15 = vadd.f32 %v1834_v24, %v1722_v30  ;;  %v1724_v56 = vadd.f32 %v1723_v50, %v4880_v19  ;;  %3042 = vmatprep.mubr.bf16.mxu0 %v4926_v14  ;;  %v2128_v12 = vmax.f32 %v1833_v18, 0.0  ;;  %v4144_v30 = vcombine.high %v2244_v48, %v2246_v23  ;;  %v2240_v18 = vld [vmem:[#allocation6 + $0x318] sm:$0xff] }
 0x22c   :  { %v1727_v5 = vpop.f32.mrf.mxu0  ;;  %3043 = vmatmul.mubr.bf16.gmra.mxu0 %v4928_v45  ;;  %v1840_v13 = vpop.f32.mrf.mxu1 }
 0x22d   :  { %v1837_v31 = vadd.f32 %v1836_v53, %v1724_v56  ;;  %3219 = vmatpush1.bf16.msra.mxu0 %v4095_v17  ;;  %v2131_v41 = vmax.f32 %v1835_v15, 0.0  ;;  %v1728_v38 = vadd.f32 %v1727_v5, %v4884_v51  ;;  %v2242_v15 = vld [vmem:[#allocation6 + $0x338] sm:$0xff] }
 0x22e   :  { %v1729_v46 = vpop.f32.mrf.mxu0  ;;  %3220 = vmatprep.subr.bf16.mxu0 %v4092_v40  ;;  %v1842_v3 = vpop.f32.mrf.mxu1 }
 0x22f   :  { %v2132_v22 = vmax.f32 %v1837_v31, 0.0  ;;  %v1730_v33 = vadd.f32 %v1729_v46, %v4880_v19  ;;  %v4938_v34 = vpack.c.bf16 %v2131_v41, %v2127_v0  ;;  %v1841_v42 = vadd.f32 %v1840_v13, %v1728_v38 }
 0x230   :  { %v1731_v43 = vpop.f32.mrf.mxu0  ;;  %v1844_v32 = vpop.f32.mrf.mxu1  ;;  %v4143_v31 = vcombine.low %v2244_v48, %v2246_v23  ;;  %v4140_v41 = vcombine.high %v2240_v18, %v2242_v15 }
 0x231   :  { %v4935_v39 = vpack.c.bf16 %v2132_v22, %v2128_v12  ;;  %v1732_v25 = vadd.f32 %v1731_v43, %v4884_v51  ;;  %3221 = vmatpush1.bf16.msra.mxu0 %v4091_v10  ;;  %v1843_v1 = vadd.f32 %v1842_v3, %v1730_v33  ;;  %v2135_v56 = vmax.f32 %v1841_v42, 0.0  ;;  %v2236_v33 = vld [vmem:[#allocation6 + $0x2d8] sm:$0xff] }
 0x232   :  { %v1733_v4 = vpop.f32.mrf.mxu0  ;;  %3222 = vmatprep.subr.bf16.mxu0 %v4152_v27  ;;  %v1846_v57 = vpop.f32.mrf.mxu1  ;;  %v2238_v3 = vld [vmem:[#allocation6 + $0x2f8] sm:$0xff]  ;;  %v4139_v43 = vcombine.low %v2240_v18, %v2242_v15 }
 0x233   :  { %v1845_v28 = vadd.f32 %v1844_v32, %v1732_v25  ;;  %v1734_v49 = vadd.f32 %v1733_v4, %v4880_v19  ;;  %3052 = vmatprep.mubr.bf16.mxu0 %v4935_v39  ;;  %v2136_v24 = vmax.f32 %v1843_v1, 0.0  ;;  %v5633_v18 = vld [vmem:[#allocation13_spill] sm:$0xff] }
 0x234   :  { %v1737_v44 = vpop.f32.mrf.mxu0  ;;  %3053 = vmatmul.mubr.bf16.gmra.mxu0 %v4938_v34  ;;  %v1850_v16 = vpop.f32.mrf.mxu1  ;;  %v4964_v15 = vrot.slane %v4876_v29, %v5633_v18 }
 0x235   :  { %v1847_v2 = vadd.f32 %v1846_v57, %v1734_v49  ;;  %3223 = vmatpush2.bf16.msra.mxu0 %v4151_v7  ;;  %v2139_v21 = vmax.f32 %v1845_v28, 0.0  ;;  %v1738_v53 = vadd.f32 %v1737_v44, %v4884_v51  ;;  %v4136_v7 = vcombine.high %v2236_v33, %v2238_v3  ;;  %v2232_v49 = vld [vmem:[#allocation6 + $0x298] sm:$0xff] }
 0x236   :  { %v1739_v59 = vpop.f32.mrf.mxu0  ;;  %3224 = vmatprep.subr.bf16.mxu0 %v4148_v62  ;;  %v1852_v40 = vpop.f32.mrf.mxu1  ;;  %v2234_v57 = vld [vmem:[#allocation6 + $0x2b8] sm:$0xff] }
 0x237   :  { %v2140_v17 = vmax.f32 %v1847_v2, 0.0  ;;  %v1740_v50 = vadd.f32 %v1739_v59, %v4880_v19  ;;  %v4948_v13 = vpack.c.bf16 %v2139_v21, %v2135_v56  ;;  %v1851_v37 = vadd.f32 %v1850_v16, %v1738_v53  ;;  %v2230_v56 = vld [vmem:[#allocation6 + $0x278] sm:$0xff] }
 0x238   :  { %v1741_v8 = vpop.f32.mrf.mxu0  ;;  %v1854_v5 = vpop.f32.mrf.mxu1 }
 0x239   :  { %v4945_v63 = vpack.c.bf16 %v2140_v17, %v2136_v24  ;;  %v1742_v11 = vadd.f32 %v1741_v8, %v4884_v51  ;;  %3225 = vmatpush2.bf16.msra.mxu0 %v4147_v55  ;;  %v1853_v46 = vadd.f32 %v1852_v40, %v1740_v50  ;;  %v2143_v48 = vmax.f32 %v1851_v37, 0.0  ;;  %v5634_v8 = vld [vmem:[#allocation15_spill] sm:$0xff]  ;;  %v2224_v37 = vld [vmem:[#allocation6 + $0x218] sm:$0xff] }
 0x23a   :  { %v1743_v10 = vpop.f32.mrf.mxu0  ;;  %3226 = vmatprep.subr.bf16.mxu0 %v4144_v30  ;;  %v1856_v22 = vpop.f32.mrf.mxu1  ;;  %v4135_v55 = vcombine.low %v2236_v33, %v2238_v3  ;;  %v4132_v30 = vcombine.high %v2232_v49, %v2234_v57 }
 0x23b   :  { %v1855_v27 = vadd.f32 %v1854_v5, %v1742_v11  ;;  %v1744_v12 = vadd.f32 %v1743_v10, %v4880_v19  ;;  %3062 = vmatprep.mubr.bf16.mxu0 %v4945_v63  ;;  %v2144_v4 = vmax.f32 %v1853_v46, 0.0  ;;  %v4968_v11 = vrot.slane %v4876_v29, %v5634_v8 }
 0x23c   :  { %v1747_v61 = vpop.f32.mrf.mxu0  ;;  %3063 = vmatmul.mubr.bf16.gmra.mxu0 %v4948_v13  ;;  %v1860_v38 = vpop.f32.mrf.mxu1 }
 0x23d   :  { %v1857_v0 = vadd.f32 %v1856_v22, %v1744_v12  ;;  %3227 = vmatpush2.bf16.msra.mxu0 %v4143_v31  ;;  %v2147_v25 = vmax.f32 %v1855_v27, 0.0  ;;  %v1748_v23 = vadd.f32 %v1747_v61, %v4884_v51  ;;  %v2226_v61 = vld [vmem:[#allocation6 + $0x238] sm:$0xff] }
 0x23e   :  { %v1749_v32 = vpop.f32.mrf.mxu0  ;;  %3228 = vmatprep.subr.bf16.mxu0 %v4140_v41  ;;  %v1862_v28 = vpop.f32.mrf.mxu1 }
 0x23f   :  { %v2148_v62 = vmax.f32 %v1857_v0, 0.0  ;;  %v1750_v1 = vadd.f32 %v1749_v32, %v4880_v19  ;;  %v4958_v21 = vpack.c.bf16 %v2147_v25, %v2143_v48  ;;  %v1861_v53 = vadd.f32 %v1860_v38, %v1748_v23 }
 0x240   :  { %v1751_v42 = vpop.f32.mrf.mxu0  ;;  %v1864_v16 = vpop.f32.mrf.mxu1 }
 0x241   :  { %v4955_v44 = vpack.c.bf16 %v2148_v62, %v2144_v4  ;;  %v1752_v2 = vadd.f32 %v1751_v42, %v4884_v51  ;;  %3229 = vmatpush2.bf16.msra.mxu0 %v4139_v43  ;;  %v1863_v24 = vadd.f32 %v1862_v28, %v1750_v1  ;;  %v2228_v51 = vld [vmem:[#allocation6 + $0x258] sm:$0xff]  ;;  %v2151_v29 = vmax.f32 %v1861_v53, 0.0 }
 0x242   :  { %v1753_v59 = vpop.f32.mrf.mxu0  ;;  %3230 = vmatprep.subr.bf16.mxu0 %v4136_v7  ;;  %v1866_v40 = vpop.f32.mrf.mxu1  ;;  %v4128_v27 = vcombine.high %v2228_v51, %v2230_v56  ;;  %v4127_v7 = vcombine.low %v2228_v51, %v2230_v56  ;;  %v4124_v1 = vcombine.high %v2224_v37, %v2226_v61  ;;  %v2280_v51 = vld [vmem:[#allocation6 + $0x598] sm:$0xff] }
 0x243   :  { %v1865_v17 = vadd.f32 %v1864_v16, %v1752_v2  ;;  %v1754_v50 = vadd.f32 %v1753_v59, %v4880_v19  ;;  %3072 = vmatprep.mubr.bf16.mxu0 %v4955_v44  ;;  %v4131_v19 = vcombine.low %v2232_v49, %v2234_v57  ;;  %v2152_v12 = vmax.f32 %v1863_v24, 0.0  ;;  %v2282_v56 = vld [vmem:[#allocation6 + $0x5b8] sm:$0xff] }
 0x244   :  { %v1903_v5 = vpop.f32.mrf.mxu0  ;;  %3073 = vmatmul.mubr.bf16.gmra.mxu0 %v4958_v21 }
 0x245   :  { %v1867_v31 = vadd.f32 %v1866_v40, %v1754_v50  ;;  %v2016_v10 = vpop.f32.mrf.mxu1  ;;  %3231 = vmatpush2.bf16.msra.mxu0 %v4135_v55  ;;  %v2155_v41 = vmax.f32 %v1865_v17, 0.0  ;;  %v1904_v0 = vadd.f32 %v1903_v5, %v4968_v11  ;;  %v4123_v55 = vcombine.low %v2224_v37, %v2226_v61  ;;  %v2276_v37 = vld [vmem:[#allocation6 + $0x558] sm:$0xff] }
 0x246   :  { %v1905_v46 = vpop.f32.mrf.mxu0  ;;  %3232 = vmatprep.subr.bf16.mxu0 %v4132_v30  ;;  %v2278_v61 = vld [vmem:[#allocation6 + $0x578] sm:$0xff] }
 0x247   :  { %v2156_v22 = vmax.f32 %v1867_v31, 0.0  ;;  %v1906_v33 = vadd.f32 %v1905_v46, %v4964_v15  ;;  %v2018_v3 = vpop.f32.mrf.mxu1  ;;  %v4976_v4 = vpack.c.bf16 %v2155_v41, %v2151_v29  ;;  %v2017_v23 = vadd.f32 %v2016_v10, %v1904_v0 }
 0x248   :  { %v1907_v38 = vpop.f32.mrf.mxu0 }
 0x249   :  { %v4973_v43 = vpack.c.bf16 %v2156_v22, %v2152_v12  ;;  %v1908_v25 = vadd.f32 %v1907_v38, %v4968_v11  ;;  %v2020_v32 = vpop.f32.mrf.mxu1  ;;  %3233 = vmatpush2.bf16.msra.mxu0 %v4131_v19  ;;  %v2019_v28 = vadd.f32 %v2018_v3, %v1906_v33  ;;  %v2097_v53 = vmax.f32 %v2017_v23, 0.0  ;;  %v2272_v23 = vld [vmem:[#allocation6 + $0x518] sm:$0xff] }
 0x24a   :  { %v1909_v62 = vpop.f32.mrf.mxu0  ;;  %3234 = vmatprep.subr.bf16.mxu0 %v4128_v27  ;;  %v4180_v27 = vcombine.high %v2280_v51, %v2282_v56 }
 0x24b   :  { %v2021_v49 = vadd.f32 %v2020_v32, %v1908_v25  ;;  %v1910_v57 = vadd.f32 %v1909_v62, %v4964_v15  ;;  %v2022_v48 = vpop.f32.mrf.mxu1  ;;  %3082 = vmatprep.mubr.bf16.mxu0 %v4973_v43  ;;  %v2098_v24 = vmax.f32 %v2019_v28, 0.0  ;;  %v4179_v32 = vcombine.low %v2280_v51, %v2282_v56  ;;  %v2268_v51 = vld [vmem:[#allocation6 + $0x4d8] sm:$0xff] }
 0x24c   :  { %v1913_v42 = vpop.f32.mrf.mxu0  ;;  %3083 = vmatmul.mubr.bf16.gmra.mxu0 %v4976_v4  ;;  %v2270_v56 = vld [vmem:[#allocation6 + $0x4f8] sm:$0xff] }
 0x24d   :  { %v2023_v2 = vadd.f32 %v2022_v48, %v1910_v57  ;;  %v2026_v16 = vpop.f32.mrf.mxu1  ;;  %3235 = vmatpush2.bf16.msra.mxu0 %v4127_v7  ;;  %3238 = vmatprep.mubr.bf16.mxu0 %v4893_v35  ;;  %v2101_v59 = vmax.f32 %v2021_v49, 0.0  ;;  %v1914_v5 = vadd.f32 %v1913_v42, %v4968_v11 }
 0x24e   :  { %v1915_v30 = vpop.f32.mrf.mxu0  ;;  %3236 = vmatprep.subr.bf16.mxu0 %v4124_v1  ;;  %v4176_v1 = vcombine.high %v2276_v37, %v2278_v61 }
 0x24f   :  { %v2102_v17 = vmax.f32 %v2023_v2, 0.0  ;;  %v1916_v50 = vadd.f32 %v1915_v30, %v4964_v15  ;;  %v2028_v40 = vpop.f32.mrf.mxu1  ;;  %v4987_v41 = vpack.c.bf16 %v2101_v59, %v2097_v53  ;;  %v2027_v29 = vadd.f32 %v2026_v16, %v1914_v5 }
 0x250   :  { %v1917_v31 = vpop.f32.mrf.mxu0 }
 0x251   :  { %v4984_v10 = vpack.c.bf16 %v2102_v17, %v2098_v24  ;;  %v1918_v19 = vadd.f32 %v1917_v31, %v4968_v11  ;;  %v2030_v35 = vpop.f32.mrf.mxu1  ;;  %3237 = vmatpush2.bf16.msra.mxu0 %v4123_v55  ;;  %v2029_v12 = vadd.f32 %v2028_v40, %v1916_v50  ;;  %v2105_v42 = vmax.f32 %v2027_v29, 0.0  ;;  %v2266_v29 = vld [vmem:[#allocation6 + $0x4b8] sm:$0xff] }
 0x252   :  { %v1919_v46 = vpop.f32.mrf.mxu0 }
 0x253   :  { %v2031_v22 = vadd.f32 %v2030_v35, %v1918_v19  ;;  %v1920_v33 = vadd.f32 %v1919_v46, %v4964_v15  ;;  %v2032_v3 = vpop.f32.mrf.mxu1  ;;  %3125 = vmatprep.mubr.bf16.mxu1 %v4984_v10  ;;  %v2106_v28 = vmax.f32 %v2029_v12, 0.0  ;;  %v4168_v12 = vcombine.high %v2268_v51, %v2270_v56 }
 0x254   :  { %v1923_v0 = vpop.f32.mrf.mxu0  ;;  %3126 = vmatmul.mubr.bf16.vlgmr.msra.gmra.mxu1 %v4987_v41  ;;  %3239 = vmatmul.mubr.bf16.vlgmr.msra.gmra.mxu0 %v4895_v36  ;;  %v2274_v36 = vld [vmem:[#allocation6 + $0x538] sm:$0xff] }
 0x255   :  { %v2033_v38 = vadd.f32 %v2032_v3, %v1920_v33  ;;  %v2036_v25 = vpop.f32.mrf.mxu1  ;;  %3320 = vmatpush1.bf16.msra.mxu1 %v4183_v47  ;;  %3248 = vmatprep.mubr.bf16.mxu0 %v4906_v20  ;;  %v2109_v7 = vmax.f32 %v2031_v22, 0.0  ;;  %v1924_v2 = vadd.f32 %v1923_v0, %v4968_v11  ;;  %v4175_v20 = vcombine.low %v2276_v37, %v2278_v61  ;;  %v2264_v61 = vld [vmem:[#allocation6 + $0x498] sm:$0xff] }
 0x256   :  { %v1925_v62 = vpop.f32.mrf.mxu0  ;;  %3321 = vmatprep.subr.bf16.mxu1 %v4180_v27  ;;  %v4172_v30 = vcombine.high %v2272_v23, %v2274_v36  ;;  %v4171_v35 = vcombine.low %v2272_v23, %v2274_v36  ;;  %v2260_v36 = vld [vmem:[#allocation6 + $0x458] sm:$0xff] }
 0x257   :  { %v2110_v49 = vmax.f32 %v2033_v38, 0.0  ;;  %v1926_v57 = vadd.f32 %v1925_v62, %v4964_v15  ;;  %v2038_v48 = vpop.f32.mrf.mxu1  ;;  %v5002_v55 = vpack.c.bf16 %v2109_v7, %v2105_v42  ;;  %v2037_v53 = vadd.f32 %v2036_v25, %v1924_v2  ;;  %v2262_v42 = vld [vmem:[#allocation6 + $0x478] sm:$0xff] }
 0x258   :  { %v1927_v16 = vpop.f32.mrf.mxu0  ;;  %v4167_v7 = vcombine.low %v2268_v51, %v2270_v56  ;;  %v2256_v56 = vld [vmem:[#allocation6 + $0x418] sm:$0xff] }
 0x259   :  { %v4999_v26 = vpack.c.bf16 %v2110_v49, %v2106_v28  ;;  %v1928_v6 = vadd.f32 %v1927_v16, %v4968_v11  ;;  %v2040_v47 = vpop.f32.mrf.mxu1  ;;  %3322 = vmatpush1.bf16.msra.mxu1 %v4179_v32  ;;  %v2039_v24 = vadd.f32 %v2038_v48, %v1926_v57  ;;  %v2113_v0 = vmax.f32 %v2037_v53, 0.0  ;;  %v2258_v53 = vld [vmem:[#allocation6 + $0x438] sm:$0xff] }
 0x25a   :  { %v1929_v59 = vpop.f32.mrf.mxu0  ;;  %3323 = vmatprep.subr.bf16.mxu1 %v4176_v1  ;;  %v4164_v28 = vcombine.high %v2264_v61, %v2266_v29 }
 0x25b   :  { %v2041_v17 = vadd.f32 %v2040_v47, %v1928_v6  ;;  %v1930_v50 = vadd.f32 %v1929_v59, %v4964_v15  ;;  %v2042_v40 = vpop.f32.mrf.mxu1  ;;  %3135 = vmatprep.mubr.bf16.mxu1 %v4999_v26  ;;  %v2114_v22 = vmax.f32 %v2039_v24, 0.0  ;;  %v4160_v24 = vcombine.high %v2260_v36, %v2262_v42 }
 0x25c   :  { %v1933_v5 = vpop.f32.mrf.mxu0  ;;  %3136 = vmatmul.mubr.bf16.gmra.mxu1 %v5002_v55  ;;  %3249 = vmatmul.mubr.bf16.gmra.mxu0 %v4908_v52 }
 0x25d   :  { %v2043_v31 = vadd.f32 %v2042_v40, %v1930_v50  ;;  %v2046_v19 = vpop.f32.mrf.mxu1  ;;  %3324 = vmatpush1.bf16.msra.mxu1 %v4175_v20  ;;  %3258 = vmatprep.mubr.bf16.mxu0 %v4916_v9  ;;  %v2117_v46 = vmax.f32 %v2041_v17, 0.0  ;;  %v1934_v52 = vadd.f32 %v1933_v5, %v4968_v11  ;;  %v4163_v20 = vcombine.low %v2264_v61, %v2266_v29  ;;  %v2316_v29 = vld [vmem:[#allocation6 + $0x7d8] sm:$0xff] }
 0x25e   :  { %v1935_v27 = vpop.f32.mrf.mxu0  ;;  %3325 = vmatprep.subr.bf16.mxu1 %v4172_v30 }
 0x25f   :  { %v2118_v33 = vmax.f32 %v2043_v31, 0.0  ;;  %v1936_v3 = vadd.f32 %v1935_v27, %v4964_v15  ;;  %v2048_v37 = vpop.f32.mrf.mxu1  ;;  %v5014_v62 = vpack.c.bf16 %v2117_v46, %v2113_v0  ;;  %v2047_v2 = vadd.f32 %v2046_v19, %v1934_v52  ;;  %v2318_v0 = vld [vmem:[#allocation6 + $0x7f8] sm:$0xff] }
 0x260   :  { %v1937_v38 = vpop.f32.mrf.mxu0  ;;  %v4159_v46 = vcombine.low %v2260_v36, %v2262_v42  ;;  %v2312_v42 = vld [vmem:[#allocation6 + $0x798] sm:$0xff] }
 0x261   :  { %v5011_v25 = vpack.c.bf16 %v2118_v33, %v2114_v22  ;;  %v1938_v9 = vadd.f32 %v1937_v38, %v4968_v11  ;;  %v2050_v32 = vpop.f32.mrf.mxu1  ;;  %3326 = vmatpush1.bf16.msra.mxu1 %v4171_v35  ;;  %v2049_v49 = vadd.f32 %v2048_v37, %v1936_v3  ;;  %v2121_v5 = vmax.f32 %v2047_v2, 0.0  ;;  %v2314_v2 = vld [vmem:[#allocation6 + $0x7b8] sm:$0xff] }
 0x262   :  { %v1939_v1 = vpop.f32.mrf.mxu0  ;;  %3327 = vmatprep.subr.bf16.mxu1 %v4168_v12  ;;  %v4156_v22 = vcombine.high %v2256_v56, %v2258_v53 }
 0x263   :  { %v2051_v57 = vadd.f32 %v2050_v32, %v1938_v9  ;;  %v1940_v48 = vadd.f32 %v1939_v1, %v4964_v15  ;;  %v2052_v23 = vpop.f32.mrf.mxu1  ;;  %3145 = vmatprep.mubr.bf16.mxu1 %v5011_v25  ;;  %v2122_v17 = vmax.f32 %v2049_v49, 0.0  ;;  %v4216_v49 = vcombine.high %v2316_v29, %v2318_v0 }
 0x264   :  { %v1943_v16 = vpop.f32.mrf.mxu0  ;;  %3146 = vmatmul.mubr.bf16.gmra.mxu1 %v5014_v62  ;;  %3259 = vmatmul.mubr.bf16.gmra.mxu0 %v4918_v54 }
 0x265   :  { %v2053_v6 = vadd.f32 %v2052_v23, %v1940_v48  ;;  %v2056_v47 = vpop.f32.mrf.mxu1  ;;  %3328 = vmatpush1.bf16.msra.mxu1 %v4167_v7  ;;  %3268 = vmatprep.mubr.bf16.mxu0 %v4926_v14  ;;  %v2125_v59 = vmax.f32 %v2051_v57, 0.0  ;;  %v1944_v54 = vadd.f32 %v1943_v16, %v4968_v11  ;;  %v4155_v7 = vcombine.low %v2256_v56, %v2258_v53  ;;  %v2308_v53 = vld [vmem:[#allocation6 + $0x758] sm:$0xff] }
 0x266   :  { %v1945_v30 = vpop.f32.mrf.mxu0  ;;  %3329 = vmatprep.subr.bf16.mxu1 %v4164_v28 }
 0x267   :  { %v2126_v50 = vmax.f32 %v2053_v6, 0.0  ;;  %v1946_v40 = vadd.f32 %v1945_v30, %v4964_v15  ;;  %v2058_v51 = vpop.f32.mrf.mxu1  ;;  %v5026_v27 = vpack.c.bf16 %v2125_v59, %v2121_v5  ;;  %v2057_v52 = vadd.f32 %v2056_v47, %v1944_v54  ;;  %v2310_v5 = vld [vmem:[#allocation6 + $0x778] sm:$0xff] }
 0x268   :  { %v1947_v31 = vpop.f32.mrf.mxu0  ;;  %v4215_v59 = vcombine.low %v2316_v29, %v2318_v0  ;;  %v2304_v0 = vld [vmem:[#allocation6 + $0x718] sm:$0xff] }
 0x269   :  { %v5023_v19 = vpack.c.bf16 %v2126_v50, %v2122_v17  ;;  %v1948_v14 = vadd.f32 %v1947_v31, %v4968_v11  ;;  %v2060_v35 = vpop.f32.mrf.mxu1  ;;  %3330 = vmatpush1.bf16.msra.mxu1 %v4163_v20  ;;  %v2059_v33 = vadd.f32 %v2058_v51, %v1946_v40  ;;  %v2129_v16 = vmax.f32 %v2057_v52, 0.0  ;;  %v2306_v52 = vld [vmem:[#allocation6 + $0x738] sm:$0xff] }
 0x26a   :  { %v1949_v12 = vpop.f32.mrf.mxu0  ;;  %3331 = vmatprep.subr.bf16.mxu1 %v4160_v24  ;;  %v4212_v17 = vcombine.high %v2312_v42, %v2314_v2 }
 0x26b   :  { %v2061_v3 = vadd.f32 %v2060_v35, %v1948_v14  ;;  %v1950_v37 = vadd.f32 %v1949_v12, %v4964_v15  ;;  %v2062_v61 = vpop.f32.mrf.mxu1  ;;  %3155 = vmatprep.mubr.bf16.mxu1 %v5023_v19  ;;  %v2130_v57 = vmax.f32 %v2059_v33, 0.0  ;;  %v4208_v33 = vcombine.high %v2308_v53, %v2310_v5 }
 0x26c   :  { %v1953_v38 = vpop.f32.mrf.mxu0  ;;  %3156 = vmatmul.mubr.bf16.gmra.mxu1 %v5026_v27  ;;  %3269 = vmatmul.mubr.bf16.gmra.mxu0 %v4928_v45 }
 0x26d   :  { %v2063_v9 = vadd.f32 %v2062_v61, %v1950_v37  ;;  %v2066_v32 = vpop.f32.mrf.mxu1  ;;  %3332 = vmatpush1.bf16.msra.mxu1 %v4159_v46  ;;  %3278 = vmatprep.mubr.bf16.mxu0 %v4935_v39  ;;  %v2133_v1 = vmax.f32 %v2061_v3, 0.0  ;;  %v1954_v45 = vadd.f32 %v1953_v38, %v4968_v11  ;;  %v4211_v46 = vcombine.low %v2312_v42, %v2314_v2  ;;  %v2300_v2 = vld [vmem:[#allocation6 + $0x6d8] sm:$0xff] }
 0x26e   :  { %v1955_v28 = vpop.f32.mrf.mxu0  ;;  %3333 = vmatprep.subr.bf16.mxu1 %v4156_v22 }
 0x26f   :  { %v2134_v48 = vmax.f32 %v2063_v9, 0.0  ;;  %v1956_v23 = vadd.f32 %v1955_v28, %v4964_v15  ;;  %v2068_v36 = vpop.f32.mrf.mxu1  ;;  %v5038_v30 = vpack.c.bf16 %v2133_v1, %v2129_v16  ;;  %v2067_v54 = vadd.f32 %v2066_v32, %v1954_v45  ;;  %v2302_v16 = vld [vmem:[#allocation6 + $0x6f8] sm:$0xff] }
 0x270   :  { %v1957_v6 = vpop.f32.mrf.mxu0  ;;  %v4207_v1 = vcombine.low %v2308_v53, %v2310_v5  ;;  %v2296_v5 = vld [vmem:[#allocation6 + $0x698] sm:$0xff] }
 0x271   :  { %v5035_v47 = vpack.c.bf16 %v2134_v48, %v2130_v57  ;;  %v1958_v39 = vadd.f32 %v1957_v6, %v4968_v11  ;;  %v2070_v20 = vpop.f32.mrf.mxu1  ;;  %3334 = vmatpush1.bf16.msra.mxu1 %v4155_v7  ;;  %v2069_v50 = vadd.f32 %v2068_v36, %v1956_v23  ;;  %v2137_v38 = vmax.f32 %v2067_v54, 0.0  ;;  %v2298_v54 = vld [vmem:[#allocation6 + $0x6b8] sm:$0xff] }
 0x272   :  { %v1959_v24 = vpop.f32.mrf.mxu0  ;;  %3335 = vmatprep.subr.bf16.mxu1 %v4216_v49  ;;  %v4204_v57 = vcombine.high %v2304_v0, %v2306_v52 }
 0x273   :  { %v2071_v40 = vadd.f32 %v2070_v20, %v1958_v39  ;;  %v1960_v51 = vadd.f32 %v1959_v24, %v4964_v15  ;;  %v2072_v56 = vpop.f32.mrf.mxu1  ;;  %3165 = vmatprep.mubr.bf16.mxu1 %v5035_v47  ;;  %v2138_v3 = vmax.f32 %v2069_v50, 0.0  ;;  %v4200_v50 = vcombine.high %v2300_v2, %v2302_v16 }
 0x274   :  { %v1963_v31 = vpop.f32.mrf.mxu0  ;;  %3166 = vmatmul.mubr.bf16.gmra.mxu1 %v5038_v30  ;;  %3279 = vmatmul.mubr.bf16.gmra.mxu0 %v4938_v34 }
 0x275   :  { %v2073_v14 = vadd.f32 %v2072_v56, %v1960_v51  ;;  %v2076_v35 = vpop.f32.mrf.mxu1  ;;  %3336 = vmatpush2.bf16.msra.mxu1 %v4215_v59  ;;  %3288 = vmatprep.mubr.bf16.mxu0 %v4945_v63  ;;  %v2141_v12 = vmax.f32 %v2071_v40, 0.0  ;;  %v1964_v34 = vadd.f32 %v1963_v31, %v4968_v11  ;;  %v4203_v59 = vcombine.low %v2304_v0, %v2306_v52  ;;  %v2292_v0 = vld [vmem:[#allocation6 + $0x658] sm:$0xff] }
 0x276   :  { %v1965_v22 = vpop.f32.mrf.mxu0  ;;  %3337 = vmatprep.subr.bf16.mxu1 %v4212_v17  ;;  %v2294_v52 = vld [vmem:[#allocation6 + $0x678] sm:$0xff] }
 0x277   :  { %v2142_v37 = vmax.f32 %v2073_v14, 0.0  ;;  %v1966_v61 = vadd.f32 %v1965_v22, %v4964_v15  ;;  %v2078_v29 = vpop.f32.mrf.mxu1  ;;  %v5050_v28 = vpack.c.bf16 %v2141_v12, %v2137_v38  ;;  %v2077_v45 = vadd.f32 %v2076_v35, %v1964_v34 }
 0x278   :  { %v1967_v9 = vpop.f32.mrf.mxu0  ;;  %v4199_v12 = vcombine.low %v2300_v2, %v2302_v16 }
 0x279   :  { %v5047_v32 = vpack.c.bf16 %v2142_v37, %v2138_v3  ;;  %v1968_v63 = vadd.f32 %v1967_v9, %v4968_v11  ;;  %v2080_v7 = vpop.f32.mrf.mxu1  ;;  %3338 = vmatpush2.bf16.msra.mxu1 %v4211_v46  ;;  %v2079_v48 = vadd.f32 %v2078_v29, %v1966_v61  ;;  %v2145_v31 = vmax.f32 %v2077_v45, 0.0 }
 0x27a   :  { %v1969_v49 = vpop.f32.mrf.mxu0  ;;  %3339 = vmatprep.subr.bf16.mxu1 %v4208_v33  ;;  %v4196_v3 = vcombine.high %v2296_v5, %v2298_v54  ;;  %v4195_v9 = vcombine.low %v2296_v5, %v2298_v54 }
 0x27b   :  { %v2081_v23 = vadd.f32 %v2080_v7, %v1968_v63  ;;  %v1970_v36 = vadd.f32 %v1969_v49, %v4964_v15  ;;  %v2082_v42 = vpop.f32.mrf.mxu1  ;;  %3175 = vmatprep.mubr.bf16.mxu1 %v5047_v32  ;;  %v2146_v40 = vmax.f32 %v2079_v48, 0.0  ;;  %v4192_v7 = vcombine.high %v2292_v0, %v2294_v52 }
 0x27c   :  { %v1973_v6 = vpop.f32.mrf.mxu0  ;;  %3176 = vmatmul.mubr.bf16.gmra.mxu1 %v5050_v28  ;;  %3289 = vmatmul.mubr.bf16.gmra.mxu0 %v4948_v13 }
 0x27d   :  { %v2083_v39 = vadd.f32 %v2082_v42, %v1970_v36  ;;  %v2086_v20 = vpop.f32.mrf.mxu1  ;;  %3340 = vmatpush2.bf16.msra.mxu1 %v4207_v1  ;;  %3298 = vmatprep.mubr.bf16.mxu0 %v4955_v44  ;;  %v2149_v24 = vmax.f32 %v2081_v23, 0.0  ;;  %v1974_v13 = vadd.f32 %v1973_v6, %v4968_v11  ;;  %v4191_v36 = vcombine.low %v2292_v0, %v2294_v52  ;;  %v5108_v6 = vld [vmem:[#allocation7 + $0x2] ss:$4 sm:$0xf] }
 0x27e   :  { %v1975_v17 = vpop.f32.mrf.mxu0  ;;  %3341 = vmatprep.subr.bf16.mxu1 %v4204_v57  ;;  %v2288_v57 = vld [vmem:[#allocation6 + $0x618] sm:$0xff] }
 0x27f   :  { %v2150_v51 = vmax.f32 %v2083_v39, 0.0  ;;  %v1976_v56 = vadd.f32 %v1975_v17, %v4964_v15  ;;  %v2088_v53 = vpop.f32.mrf.mxu1  ;;  %v2185_v22 = vpack.c.bf16 %v2149_v24, %v2145_v31  ;;  %v2087_v38 = vadd.f32 %v2086_v20, %v1974_v13 }
 0x280   :  { %v1977_v14 = vpop.f32.mrf.mxu0  ;;  %v5120_v17 = vrot.slane %v5108_v6, %v4483_v58 }
 0x281   :  { %v2186_v35 = vpack.c.bf16 %v2150_v51, %v2146_v40  ;;  %v1978_v46 = vadd.f32 %v1977_v14, %v4968_v11  ;;  %v2090_v44 = vpop.f32.mrf.mxu1  ;;  %3342 = vmatpush2.bf16.msra.mxu1 %v4203_v59  ;;  %v2089_v37 = vadd.f32 %v2088_v53, %v1976_v56  ;;  %v2153_v48 = vmax.f32 %v2087_v38, 0.0 }
 0x282   :  { %v1979_v33 = vpop.f32.mrf.mxu0  ;;  %3343 = vmatprep.subr.bf16.mxu1 %v4200_v50  ;;  %v5116_v59 = vrot.slane %v5108_v6, %v4489_v60  ;;  %v4419_v53 = vmov 0  }
 0x283   :  { %v2091_v61 = vadd.f32 %v2090_v44, %v1978_v46  ;;  %v1980_v29 = vadd.f32 %v1979_v33, %v4964_v15  ;;  %3185 = vmatprep.mubr.bf16.mxu1 %v2186_v35  ;;  %v2092_v34 = vpop.f32.mrf.mxu1  ;;  %v2154_v1 = vmax.f32 %v2089_v37, 0.0  ;;  %v2290_v15 = vld [vmem:[#allocation6 + $0x638] sm:$0xff]  ;;  %4227 = vset.pattern.permute.xlu1 %v4419_v53 }
 0x284   :  { %3186 = vmatmul.mubr.bf16.gmra.mxu1 %v2185_v22  ;;  %3299 = vmatmul.mubr.bf16.gmra.mxu0 %v4958_v21  ;;  %v4188_v2 = vcombine.high %v2288_v57, %v2290_v15  ;;  %v4187_v21 = vcombine.low %v2288_v57, %v2290_v15 }
 0x285   :  { %v2093_v11 = vadd.f32 %v2092_v34, %v1980_v29  ;;  %3344 = vmatpush2.bf16.msra.mxu1 %v4199_v12  ;;  %3308 = vmatprep.mubr.bf16.mxu0 %v4973_v43  ;;  %v2157_v63 = vmax.f32 %v2091_v61, 0.0 }
 0x286   :  { %3345 = vmatprep.subr.bf16.mxu1 %v4196_v3  ;;  %4228 = vset.pattern.permute.xlu0 %v4419_v53 }
 0x287   :  { %v2158_v49 = vmax.f32 %v2093_v11, 0.0  ;;  %v2189_v42 = vpack.c.bf16 %v2157_v63, %v2153_v48 }
 0x289   :  { %v2190_v23 = vpack.c.bf16 %v2158_v49, %v2154_v1  ;;  %3346 = vmatpush2.bf16.msra.mxu1 %v4195_v9 }
 0x28a   :  { %3347 = vmatprep.subr.bf16.mxu1 %v4192_v7 }
 0x28b   :  { %3195 = vmatprep.mubr.bf16.mxu1 %v2190_v23 }
 0x28c   :  { %3196 = vmatmul.mubr.bf16.gmra.mxu1 %v2189_v42  ;;  %3309 = vmatmul.mubr.bf16.gmra.mxu0 %v4976_v4 }
 0x28d   :  { %3348 = vmatpush2.bf16.msra.mxu1 %v4191_v36  ;;  %3351 = vmatprep.mubr.bf16.mxu1 %v4984_v10 }
 0x28e   :  { %3349 = vmatprep.subr.bf16.mxu1 %v4188_v2 }
 0x291   :  { %3350 = vmatpush2.bf16.msra.mxu1 %v4187_v21  ;;  %v3496_v21 = vld [vmem:[%s5617_s3] sm:$0xf] }
 0x294   :  { %3352 = vmatmul.mubr.bf16.vlgmr.msra.gmra.mxu1 %v4987_v41 }
 0x295   :  { %3361 = vmatprep.mubr.bf16.mxu1 %v4999_v26 }
 0x29c   :  { %3362 = vmatmul.mubr.bf16.gmra.mxu1 %v5002_v55 }
 0x29d   :  { %3371 = vmatprep.mubr.bf16.mxu1 %v5011_v25 }
 0x2a4   :  { %3372 = vmatmul.mubr.bf16.gmra.mxu1 %v5014_v62 }
 0x2a5   :  { %3381 = vmatprep.mubr.bf16.mxu1 %v5023_v19 }
 0x2ac   :  { %3382 = vmatmul.mubr.bf16.gmra.mxu1 %v5026_v27 }
 0x2ad   :  { %3391 = vmatprep.mubr.bf16.mxu1 %v5035_v47 }
 0x2b4   :  { %3392 = vmatmul.mubr.bf16.gmra.mxu1 %v5038_v30 }
 0x2b5   :  { %3401 = vmatprep.mubr.bf16.mxu1 %v5047_v32 }
 0x2bc   :  { %3402 = vmatmul.mubr.bf16.gmra.mxu1 %v5050_v28 }
 0x2bd   :  { %3411 = vmatprep.mubr.bf16.mxu1 %v2186_v35 }
 0x2c4   :  { %3412 = vmatmul.mubr.bf16.gmra.mxu1 %v2185_v22 }
 0x2c5   :  { %3421 = vmatprep.mubr.bf16.mxu1 %v2190_v23 }
 0x2cc   :  { %3422 = vmatmul.mubr.bf16.gmra.mxu1 %v2189_v42 }
 0x2d4   :  { %v5076_v43 = vpop.f32.mrf.mxu0 }
 0x2d6   :  { %v5078_v4 = vpop.f32.mrf.mxu0 }
 0x2d8   :  { %v5080_v10 = vpop.f32.mrf.mxu0 }
 0x2da   :  { %v5082_v41 = vpop.f32.mrf.mxu0 }
 0x2dc   :  { %v5084_v26 = vpop.f32.mrf.mxu0 }
 0x2de   :  { %v5086_v55 = vpop.f32.mrf.mxu0 }
 0x2e0   :  { %v5088_v25 = vpop.f32.mrf.mxu0 }
 0x2e2   :  { %v5090_v62 = vpop.f32.mrf.mxu0 }
 0x2e4   :  { %v5092_v19 = vpop.f32.mrf.mxu0 }
 0x2e6   :  { %v5094_v27 = vpop.f32.mrf.mxu0 }
 0x2e8   :  { %v5096_v47 = vpop.f32.mrf.mxu0 }
 0x2ea   :  { %v5098_v30 = vpop.f32.mrf.mxu0 }
 0x2ec   :  { %v5100_v32 = vpop.f32.mrf.mxu0 }
 0x2ee   :  { %v5102_v28 = vpop.f32.mrf.mxu0 }
 0x2f0   :  { %v5104_v16 = vpop.f32.mrf.mxu0 }
 0x2f2   :  { %v5106_v45 = vpop.f32.mrf.mxu0 }
 0x2f4   :  { %v5110_v39 = vpop.f32.mrf.mxu0 }
 0x2f6   :  { %v5112_v20 = vpop.f32.mrf.mxu0 }
 0x2f8   :  { %v3058_v24 = vpop.f32.mrf.mxu0 }
 0x2f9   :  { %v3059_v50 = vadd.f32 %v3058_v24, %v5116_v59 }
 0x2fa   :  { %v3060_v40 = vpop.f32.mrf.mxu0 }
 0x2fb   :  { %v3061_v51 = vadd.f32 %v3060_v40, %v5120_v17 }
 0x2fc   :  { %v5124_v56 = vpop.f32.mrf.mxu0 }
 0x2fe   :  { %v5126_v5 = vpop.f32.mrf.mxu0 }
 0x300   :  { %v5128_v54 = vpop.f32.mrf.mxu0 }
 0x302   :  { %v5130_v31 = vpop.f32.mrf.mxu0 }
 0x304   :  { %v5132_v13 = vpop.f32.mrf.mxu0 }
 0x306   :  { %v5134_v58 = vpop.f32.mrf.mxu0 }
 0x308   :  { %v5136_v14 = vpop.f32.mrf.mxu0 }
 0x30a   :  { %v5138_v35 = vpop.f32.mrf.mxu0 }
 0x30c   :  { %v5140_v46 = vpop.f32.mrf.mxu0 }
 0x30e   :  { %v5142_v44 = vpop.f32.mrf.mxu0 }
 0x310   :  { %v5144_v12 = vpop.f32.mrf.mxu0 }
 0x312   :  { %v5146_v22 = vpop.f32.mrf.mxu0 }
 0x314   :  { %v5148_v33 = vpop.f32.mrf.mxu1  ;;  %v5150_v3 = vpop.f32.mrf.mxu0 }
 0x316   :  { %v5152_v37 = vpop.f32.mrf.mxu1  ;;  %v5154_v61 = vpop.f32.mrf.mxu0 }
 0x318   :  { %v5156_v29 = vpop.f32.mrf.mxu1  ;;  %v5158_v0 = vpop.f32.mrf.mxu0 }
 0x31a   :  { %v5160_v52 = vpop.f32.mrf.mxu1  ;;  %v5164_v34 = vpop.f32.mrf.mxu0 }
 0x31b   :  { %5635 = vst [vmem:[#allocation13_spill] sm:$0xff] %v5164_v34 }
 0x31c   :  { %v5162_v38 = vpop.f32.mrf.mxu1  ;;  %v5170_v63 = vpop.f32.mrf.mxu0 }
 0x31d   :  { %5636 = vst [vmem:[#allocation15_spill] sm:$0xff] %v5170_v63 }
 0x31e   :  { %v5166_v11 = vpop.f32.mrf.mxu1  ;;  %v5176_v49 = vpop.f32.mrf.mxu0 }
 0x31f   :  { %5639 = vst [vmem:[#allocation18_spill] sm:$0xff] %v5176_v49 }
 0x320   :  { %v5168_v9 = vpop.f32.mrf.mxu1  ;;  %v5182_v48 = vpop.f32.mrf.mxu0 }
 0x321   :  { %5642 = vst [vmem:[#allocation21_spill] sm:$0xff] %v5182_v48 }
 0x322   :  { %v5172_v7 = vpop.f32.mrf.mxu1  ;;  %v5188_v42 = vpop.f32.mrf.mxu0 }
 0x323   :  { %5637 = vst [vmem:[#allocation16_spill] sm:$0xff] %v5172_v7  ;;  %5645 = vst [vmem:[#allocation24_spill] sm:$0xff] %v5188_v42 }
 0x324   :  { %v5174_v1 = vpop.f32.mrf.mxu1  ;;  %v5197_v40 = vpop.f32.mrf.mxu0 }
 0x325   :  { %5638 = vst [vmem:[#allocation17_spill] sm:$0xff] %v5174_v1  ;;  %5648 = vst [vmem:[#allocation27_spill] sm:$0xff] %v5197_v40 }
 0x326   :  { %v5178_v57 = vpop.f32.mrf.mxu1 }
 0x327   :  { %5640 = vst [vmem:[#allocation19_spill] sm:$0xff] %v5178_v57 }
 0x328   :  { %v5180_v15 = vpop.f32.mrf.mxu1 }
 0x329   :  { %5641 = vst [vmem:[#allocation20_spill] sm:$0xff] %v5180_v15  ;;  %v3497_v15 = vunpack.c.l.bf16 %v3496_v21 }
 0x32a   :  { %v5184_v23 = vpop.f32.mrf.mxu1 }
 0x32b   :  { %5643 = vst [vmem:[#allocation22_spill] sm:$0xff] %v5184_v23  ;;  %v5203_v23 = vpop.f32.mrf.mxu0  ;;  %v3502_v42 = vrot.slane %v3497_v15, %v4489_v60  ;;  %v3506_v48 = vrot.slane %v3497_v15, %v5634_v8 }
 0x32c   :  { %v5186_v36 = vpop.f32.mrf.mxu1  ;;  %5651 = vst [vmem:[#allocation30_spill] sm:$0xff] %v5203_v23 }
 0x32d   :  { %5644 = vst [vmem:[#allocation23_spill] sm:$0xff] %v5186_v36  ;;  %v5209_v57 = vpop.f32.mrf.mxu0  ;;  %v5212_v40 = vrot.slane %v3502_v42, %v4489_v60 }
 0x32e   :  { %v5190_v2 = vpop.f32.mrf.mxu1  ;;  %5653 = vst [vmem:[#allocation32_spill] sm:$0xff] %v5209_v57 }
 0x32f   :  { %5646 = vst [vmem:[#allocation25_spill] sm:$0xff] %v5190_v2 }
 0x330   :  { %v5195_v24 = vpop.f32.mrf.mxu1 }
 0x331   :  { %5647 = vst [vmem:[#allocation26_spill] sm:$0xff] %v5195_v24 }
 0x332   :  { %v5199_v53 = vpop.f32.mrf.mxu1 }
 0x333   :  { %5649 = vst [vmem:[#allocation28_spill] sm:$0xff] %v5199_v53 }
 0x334   :  { %v5201_v1 = vpop.f32.mrf.mxu1 }
 0x335   :  { %5650 = vst [vmem:[#allocation29_spill] sm:$0xff] %v5201_v1  ;;  %v5217_v1 = vrot.slane %v3506_v48, %v4489_v60 }
 0x336   :  { %v5205_v36 = vpop.f32.mrf.mxu1 }
 0x337   :  { %5652 = vst [vmem:[#allocation31_spill] sm:$0xff] %v5205_v36  ;;  %v5219_v36 = vpop.f32.mrf.mxu0 }
 0x338   :  { %v3171_v2 = vpop.f32.mrf.mxu1  ;;  %5655 = vst [vmem:[#allocation34_spill] sm:$0xff] %v5219_v36 }
 0x339   :  { %v3172_v49 = vadd.f32 %v3171_v2, %v3059_v50  ;;  %v5227_v42 = vpop.f32.mrf.mxu0 }
 0x33a   :  { %v3173_v24 = vpop.f32.mrf.mxu1 }
 0x33b   :  { %v3468_v53 = vmax.f32 %v3172_v49, 0.0  ;;  %v3174_v21 = vadd.f32 %v3173_v24, %v3061_v51  ;;  %v5658_v24 = vld [vmem:[#allocation12_spill] sm:$0xff] }
 0x33c   :  { %v5214_v63 = vpop.f32.mrf.mxu1  ;;  %v3509_v48 = vsub.s32 4, %v5658_v24 }
 0x33d   :  { %5654 = vst [vmem:[#allocation33_spill] sm:$0xff] %v5214_v63  ;;  %v3571_v23 = vmul.f32 %v5212_v40, %v3468_v53  ;;  %v3469_v34 = vmax.f32 %v3174_v21, 0.0  ;;  %v3513_v63 = vsub.s32 6, %v5658_v24  ;;  %v5237_v53 = vpop.f32.mrf.mxu0  ;;  %v3017_v24 = vadd.f32 %v5078_v4, %v5120_v17 }
 0x33e   :  { %v5222_v7 = vpop.f32.mrf.mxu1 }
 0x33f   :  { %5656 = vst [vmem:[#allocation35_spill] sm:$0xff] %v5222_v7  ;;  %v3572_v50 = vmul.f32 %v5217_v1, %v3469_v34  ;;  %v3510_v7 = vrot.slane %v3497_v15, %v3509_v48  ;;  %v3514_v34 = vrot.slane %v3497_v15, %v3513_v63  ;;  %v5257_v63 = vrot.slane %v5108_v6, %v5633_v18 }
 0x340   :  { %v5225_v2 = vpop.f32.mrf.mxu1  ;;  %v3025_v48 = vadd.f32 %v5084_v26, %v5116_v59  ;;  %v3029_v18 = vadd.f32 %v5088_v25, %v5116_v59  ;;  %v5282_v26 = vadd.f32 %v5092_v19, %v5116_v59  ;;  %v5301_v19 = vadd.f32 %v5100_v32, %v5116_v59 }
 0x341   :  { %v5229_v49 = vadd.f32 %v3572_v50, %v3571_v23  ;;  %v5245_v23 = vrot.slane %v5108_v6, %v5634_v8  ;;  %v5247_v50 = vpop.f32.mrf.mxu0  ;;  %v3021_v8 = vadd.f32 %v5082_v41, %v5120_v17  ;;  %v5269_v4 = vrot.slane %v3514_v34, %v4489_v60 }
 0x342   :  { %v5231_v51 = vpop.f32.mrf.mxu1  ;;  %v3031_v6 = vadd.f32 %v5090_v62, %v5120_v17  ;;  %v3130_v41 = vadd.f32 %v5152_v37, %v3017_v24  ;;  %v5297_v62 = vadd.f32 %v5098_v30, %v5120_v17  ;;  %v5316_v30 = vadd.f32 %v5106_v45, %v5120_v17 }
 0x343   :  { %5657 = vst [vmem:[#allocation36_spill] sm:$0xff] %v5229_v49  ;;  %v3015_v49 = vadd.f32 %v5076_v43, %v5116_v59  ;;  %v5266_v43 = vrot.slane %v3510_v7, %v4489_v60  ;;  %v5286_v7 = vadd.f32 %v5094_v27, %v5120_v17  ;;  %v5293_v34 = vpop.f32.mrf.mxu0  ;;  %v5305_v27 = vadd.f32 %v5102_v28, %v5120_v17 }
 0x344   :  { %v5235_v36 = vpop.f32.mrf.mxu1  ;;  %v3134_v37 = vadd.f32 %v5160_v52, %v3021_v8  ;;  %v5320_v32 = vadd.f32 %v5110_v39, %v5116_v59  ;;  %v5325_v28 = vadd.f32 %v5112_v20, %v5120_v17  ;;  %v5329_v52 = vadd.f32 %v5124_v56, %v5116_v59 }
 0x345   :  { %5659 = vst [vmem:[#allocation37_spill] sm:$0xff] %v5235_v36  ;;  %v3019_v36 = vadd.f32 %v5080_v10, %v5116_v59  ;;  %v3027_v10 = vadd.f32 %v5086_v55, %v5120_v17  ;;  %v5290_v55 = vadd.f32 %v5096_v47, %v5116_v59  ;;  %v3128_v25 = vadd.f32 %v5148_v33, %v3015_v49 }
 0x346   :  { %v5239_v21 = vpop.f32.mrf.mxu1  ;;  %v5312_v33 = vadd.f32 %v5104_v16, %v5116_v59  ;;  %v5333_v16 = vadd.f32 %v5126_v5, %v5120_v17  ;;  %v3433_v45 = vmax.f32 %v3130_v41, 0.0  ;;  %v5339_v39 = vadd.f32 %v5128_v54, %v5116_v59 }
 0x347   :  { %v3132_v49 = vadd.f32 %v5156_v29, %v3019_v36  ;;  %v5343_v29 = vadd.f32 %v5130_v31, %v5120_v17  ;;  %v5347_v20 = vadd.f32 %v5132_v13, %v5116_v59  ;;  %v3432_v56 = vmax.f32 %v3128_v25, 0.0  ;;  %v5349_v36 = vpop.f32.mrf.mxu0 }
 0x348   :  { %v5241_v57 = vpop.f32.mrf.mxu1  ;;  %v5353_v5 = vadd.f32 %v5134_v58, %v5120_v17  ;;  %v5357_v8 = vadd.f32 %v5136_v14, %v5116_v59  ;;  %v5361_v54 = vadd.f32 %v5138_v35, %v5120_v17  ;;  %v3437_v31 = vmax.f32 %v3134_v37, 0.0 }
 0x349   :  { %5660 = vst [vmem:[#allocation38_spill] sm:$0xff] %v5241_v57  ;;  %v5367_v13 = vadd.f32 %v5140_v46, %v5116_v59  ;;  %v5371_v25 = vadd.f32 %v5142_v44, %v5120_v17  ;;  %v3241_v58 = vadd.f32 %v5150_v3, %v5245_v23  ;;  %v3436_v14 = vmax.f32 %v3132_v49, 0.0  ;;  %v5389_v49 = vpop.f32.mrf.mxu0 }
 0x34a   :  { %v5259_v15 = vpop.f32.mrf.mxu1  ;;  %v5377_v60 = vadd.f32 %v5144_v12, %v5116_v59  ;;  %v3536_v35 = vmul.f32 %v5217_v1, %v3433_v45  ;;  %v3138_v37 = vadd.f32 %v5162_v38, %v3025_v48  ;;  %v3535_v44 = vmul.f32 %v5212_v40, %v3432_v56  ;;  %v5669_v48 = vld [vmem:[#allocation16_spill] sm:$0xff] }
 0x34b   :  { %5665 = vst [vmem:[#allocation43_spill] sm:$0xff] %v5367_v13  ;;  %5666 = vst [vmem:[#allocation44_spill] sm:$0xff] %v5371_v25  ;;  %v3243_v3 = vadd.f32 %v5154_v61, %v5257_v63  ;;  %v3245_v12 = vadd.f32 %v5158_v0, %v5245_v23  ;;  %v3540_v38 = vmul.f32 %v5217_v1, %v3437_v31  ;;  %v5672_v31 = vld [vmem:[#allocation18_spill] sm:$0xff] }
 0x34c   :  { %v5278_v57 = vpop.f32.mrf.mxu1  ;;  %5667 = vst [vmem:[#allocation45_spill] sm:$0xff] %v5377_v60  ;;  %v3599_v13 = vadd.f32 %v3536_v35, %v3535_v44 }
 0x34d   :  { %5661 = vst [vmem:[#allocation39_spill] sm:$0xff] %v5278_v57 }
 0x34e   :  { %v5308_v47 = vpop.f32.mrf.mxu1 }
 0x34f   :  { %5662 = vst [vmem:[#allocation40_spill] sm:$0xff] %v5308_v47 }
 0x350   :  { %v5335_v24 = vpop.f32.mrf.mxu1 }
 0x351   :  { %5663 = vst [vmem:[#allocation41_spill] sm:$0xff] %v5335_v24  ;;  %v3140_v24 = vadd.f32 %v5166_v11, %v3027_v10  ;;  %v3142_v11 = vadd.f32 %v5168_v9, %v3029_v18  ;;  %v3144_v10 = vadd.f32 %v5669_v48, %v3031_v6  ;;  %v3253_v9 = vadd.f32 %v5672_v31, %v5257_v63  ;;  %v5403_v18 = vpop.f32.mrf.mxu0 }
 0x352   :  { %v5363_v41 = vpop.f32.mrf.mxu1 }
 0x353   :  { %5664 = vst [vmem:[#allocation42_spill] sm:$0xff] %v5363_v41  ;;  %v5384_v41 = vadd.f32 %v5146_v22, %v5120_v17  ;;  %v3539_v17 = vmul.f32 %v5212_v40, %v3436_v14  ;;  %v5670_v22 = vld [vmem:[#allocation13_spill] sm:$0xff]  ;;  %v3441_v57 = vmax.f32 %v3140_v24, 0.0 }
 0x354   :  { %v3353_v46 = vpop.f32.mrf.mxu1  ;;  %v3247_v56 = vadd.f32 %v5670_v22, %v5257_v63  ;;  %v3444_v22 = vmax.f32 %v3142_v11, 0.0 }
 0x355   :  { %5668 = vst [vmem:[#allocation46_spill] sm:$0xff] %v5384_v41  ;;  %v3354_v59 = vadd.f32 %v3353_v46, %v3241_v58  ;;  %v3440_v41 = vmax.f32 %v3138_v37, 0.0  ;;  %v5671_v58 = vld [vmem:[#allocation15_spill] sm:$0xff]  ;;  %v3604_v47 = vadd.f32 %v3540_v38, %v3539_v17  ;;  %v3544_v25 = vmul.f32 %v5217_v1, %v3441_v57  ;;  %v5676_v57 = vld [vmem:[#allocation24_spill] sm:$0xff] }
 0x356   :  { %v3355_v45 = vpop.f32.mrf.mxu1  ;;  %v3251_v46 = vadd.f32 %v5671_v58, %v5245_v23  ;;  %v5673_v37 = vld [vmem:[#allocation19_spill] sm:$0xff] }
 0x357   :  { %v3434_v60 = vmax.f32 %v3354_v59, 0.0  ;;  %v3356_v61 = vadd.f32 %v3355_v45, %v3243_v3  ;;  %v3445_v59 = vmax.f32 %v3144_v10, 0.0  ;;  %v3150_v3 = vadd.f32 %v5673_v37, %v5286_v7  ;;  %v5415_v10 = vpop.f32.mrf.mxu0 }
 0x358   :  { %v3357_v0 = vpop.f32.mrf.mxu1  ;;  %v3543_v31 = vmul.f32 %v5212_v40, %v3440_v41 }
 0x359   :  { %v3537_v6 = vmul.f32 %v5266_v43, %v3434_v60  ;;  %v3435_v14 = vmax.f32 %v3356_v61, 0.0  ;;  %v3358_v48 = vadd.f32 %v3357_v0, %v3245_v12  ;;  %v5674_v60 = vld [vmem:[#allocation21_spill] sm:$0xff]  ;;  %v3548_v41 = vmul.f32 %v5217_v1, %v3445_v59 }
 0x35a   :  { %v3359_v45 = vpop.f32.mrf.mxu1  ;;  %v3255_v61 = vadd.f32 %v5674_v60, %v5245_v23  ;;  %v5675_v12 = vld [vmem:[#allocation17_spill] sm:$0xff]  ;;  %v3609_v59 = vadd.f32 %v3544_v25, %v3543_v31 }
 0x35b   :  { %v3438_v58 = vmax.f32 %v3358_v48, 0.0  ;;  %v3360_v24 = vadd.f32 %v3359_v45, %v3247_v56  ;;  %v3538_v35 = vmul.f32 %v5269_v4, %v3435_v14  ;;  %v3600_v44 = vadd.f32 %v3599_v13, %v3537_v6 }
 0x35c   :  { %v3148_v38 = vadd.f32 %v5675_v12, %v5282_v26  ;;  %v3363_v11 = vpop.f32.mrf.mxu1  ;;  %v3547_v13 = vmul.f32 %v5212_v40, %v3444_v22  ;;  %v3257_v6 = vadd.f32 %v5676_v57, %v5257_v63  ;;  %v3449_v14 = vmax.f32 %v3150_v3, 0.0 }
 0x35d   :  { %v3541_v7 = vmul.f32 %v5266_v43, %v3438_v58  ;;  %v3439_v17 = vmax.f32 %v3360_v24, 0.0  ;;  %v3364_v56 = vadd.f32 %v3363_v11, %v3251_v46  ;;  %v3601_v0 = vadd.f32 %v3600_v44, %v3538_v35  ;;  %v5677_v58 = vld [vmem:[#allocation20_spill] sm:$0xff]  ;;  %v5678_v24 = vld [vmem:[#allocation22_spill] sm:$0xff]  ;;  %v5427_v44 = vpop.f32.mrf.mxu0 }
 0x35e   :  { %v3365_v48 = vpop.f32.mrf.mxu1  ;;  %v3448_v12 = vmax.f32 %v3148_v38, 0.0  ;;  %v3152_v46 = vadd.f32 %v5677_v58, %v5290_v55  ;;  %v3154_v22 = vadd.f32 %v5678_v24, %v5297_v62  ;;  %v3552_v38 = vmul.f32 %v5217_v1, %v3449_v14  ;;  %v5680_v55 = vld [vmem:[#allocation30_spill] sm:$0xff] }
 0x35f   :  { %v3542_v37 = vmul.f32 %v5269_v4, %v3439_v17  ;;  %v3442_v26 = vmax.f32 %v3364_v56, 0.0  ;;  %v3366_v45 = vadd.f32 %v3365_v48, %v3253_v9  ;;  %3602 = vadd.xlane.f32.xlu0 %v3601_v0  ;;  %v3605_v60 = vadd.f32 %v3604_v47, %v3541_v7  ;;  %v5679_v9 = vld [vmem:[#allocation27_spill] sm:$0xff] }
 0x360   :  { %v3367_v35 = vpop.f32.mrf.mxu1  ;;  %v3614_v56 = vadd.f32 %v3548_v41, %v3547_v13  ;;  %v3261_v47 = vadd.f32 %v5679_v9, %v5245_v23  ;;  %v3263_v7 = vadd.f32 %v5680_v55, %v5257_v63  ;;  %v5681_v13 = vld [vmem:[#allocation25_spill] sm:$0xff] }
 0x361   :  { %v3545_v3 = vmul.f32 %v5266_v43, %v3442_v26  ;;  %v3443_v11 = vmax.f32 %v3366_v45, 0.0  ;;  %v3368_v57 = vadd.f32 %v3367_v35, %v3255_v61  ;;  %v3606_v17 = vadd.f32 %v3605_v60, %v3542_v37  ;;  %v5439_v60 = vpop.f32.mrf.mxu0 }
 0x362   :  { %v3369_v0 = vpop.f32.mrf.mxu1  ;;  %v3551_v26 = vmul.f32 %v5212_v40, %v3448_v12  ;;  %v3452_v61 = vmax.f32 %v3152_v46, 0.0  ;;  %v3453_v37 = vmax.f32 %v3154_v22, 0.0  ;;  %v3160_v41 = vadd.f32 %v5681_v13, %v5305_v27  ;;  %v5684_v46 = vld [vmem:[#allocation23_spill] sm:$0xff] }
 0x363   :  { %v3446_v62 = vmax.f32 %v3368_v57, 0.0  ;;  %v3370_v48 = vadd.f32 %v3369_v0, %v3257_v6  ;;  %3607 = vadd.xlane.f32.xlu0 %v3606_v17  ;;  %v3546_v25 = vmul.f32 %v5269_v4, %v3443_v11  ;;  %v3610_v31 = vadd.f32 %v3609_v59, %v3545_v3  ;;  %v5682_v57 = vld [vmem:[#allocation32_spill] sm:$0xff]  ;;  %v5683_v59 = vld [vmem:[#allocation34_spill] sm:$0xff] }
 0x364   :  { %v3373_v45 = vpop.f32.mrf.mxu1  ;;  %v3619_v6 = vadd.f32 %v3552_v38, %v3551_v26  ;;  %v3265_v11 = vadd.f32 %v5682_v57, %v5245_v23  ;;  %v3267_v12 = vadd.f32 %v5683_v59, %v5257_v63  ;;  %v3158_v22 = vadd.f32 %v5684_v46, %v5301_v19  ;;  %v5687_v46 = vld [vmem:[#allocation31_spill] sm:$0xff] }
 0x365   :  { %v3549_v14 = vmul.f32 %v5266_v43, %v3446_v62  ;;  %v3447_v58 = vmax.f32 %v3370_v48, 0.0  ;;  %v3374_v24 = vadd.f32 %v3373_v45, %v3261_v47  ;;  %v3611_v35 = vadd.f32 %v3610_v31, %v3546_v25  ;;  %v5685_v62 = vld [vmem:[#allocation28_spill] sm:$0xff]  ;;  %v5453_v31 = vpop.f32.mrf.mxu0 }
 0x366   :  { %v3375_v3 = vpop.f32.mrf.mxu1  ;;  %v3555_v47 = vmul.f32 %v5212_v40, %v3452_v61  ;;  %v3556_v38 = vmul.f32 %v5217_v1, %v3453_v37  ;;  %v3457_v0 = vmax.f32 %v3160_v41, 0.0  ;;  %v3164_v48 = vadd.f32 %v5685_v62, %v5316_v30  ;;  %v5686_v61 = vld [vmem:[#allocation26_spill] sm:$0xff] }
 0x367   :  { %v3550_v27 = vmul.f32 %v5269_v4, %v3447_v58  ;;  %v3450_v17 = vmax.f32 %v3374_v24, 0.0  ;;  %v3376_v9 = vadd.f32 %v3375_v3, %v3263_v7  ;;  %3612 = vadd.xlane.f32.xlu1 %v3611_v35  ;;  %v3615_v55 = vadd.f32 %v3614_v56, %v3549_v14  ;;  %v5466_v3 = vpop.f32.mrf.mxu0 }
 0x368   :  { %v3377_v25 = vpop.f32.mrf.mxu1  ;;  %v3456_v58 = vmax.f32 %v3158_v22, 0.0  ;;  %v3271_v56 = vadd.f32 %v5227_v42, %v5245_v23  ;;  %v3273_v7 = vadd.f32 %v5237_v53, %v5257_v63  ;;  %v3162_v37 = vadd.f32 %v5686_v61, %v5312_v33 }
 0x369   :  { %v3553_v19 = vmul.f32 %v5266_v43, %v3450_v17  ;;  %v3451_v26 = vmax.f32 %v3376_v9, 0.0  ;;  %v3378_v13 = vadd.f32 %v3377_v25, %v3265_v11  ;;  %v3616_v45 = vadd.f32 %v3615_v55, %v3550_v27  ;;  %v5688_v55 = vld [vmem:[#allocation29_spill] sm:$0xff] }
 0x36a   :  { %v3379_v41 = vpop.f32.mrf.mxu1  ;;  %v3624_v57 = vadd.f32 %v3556_v38, %v3555_v47  ;;  %v3560_v11 = vmul.f32 %v5217_v1, %v3457_v0  ;;  %v3461_v59 = vmax.f32 %v3164_v48, 0.0  ;;  %v3170_v42 = vadd.f32 %v5687_v46, %v5325_v28 }
 0x36b   :  { %v3554_v30 = vmul.f32 %v5269_v4, %v3451_v26  ;;  %v3454_v14 = vmax.f32 %v3378_v13, 0.0  ;;  %v3380_v24 = vadd.f32 %v3379_v41, %v3267_v12  ;;  %3617 = vadd.xlane.f32.xlu1 %v3616_v45  ;;  %v3620_v35 = vadd.f32 %v3619_v6, %v3553_v19 }
 0x36c   :  { %v3383_v22 = vpop.f32.mrf.mxu1  ;;  %v3559_v9 = vmul.f32 %v5212_v40, %v3456_v58  ;;  %v3460_v12 = vmax.f32 %v3162_v37, 0.0  ;;  %v3275_v6 = vadd.f32 %v5247_v50, %v5245_v23  ;;  %v3168_v47 = vadd.f32 %v5688_v55, %v5320_v32  ;;  %v5478_v58 = vpop.f32.mrf.mxu0 }
 0x36d   :  { %v3557_v53 = vmul.f32 %v5266_v43, %v3454_v14  ;;  %v3455_v33 = vmax.f32 %v3380_v24, 0.0  ;;  %v3384_v27 = vadd.f32 %v3383_v22, %v3271_v56  ;;  %v3621_v17 = vadd.f32 %v3620_v35, %v3554_v30  ;;  %v5689_v30 = vld [vmem:[#allocation35_spill] sm:$0xff]  ;;  %v5690_v22 = vld [vmem:[#allocation33_spill] sm:$0xff] }
 0x36e   :  { %v3385_v38 = vpop.f32.mrf.mxu1  ;;  %v3629_v25 = vadd.f32 %v3560_v11, %v3559_v9  ;;  %v3564_v19 = vmul.f32 %v5217_v1, %v3461_v59  ;;  %v3277_v26 = vadd.f32 %v5293_v34, %v5257_v63  ;;  %v3465_v13 = vmax.f32 %v3170_v42, 0.0 }
 0x36f   :  { %v3558_v28 = vmul.f32 %v5269_v4, %v3455_v33  ;;  %v3458_v0 = vmax.f32 %v3384_v27, 0.0  ;;  %v3386_v62 = vadd.f32 %v3385_v38, %v3273_v7  ;;  %3622 = vadd.xlane.f32.xlu0 %v3621_v17  ;;  %v3625_v48 = vadd.f32 %v3624_v57, %v3557_v53  ;;  %v5492_v33 = vpop.f32.mrf.mxu0 }
 0x370   :  { %v3387_v45 = vpop.f32.mrf.mxu1  ;;  %v3563_v37 = vmul.f32 %v5212_v40, %v3460_v12  ;;  %v3464_v7 = vmax.f32 %v3168_v47, 0.0  ;;  %v3281_v41 = vadd.f32 %v5349_v36, %v5245_v23  ;;  %v3180_v14 = vadd.f32 %v5689_v30, %v5333_v16 }
 0x371   :  { %v3561_v50 = vmul.f32 %v5266_v43, %v3458_v0  ;;  %v3459_v32 = vmax.f32 %v3386_v62, 0.0  ;;  %v3388_v56 = vadd.f32 %v3387_v45, %v3275_v6  ;;  %v3626_v61 = vadd.f32 %v3625_v48, %v3558_v28 }
 0x372   :  { %v3389_v24 = vpop.f32.mrf.mxu1  ;;  %v3634_v59 = vadd.f32 %v3564_v19, %v3563_v37  ;;  %v3568_v46 = vmul.f32 %v5217_v1, %v3465_v13  ;;  %v3283_v42 = vadd.f32 %v5389_v49, %v5257_v63  ;;  %v3178_v53 = vadd.f32 %v5690_v22, %v5329_v52 }
 0x373   :  { %v3562_v34 = vmul.f32 %v5269_v4, %v3459_v32  ;;  %v3462_v35 = vmax.f32 %v3388_v56, 0.0  ;;  %v3390_v57 = vadd.f32 %v3389_v24, %v3277_v26  ;;  %3627 = vadd.xlane.f32.xlu0 %v3626_v61  ;;  %v3630_v11 = vadd.f32 %v3629_v25, %v3561_v50  ;;  %v5505_v26 = vpop.f32.mrf.mxu0  ;;  %v126_v50 = vld [vmem:[#allocation7 + $0x3] sm:$0x1]  ;;  %v5691_v24 = vld [vmem:[#allocation37_spill] sm:$0xff] }
 0x374   :  { %v3393_v36 = vpop.f32.mrf.mxu1  ;;  %v3567_v12 = vmul.f32 %v5212_v40, %v3464_v7  ;;  %v3285_v6 = vadd.f32 %v5403_v18, %v5245_v23  ;;  %v3473_v55 = vmax.f32 %v3180_v14, 0.0  ;;  %v3184_v49 = vadd.f32 %v5231_v51, %v5343_v29 }
 0x375   :  { %v3565_v16 = vmul.f32 %v5266_v43, %v3462_v35  ;;  %v3463_v27 = vmax.f32 %v3390_v57, 0.0  ;;  %v3394_v17 = vadd.f32 %v3393_v36, %v3281_v41  ;;  %v3631_v9 = vadd.f32 %v3630_v11, %v3562_v34 }
 0x376   :  { %v3395_v47 = vpop.f32.mrf.mxu1  ;;  %v3639_v62 = vadd.f32 %v3568_v46, %v3567_v12  ;;  %v3287_v48 = vadd.f32 %v5415_v10, %v5257_v63  ;;  %v3472_v25 = vmax.f32 %v3178_v53, 0.0  ;;  %v3182_v19 = vadd.f32 %v5225_v2, %v5339_v39 }
 0x377   :  { %v3566_v52 = vmul.f32 %v5269_v4, %v3463_v27  ;;  %v3466_v38 = vmax.f32 %v3394_v17, 0.0  ;;  %v3396_v28 = vadd.f32 %v3395_v47, %v3283_v42  ;;  %3632 = vadd.xlane.f32.xlu0 %v3631_v9  ;;  %v3635_v0 = vadd.f32 %v3634_v59, %v3565_v16  ;;  %v5692_v27 = vld [vmem:[#allocation36_spill] sm:$0xff] }
 0x378   :  { %v3397_v18 = vpop.f32.mrf.mxu1  ;;  %v3291_v32 = vadd.f32 %v5427_v44, %v5245_v23  ;;  %v3576_v56 = vmul.f32 %v5217_v1, %v3473_v55  ;;  %v3293_v10 = vadd.f32 %v5439_v60, %v5257_v63  ;;  %v3477_v61 = vmax.f32 %v3184_v49, 0.0  ;;  %v3306_v60 = vpop.f32.mrf.mxu0 }
 0x379   :  { %v3569_v51 = vmul.f32 %v5266_v43, %v3466_v38  ;;  %v3467_v29 = vmax.f32 %v3396_v28, 0.0  ;;  %v3398_v13 = vadd.f32 %v3397_v18, %v3285_v6  ;;  %v3636_v45 = vadd.f32 %v3635_v0, %v3566_v52 }
 0x37a   :  { %v3399_v37 = vpop.f32.mrf.mxu1  ;;  %v3575_v30 = vmul.f32 %v5212_v40, %v3472_v25  ;;  %v3476_v14 = vmax.f32 %v3182_v19, 0.0  ;;  %v3188_v34 = vadd.f32 %v5691_v24, %v5347_v20  ;;  %v3190_v44 = vadd.f32 %v5239_v21, %v5353_v5  ;;  %v3310_v49 = vpop.f32.mrf.mxu0 }
 0x37b   :  { %v3570_v2 = vmul.f32 %v5269_v4, %v3467_v29  ;;  %v3470_v39 = vmax.f32 %v3398_v13, 0.0  ;;  %v3400_v7 = vadd.f32 %v3399_v37, %v3287_v48  ;;  %3637 = vadd.xlane.f32.xlu0 %v3636_v45  ;;  %v3640_v41 = vadd.f32 %v3639_v62, %v3569_v51  ;;  %v5693_v48 = vld [vmem:[#allocation38_spill] sm:$0xff] }
 0x37c   :  { %v3403_v35 = vpop.f32.mrf.mxu1  ;;  %3681 = vperm.xlu1 %4227, %v126_v50   ;;  %v3649_v42 = vadd.f32 %v3576_v56, %v3575_v30  ;;  %v3295_v22 = vadd.f32 %v5453_v31, %v5245_v23  ;;  %v3580_v53 = vmul.f32 %v5217_v1, %v3477_v61  ;;  %v3297_v20 = vadd.f32 %v5466_v3, %v5257_v63  ;;  %v5694_v50 = vld [vmem:[#allocation44_spill] sm:$0xff]  ;;  %v5697_v30 = vld [vmem:[#allocation39_spill] sm:$0xff] }
 0x37d   :  { %v3573_v57 = vmul.f32 %v5266_v43, %v3470_v39  ;;  %v3471_v11 = vmax.f32 %v3400_v7, 0.0  ;;  %v3404_v59 = vadd.f32 %v3403_v35, %v3291_v32  ;;  %v3641_v46 = vadd.f32 %v3640_v41, %v3570_v2  ;;  %v5695_v32 = vld [vmem:[#allocation40_spill] sm:$0xff]  ;;  %v5696_v41 = vld [vmem:[#allocation43_spill] sm:$0xff] }
 0x37e   :  { %v3405_v36 = vpop.f32.mrf.mxu1  ;;  %v3579_v9 = vmul.f32 %v5212_v40, %v3476_v14  ;;  %v3480_v12 = vmax.f32 %v3188_v34, 0.0  ;;  %v3481_v6 = vmax.f32 %v3190_v44, 0.0  ;;  %v3194_v31 = vadd.f32 %v5259_v15, %v5361_v54 }
 0x37f   :  { %v3574_v21 = vmul.f32 %v5269_v4, %v3471_v11  ;;  %v3474_v5 = vmax.f32 %v3404_v59, 0.0  ;;  %v3406_v16 = vadd.f32 %v3405_v36, %v3293_v10  ;;  %3642 = vadd.xlane.f32.xlu0 %v3641_v46  ;;  %v3645_v17 = vadd.f32 %v5692_v27, %v3573_v57  ;;  %v3312_v10 = vpop.f32.mrf.mxu0 }
 0x380   :  { %v3407_v55 = vpop.f32.mrf.mxu1  ;;  %v3654_v28 = vadd.f32 %v3580_v53, %v3579_v9  ;;  %v3301_v0 = vadd.f32 %v5478_v58, %v5245_v23  ;;  %v3303_v62 = vadd.f32 %v5492_v33, %v5257_v63  ;;  %v3192_v25 = vadd.f32 %v5693_v48, %v5357_v8  ;;  %v5700_v9 = vld [vmem:[#allocation45_spill] sm:$0xff] }
 0x381   :  { %v3577_v47 = vmul.f32 %v5266_v43, %v3474_v5  ;;  %v3475_v3 = vmax.f32 %v3406_v16, 0.0  ;;  %v3408_v52 = vadd.f32 %v3407_v55, %v3295_v22  ;;  %v5531_v38 = vadd.f32 %v3645_v17, %v3574_v21  ;;  %v5699_v22 = vld [vmem:[#allocation42_spill] sm:$0xff] }
 0x382   :  { %v3409_v19 = vpop.f32.mrf.mxu1  ;;  %v3583_v29 = vmul.f32 %v5212_v40, %v3480_v12  ;;  %v3584_v13 = vmul.f32 %v5217_v1, %v3481_v6  ;;  %v3485_v45 = vmax.f32 %v3194_v31, 0.0  ;;  %v3200_v58 = vadd.f32 %v5695_v32, %v5694_v50  ;;  %v5701_v12 = vld [vmem:[#allocation41_spill] sm:$0xff] }
 0x383   :  { %v3578_v15 = vmul.f32 %v5269_v4, %v3475_v3  ;;  %v3478_v54 = vmax.f32 %v3408_v52, 0.0  ;;  %v3410_v18 = vadd.f32 %v3409_v19, %v3297_v20  ;;  %v3650_v51 = vadd.f32 %v3649_v42, %v3577_v47  ;;  %v5698_v42 = vld [vmem:[#allocation46_spill] sm:$0xff]  ;;  %v3314_v20 = vpop.f32.mrf.mxu0 }
 0x384   :  { %v3413_v56 = vpop.f32.mrf.mxu1  ;;  %v3484_v2 = vmax.f32 %v3192_v25, 0.0  ;;  %v3305_v39 = vadd.f32 %v5505_v26, %v5245_v23  ;;  %v3307_v7 = vadd.f32 %v3306_v60, %v5257_v63  ;;  %v3198_v14 = vadd.f32 %v5697_v30, %v5696_v41 }
 0x385   :  { %v3581_v33 = vmul.f32 %v5266_v43, %v3478_v54  ;;  %v3479_v61 = vmax.f32 %v3410_v18, 0.0  ;;  %v3414_v8 = vadd.f32 %v3413_v56, %v3301_v0  ;;  %v3651_v37 = vadd.f32 %v3650_v51, %v3578_v15  ;;  %v3316_v19 = vpop.f32.mrf.mxu0 }
 0x386   :  { %v3415_v24 = vpop.f32.mrf.mxu1  ;;  %v3659_v11 = vadd.f32 %v3584_v13, %v3583_v29  ;;  %v3588_v59 = vmul.f32 %v5217_v1, %v3485_v45  ;;  %v3489_v46 = vmax.f32 %v3200_v58, 0.0  ;;  %v3204_v53 = vadd.f32 %v5699_v22, %v5698_v42 }
 0x387   :  { %v3582_v34 = vmul.f32 %v5269_v4, %v3479_v61  ;;  %v3482_v44 = vmax.f32 %v3414_v8, 0.0  ;;  %v3416_v35 = vadd.f32 %v3415_v24, %v3303_v62  ;;  %3652 = vadd.xlane.f32.xlu0 %v3651_v37  ;;  %v3655_v57 = vadd.f32 %v3654_v28, %v3581_v33 }
 0x388   :  { %v3417_v26 = vpop.f32.mrf.mxu1  ;;  %v3587_v16 = vmul.f32 %v5212_v40, %v3484_v2  ;;  %v3488_v27 = vmax.f32 %v3198_v14, 0.0  ;;  %v3311_v17 = vadd.f32 %v3310_v49, %v5245_v23  ;;  %v3202_v6 = vadd.f32 %v5701_v12, %v5700_v9 }
 0x389   :  { %v3585_v60 = vmul.f32 %v5266_v43, %v3482_v44  ;;  %v3483_v36 = vmax.f32 %v3416_v35, 0.0  ;;  %v3418_v21 = vadd.f32 %v3417_v26, %v3305_v39  ;;  %v3656_v5 = vadd.f32 %v3655_v57, %v3582_v34 }
 0x38a   :  { %v3419_v31 = vpop.f32.mrf.mxu1  ;;  %v3664_v28 = vadd.f32 %v3588_v59, %v3587_v16  ;;  %v3592_v0 = vmul.f32 %v5217_v1, %v3489_v46  ;;  %v3313_v62 = vadd.f32 %v3312_v10, %v5257_v63  ;;  %v3493_v48 = vmax.f32 %v3204_v53, 0.0  ;;  %v5703_v16 = vld [vmem:[#allocation14_spill] sm:$0xff] }
 0x38b   :  { %v3586_v55 = vmul.f32 %v5269_v4, %v3483_v36  ;;  %v3486_v47 = vmax.f32 %v3418_v21, 0.0  ;;  %v3420_v3 = vadd.f32 %v3419_v31, %v3307_v7  ;;  %3657 = vadd.xlane.f32.xlu0 %v3656_v5  ;;  %v3660_v52 = vadd.f32 %v3659_v11, %v3585_v60  ;;  %v5702_v60 = vld [vmem:[#allocation12_spill] sm:$0xff] }
 0x38c   :  { %v3423_v25 = vpop.f32.mrf.mxu1  ;;  %v3591_v51 = vmul.f32 %v5212_v40, %v3488_v27  ;;  %v3492_v29 = vmax.f32 %v3202_v6, 0.0  ;;  %v3315_v13 = vadd.f32 %v3314_v20, %v5245_v23  ;;  %v3596_v33 = vmul.f32 %v5217_v1, %v3493_v48 }
 0x38d   :  { %v3589_v49 = vmul.f32 %v5266_v43, %v3486_v47  ;;  %v3487_v15 = vmax.f32 %v3420_v3, 0.0  ;;  %v3424_v54 = vadd.f32 %v3423_v25, %v3311_v17  ;;  %v3661_v18 = vadd.f32 %v3660_v52, %v3586_v55 }
 0x38e   :  { %v3425_v45 = vpop.f32.mrf.mxu1  ;;  %v3669_v10 = vadd.f32 %v3592_v0, %v3591_v51  ;;  %v3317_v61 = vadd.f32 %v3316_v19, %v5257_v63  ;;  %v3595_v23 = vmul.f32 %v5212_v40, %v3492_v29  ;;  %v4420_v40 = vmov 839922192  }
 0x38f   :  { %v3590_v50 = vmul.f32 %v5269_v4, %v3487_v15  ;;  %v3490_v32 = vmax.f32 %v3424_v54, 0.0  ;;  %v3426_v58 = vadd.f32 %v3425_v45, %v3313_v62  ;;  %3662 = vadd.xlane.f32.xlu0 %v3661_v18  ;;  %v3665_v56 = vadd.f32 %v3664_v28, %v3589_v49 }
 0x390   :  { %v3427_v8 = vpop.f32.mrf.mxu1  ;;  %v3674_v44 = vadd.f32 %v3596_v33, %v3595_v23  ;;  %v3685_v46 = vunpack.c.l.s4 %v4420_v40 }
 0x391   :  { %v3593_v37 = vmul.f32 %v5266_v43, %v3490_v32  ;;  %v3491_v2 = vmax.f32 %v3426_v58, 0.0  ;;  %v3428_v39 = vadd.f32 %v3427_v8, %v3315_v13  ;;  %v3666_v7 = vadd.f32 %v3665_v56, %v3590_v50 }
 0x392   :  { %v3429_v41 = vpop.f32.mrf.mxu1  ;;  %v3686_v53 = vunpack.c.0.s8 %v3685_v46 }
 0x393   :  { %v3594_v30 = vmul.f32 %v5269_v4, %v3491_v2  ;;  %v3494_v14 = vmax.f32 %v3428_v39, 0.0  ;;  %v3430_v24 = vadd.f32 %v3429_v41, %v3317_v61  ;;  %3667 = vadd.xlane.f32.xlu0 %v3666_v7  ;;  %v3670_v34 = vadd.f32 %v3669_v10, %v3593_v37 }
 0x394   :  { %v3689_v36 = vsub.s32 %v3686_v53, %v5702_v60  ;;  %v5704_v61 = vlaneseq }
 0x395   :  { %v3597_v1 = vmul.f32 %v5266_v43, %v3494_v14  ;;  %v3495_v35 = vmax.f32 %v3430_v24, 0.0  ;;  %v3671_v63 = vadd.f32 %v3670_v34, %v3594_v30 }
 0x396   :  { %v5577_v8 = vand.u32 127, %v5704_v61 }
 0x397   :  { %v3598_v57 = vmul.f32 %v5269_v4, %v3495_v35  ;;  %3672 = vadd.xlane.f32.xlu0 %v3671_v63  ;;  %v3675_v11 = vadd.f32 %v3674_v44, %v3597_v1 }
 0x398   :  { %v3783_v2 = vadd.s32 4294967288, %v5577_v8  ;;  %v3790_v39 = vadd.s32 4294967280, %v5577_v8  ;;  %v3797_v7 = vadd.s32 4294967272, %v5577_v8  ;;  %v3804_v23 = vadd.s32 4294967264, %v5577_v8 }
 0x399   :  { %v3676_v59 = vadd.f32 %v3675_v11, %v3598_v57  ;;  %v3781_v30 = vsub.s32 %v5577_v8, %v5702_v60  ;;  %v3811_v14 = vadd.s32 4294967256, %v5577_v8  ;;  %v3818_v1 = vadd.s32 4294967248, %v5577_v8 }
 0x39a   :  { %v3786_v41 = vsub.s32 %v3783_v2, %v5702_v60  ;;  %v3793_v44 = vsub.s32 %v3790_v39, %v5702_v60  ;;  %v3800_v35 = vsub.s32 %v3797_v7, %v5702_v60  ;;  %v3807_v63 = vsub.s32 %v3804_v23, %v5702_v60 }
 0x39b   :  { %3677 = vadd.xlane.f32.xlu0 %v3676_v59  ;;  %v3814_v59 = vsub.s32 %v3811_v14, %v5702_v60  ;;  %v3821_v46 = vsub.s32 %v3818_v1, %v5702_v60  ;;  %v3825_v53 = vadd.s32 4294967240, %v5577_v8 }
 0x3a0   :  { %3647 = vadd.xlane.f32.xlu1 %v5531_v38 }
 0x3e8   :  { %v3603_v42 = vpop.xlane.xlu0 %3602 }
 0x3ec   :  { %v3608_v26 = vpop.xlane.xlu0 %3607 }
 0x3f0   :  { %v3613_v22 = vpop.xlane.xlu1 %3612 }
 0x3f4   :  { %v3618_v20 = vpop.xlane.xlu1 %3617 }
 0x3f8   :  { %v3682_v43 = vpop.permute.xlu1 %3681  ;;  %v3623_v21 = vpop.xlane.xlu0 %3622 }
 0x3f9   :  { %v3690_v5 = vrot.slane %v3682_v43, %v3689_v36 }
 0x3fb   :  { %v3695_v4 = vrot.slane %v3690_v5, %v5703_v16 }
 0x3fc   :  { %v3628_v27 = vpop.xlane.xlu0 %3627 }
 0x3fd   :  { %v3697_v17 = vadd.f32 %v3695_v4, %v3603_v42  ;;  %v3698_v9 = vadd.f32 %v3695_v4, %v3608_v26  ;;  %v3699_v12 = vadd.f32 %v3695_v4, %v3613_v22  ;;  %v3700_v55 = vadd.f32 %v3695_v4, %v3618_v20 }
 0x3fe   :  { %v3701_v47 = vadd.f32 %v3695_v4, %v3623_v21  ;;  %v3702_v52 = vadd.f32 %v3695_v4, %v3628_v27  ;;  %v3832_v42 = vadd.s32 4294967232, %v5577_v8  ;;  %v3839_v21 = vadd.s32 4294967224, %v5577_v8 }
 0x3ff   :  { %3730 = vperm.xlu0 %4228, %v3697_v17   ;;  %3733 = vperm.xlu1 %4227, %v3698_v9   ;;  %v3828_v17 = vsub.s32 %v3825_v53, %v5702_v60 }
 0x400   :  { %v3633_v38 = vpop.xlane.xlu0 %3632 }
 0x401   :  { %v3703_v0 = vadd.f32 %v3695_v4, %v3633_v38 }
 0x403   :  { %3736 = vperm.xlu1 %4227, %v3699_v12   ;;  %v3846_v12 = vadd.s32 4294967216, %v5577_v8 }
 0x404   :  { %v3638_v6 = vpop.xlane.xlu0 %3637 }
 0x405   :  { %v3704_v31 = vadd.f32 %v3695_v4, %v3638_v6 }
 0x407   :  { %3739 = vperm.xlu1 %4227, %v3700_v55   ;;  %3751 = vperm.xlu0 %4228, %v3704_v31   ;;  %v3842_v55 = vsub.s32 %v3839_v21, %v5702_v60 }
 0x408   :  { %v3643_v3 = vpop.xlane.xlu0 %3642 }
 0x409   :  { %v3705_v48 = vadd.f32 %v3695_v4, %v3643_v3 }
 0x40b   :  { %3742 = vperm.xlu1 %4227, %v3701_v47   ;;  %v3853_v47 = vadd.s32 4294967208, %v5577_v8 }
 0x40f   :  { %3745 = vperm.xlu1 %4227, %v3702_v52  }
 0x410   :  { %v3653_v28 = vpop.xlane.xlu0 %3652 }
 0x411   :  { %v3707_v19 = vadd.f32 %v3695_v4, %v3653_v28 }
 0x413   :  { %3748 = vperm.xlu1 %4227, %v3703_v0   ;;  %v3849_v0 = vsub.s32 %v3846_v12, %v5702_v60 }
 0x414   :  { %v3658_v62 = vpop.xlane.xlu0 %3657 }
 0x415   :  { %v3708_v13 = vadd.f32 %v3695_v4, %v3658_v62  ;;  %v3860_v62 = vadd.s32 4294967200, %v5577_v8 }
 0x417   :  { %3754 = vperm.xlu1 %4227, %v3705_v48  }
 0x418   :  { %v3663_v25 = vpop.xlane.xlu0 %3662 }
 0x419   :  { %v3709_v15 = vadd.f32 %v3695_v4, %v3663_v25 }
 0x41b   :  { %3760 = vperm.xlu1 %4227, %v3707_v19  }
 0x41c   :  { %v3668_v49 = vpop.xlane.xlu0 %3667 }
 0x41d   :  { %v3710_v45 = vadd.f32 %v3695_v4, %v3668_v49  ;;  %v3856_v49 = vsub.s32 %v3853_v47, %v5702_v60 }
 0x41f   :  { %3766 = vperm.xlu1 %4227, %v3709_v15   ;;  %v3867_v15 = vadd.s32 4294967192, %v5577_v8 }
 0x420   :  { %v3673_v54 = vpop.xlane.xlu0 %3672 }
 0x421   :  { %v3711_v18 = vadd.f32 %v3695_v4, %v3673_v54 }
 0x423   :  { %3772 = vperm.xlu1 %4227, %v3711_v18  }
 0x424   :  { %v3678_v50 = vpop.xlane.xlu0 %3677 }
 0x425   :  { %v3712_v32 = vadd.f32 %v3695_v4, %v3678_v50 }
 0x429   :  { %v3648_v51 = vpop.xlane.xlu1 %3647 }
 0x42a   :  { %v3706_v29 = vadd.f32 %v3695_v4, %v3648_v51  ;;  %v3835_v4 = vsub.s32 %v3832_v42, %v5702_v60 }
 0x42c   :  { %3757 = vperm.xlu0 %4228, %v3706_v29  }
 0x430   :  { %3763 = vperm.xlu0 %4228, %v3708_v13   ;;  %v3863_v13 = vsub.s32 %v3860_v62, %v5702_v60 }
 0x434   :  { %3769 = vperm.xlu0 %4228, %v3710_v45   ;;  %v3874_v45 = vadd.s32 4294967184, %v5577_v8 }
 0x438   :  { %3775 = vperm.xlu0 %4228, %v3712_v32  }
 0x47a   :  { %v3734_v58 = vpop.permute.xlu1 %3733  ;;  %v3731_v34 = vpop.permute.xlu0 %3730 }
 0x47b   :  { %v3787_v57 = vrot.slane %v3734_v58, %v3786_v41  ;;  %v3782_v11 = vrot.slane %v3731_v34, %v3781_v30  ;;  %v3870_v58 = vsub.s32 %v3867_v15, %v5702_v60 }
 0x47d   :  { %v3789_v36 = vsel %vm3788_vm0, %v3787_v57, %v3782_v11 }
 0x47e   :  { %v3737_v56 = vpop.permute.xlu1 %3736 }
 0x47f   :  { %v3794_v40 = vrot.slane %v3737_v56, %v3793_v44  ;;  %v3881_v56 = vadd.s32 4294967176, %v5577_v8 }
 0x481   :  { %v3796_v5 = vsel %vm3795_vm1, %v3794_v40, %v3789_v36  ;;  %v3884_v23 = vsub.s32 %v3881_v56, %v5702_v60 }
 0x482   :  { %v3740_v10 = vpop.permute.xlu1 %3739  ;;  %v3752_v9 = vpop.permute.xlu0 %3751 }
 0x483   :  { %v3801_v22 = vrot.slane %v3740_v10, %v3800_v35  ;;  %v3829_v28 = vrot.slane %v3752_v9, %v3828_v17 }
 0x485   :  { %v3803_v27 = vsel %vm3802_vm2, %v3801_v22, %v3796_v5 }
 0x486   :  { %v3743_v33 = vpop.permute.xlu1 %3742 }
 0x487   :  { %v3808_v20 = vrot.slane %v3743_v33, %v3807_v63 }
 0x489   :  { %v3810_v38 = vsel %vm3809_vm3, %v3808_v20, %v3803_v27 }
 0x48a   :  { %v3746_v37 = vpop.permute.xlu1 %3745 }
 0x48b   :  { %v3815_v43 = vrot.slane %v3746_v37, %v3814_v59  ;;  %v3877_v37 = vsub.s32 %v3874_v45, %v5702_v60 }
 0x48d   :  { %v3817_v6 = vsel %vm3816_vm4, %v3815_v43, %v3810_v38 }
 0x48e   :  { %v3749_v24 = vpop.permute.xlu1 %3748 }
 0x48f   :  { %v3822_v16 = vrot.slane %v3749_v24, %v3821_v46 }
 0x491   :  { %v3824_v3 = vsel %vm3823_vm5, %v3822_v16, %v3817_v6 }
 0x492   :  { %v3755_v26 = vpop.permute.xlu1 %3754  ;;  %v3831_v25 = vsel %vm3830_vm6, %v3829_v28, %v3824_v3 }
 0x493   :  { %v3836_v52 = vrot.slane %v3755_v26, %v3835_v4 }
 0x495   :  { %v3838_v54 = vsel %vm3837_vm7, %v3836_v52, %v3831_v25 }
 0x496   :  { %v3761_v31 = vpop.permute.xlu1 %3760 }
 0x497   :  { %v3850_v29 = vrot.slane %v3761_v31, %v3849_v0 }
 0x49a   :  { %v3767_v18 = vpop.permute.xlu1 %3766 }
 0x49b   :  { %v3864_v61 = vrot.slane %v3767_v18, %v3863_v13 }
 0x49e   :  { %v3773_v39 = vpop.permute.xlu1 %3772 }
 0x49f   :  { %v3878_v14 = vrot.slane %v3773_v39, %v3877_v37 }
 0x4a7   :  { %v3758_v48 = vpop.permute.xlu0 %3757 }
 0x4a8   :  { %v3843_v19 = vrot.slane %v3758_v48, %v3842_v55 }
 0x4aa   :  { %v3845_v51 = vsel %vm3844_vm8, %v3843_v19, %v3838_v54 }
 0x4ab   :  { %v3764_v50 = vpop.permute.xlu0 %3763  ;;  %v3852_v10 = vsel %vm3851_vm9, %v3850_v29, %v3845_v51 }
 0x4ac   :  { %v3857_v32 = vrot.slane %v3764_v50, %v3856_v49 }
 0x4ae   :  { %v3859_v33 = vsel %vm3858_vm10, %v3857_v32, %v3852_v10 }
 0x4af   :  { %v3770_v2 = vpop.permute.xlu0 %3769  ;;  %v3866_v41 = vsel %vm3865_vm11, %v3864_v61, %v3859_v33 }
 0x4b0   :  { %v3871_v7 = vrot.slane %v3770_v2, %v3870_v58 }
 0x4b2   :  { %v3873_v30 = vsel %vm3872_vm12, %v3871_v7, %v3866_v41 }
 0x4b3   :  { %v3776_v24 = vpop.permute.xlu0 %3775  ;;  %v3880_v8 = vsel %vm3879_vm13, %v3878_v14, %v3873_v30 }
 0x4b4   :  { %v3885_v34 = vrot.slane %v3776_v24, %v3884_v23 }
 0x4b6   :  { %v3887_v44 = vsel %vm3886_vm14, %v3885_v34, %v3880_v8 }
 0x4b7   :  { %3889 = vst [vmem:[%s5619_s5] sm:$0x1] %v3887_v44 }
 0x4b8   :  { %3894 = vsyncpa [#allocation3], 1 }
 0x4b9   :  { %3895 = vsyncpa [#allocation5], 1 }
 0x4ba   :  { %3896 = vsyncpa [#allocation8], 1 }

</bundles_post_ra>
